<compile_context>
chip_gen: v7x
topology: tpu7x:2x2x1
jax: 0.10.0
libtpu: 0.0.40
codegen_flags: <defaults>
</compile_context>

<pallas_src>
import functools

import numpy as np

import jax
import jax.numpy as jnp
from jax.experimental import pallas as pl
from jax.experimental.pallas import tpu as pltpu

BN_EPS = 1e-5
LANES = 128


# --------------------------------------------------------------------------- #
# Architecture description (mirrors Encoder/Decoder, n_extra_layers = 0).
# Each entry: (C_in, C_out, K, stride, pad, has_bn, act).
# --------------------------------------------------------------------------- #
def encoder_layer_shapes(isize, nz, nc, ndf):
    layers = [(nc, ndf, 4, 2, 1, False, "lrelu")]
    csize, cndf = isize // 2, ndf
    while csize > 4:
        layers.append((cndf, cndf * 2, 4, 2, 1, True, "lrelu"))
        cndf *= 2
        csize //= 2
    layers.append((cndf, nz, 4, 1, 0, False, "none"))
    return layers


def decoder_layer_shapes(isize, nz, nc, ngf):
    cngf, tisize = ngf // 2, 4
    while tisize != isize:
        cngf *= 2
        tisize *= 2
    layers = [(nz, cngf, 4, 1, 0, True, "relu")]
    csize = 4
    while csize < isize // 2:
        layers.append((cngf, cngf // 2, 4, 2, 1, True, "relu"))
        cngf //= 2
        csize *= 2
    layers.append((cngf, nc, 4, 2, 1, False, "tanh"))
    return layers


# --------------------------------------------------------------------------- #
# One-time lowering of conv weights to dense "flattened activation" matrices.
# Flattening convention: x_flat[b, c*L + l]  (channel-major, NCL).
# --------------------------------------------------------------------------- #
def conv1d_matrix(w, L_in, stride, pad):
    """Conv1d weight (C_out, C_in, K) -> dense (C_in*L_in, C_out*L_out)."""
    C_out, C_in, K = w.shape
    L_out = (L_in + 2 * pad - K) // stride + 1
    j = jnp.arange(L_in)
    lo = jnp.arange(L_out)
    k = j[:, None] - lo[None, :] * stride + pad              # (L_in, L_out)
    valid = (k >= 0) & (k < K)
    wg = w[:, :, jnp.clip(k, 0, K - 1)]                      # (C_out, C_in, L_in, L_out)
    wg = jnp.where(valid[None, None], wg, 0.0)
    mat = jnp.transpose(wg, (1, 2, 0, 3)).reshape(C_in * L_in, C_out * L_out)
    return mat, L_out


def convt1d_matrix(wt, L_in, stride, pad):
    """ConvTranspose1d weight (C_in, C_out, K) -> dense (C_in*L_in, C_out*L_out)."""
    C_in, C_out, K = wt.shape
    L_out = (L_in - 1) * stride - 2 * pad + K
    li = jnp.arange(L_in)
    lo = jnp.arange(L_out)
    k = lo[None, :] - li[:, None] * stride + pad             # (L_in, L_out)
    valid = (k >= 0) & (k < K)
    wg = wt[:, :, jnp.clip(k, 0, K - 1)]                     # (C_in, C_out, L_in, L_out)
    wg = jnp.where(valid[None, None], wg, 0.0)
    mat = jnp.transpose(wg, (0, 2, 1, 3)).reshape(C_in * L_in, C_out * L_out)
    return mat, L_out


def bn_avg_matrix(C, L):
    """(C*L, C*L): row_vec @ M averages over the L positions of each channel
    and broadcasts the per-channel value back to every position."""
    return jnp.kron(jnp.eye(C, dtype=jnp.float32),
                    jnp.full((L, L), 1.0 / L, dtype=jnp.float32))


# --------------------------------------------------------------------------- #
# Parameter construction (deterministic; same shapes as the torch module).
# --------------------------------------------------------------------------- #
def _w(key, shape, scale=0.1):
    return jax.random.normal(key, shape, jnp.float32) * scale


def make_netg_params(key, feature_number, isize, nz, nc, ngf):
    enc_shapes = encoder_layer_shapes(isize, nz, nc, ngf)
    dec_shapes = decoder_layer_shapes(isize, nz, nc, ngf)
    n_keys = 4 + 2 * len(enc_shapes) + len(dec_shapes)
    keys = iter(jax.random.split(key, n_keys))
    return dict(
        fd_w=_w(next(keys), (32, feature_number)),            # nn.Linear(F, 32)
        fd_b=_w(next(keys), (32,)),
        enc1=[_w(next(keys), (co, ci, k)) for (ci, co, k, *_) in enc_shapes],
        dec=[_w(next(keys), (ci, co, k)) for (ci, co, k, *_) in dec_shapes],
        fe_w=_w(next(keys), (feature_number, 32)),             # nn.Linear(32, F)
        fe_b=_w(next(keys), (feature_number,)),
        enc2=[_w(next(keys), (co, ci, k)) for (ci, co, k, *_) in enc_shapes],
    )


# --------------------------------------------------------------------------- #
# Setup: lower torch-style parameters into ONE (n_blocks*128, 128) f32 slab of
# zero-padded 128x128 blocks plus static per-layer metadata.
# --------------------------------------------------------------------------- #
def prepare_netg(params, F, isize, nz, nc, ngf):
    enc_shapes = encoder_layer_shapes(isize, nz, nc, ngf)
    dec_shapes = decoder_layer_shapes(isize, nz, nc, ngf)

    def lower_stack(weights, shapes, L_in, is_transpose):
        mats, bnk, acts = [], [], []
        L = L_in
        for w, (ci, co, k, s, p, has_bn, a) in zip(weights, shapes):
            m, L = (convt1d_matrix if is_transpose else conv1d_matrix)(w, L, s, p)
            mats.append(m)
            bnk.append((co, L) if has_bn else None)
            acts.append(a)
        return mats, bnk, acts, L, shapes[-1][1]

    enc1_mats, enc_bnk, enc_act, encL, encC = lower_stack(params["enc1"], enc_shapes, isize, False)
    dec_mats, dec_bnk, dec_act, decL, decC = lower_stack(params["dec"], dec_shapes, encL, True)
    enc2_mats, enc2_bnk, enc2_act, _, _ = lower_stack(params["enc2"], enc_shapes, isize, False)

    gen_w = nc * isize
    assert encC == nz and encL == 1
    assert decC == nc and decL == isize
    assert gen_w == 32, "decoder output must flatten to 32 lanes for feature_expand"
    assert not enc_shapes[0][5] and enc_shapes[0][6] == "lrelu"   # exact fd fold
    assert F + 1 <= LANES and gen_w + 1 <= LANES
    assert F + 2 * nz <= LANES                                    # packed output fits

    bn_keys = []

    def bn_index(key):
        if key is None:
            return -1
        if key not in bn_keys:
            bn_keys.append(key)
        return bn_keys.index(key)

    blocks = []

    def add_block(mat, row_off=0, col_off=0):
        r, c = mat.shape
        assert row_off + r <= LANES and col_off + c <= LANES
        b = jnp.zeros((LANES, LANES), jnp.float32)
        b = b.at[row_off:row_off + r, col_off:col_off + c].set(mat.astype(jnp.float32))
        blocks.append(b)
        return len(blocks) - 1

    # --- encoder1 layer 0, fused with feature_dec (W = fd_w.T @ M0; bias row
    #     at lane F consumed by the constant-one lane of the padded input).
    w0 = jnp.concatenate(
        [params["fd_w"].T @ enc1_mats[0],
         (params["fd_b"] @ enc1_mats[0])[None, :]], axis=0)
    enc1_layers = [(add_block(w0), bn_index(enc_bnk[0]), enc_act[0])]
    for m, k, a in zip(enc1_mats[1:], enc_bnk[1:], enc_act[1:]):
        enc1_layers.append((add_block(m), bn_index(k), a))

    # --- decoder
    dec_layers = [(add_block(m), bn_index(k), a)
                  for m, k, a in zip(dec_mats, dec_bnk, dec_act)]

    # --- tail: feature_expand || encoder2 layer 0 in one matrix; fe_b sits in
    #     row `gen_w`, fed by a constant-one lane injected into `gen`.
    off2 = F
    assert off2 + enc2_mats[0].shape[1] <= LANES
    tail = jnp.zeros((LANES, LANES), jnp.float32)
    tail = tail.at[:gen_w, :F].set(params["fe_w"].T.astype(jnp.float32))
    tail = tail.at[gen_w, :F].set(params["fe_b"].astype(jnp.float32))
    tail = tail.at[:gen_w, off2:off2 + enc2_mats[0].shape[1]].set(
        enc2_mats[0].astype(jnp.float32))
    blocks.append(tail)
    tail_blk = len(blocks) - 1

    # --- encoder2 layers 1.. ; layer 1 is row-shifted by off2 so it consumes
    #     the tail's lane placement directly (imag lanes hit zero rows).
    enc2_layers = [(add_block(enc2_mats[1], row_off=off2),
                    bn_index(enc2_bnk[1]), enc2_act[1])]
    for m, k, a in zip(enc2_mats[2:], enc2_bnk[2:], enc2_act[2:]):
        enc2_layers.append((add_block(m), bn_index(k), a))

    # --- BN block-averaging matrices (distinct (C, L) configurations).
    avg_blk0 = len(blocks)
    for (c, l) in bn_keys:
        add_block(bn_avg_matrix(c, l))

    slab = jnp.concatenate(blocks, axis=0)            # (n_blocks*128, 128) f32

    meta = dict(enc1=tuple(enc1_layers), dec=tuple(dec_layers),
                tail_blk=tail_blk, enc2=tuple(enc2_layers),
                avg_blk0=avg_blk0, feature_number=F, nz=nz,
                gen_w=gen_w, off2=off2)
    return slab, meta


# --------------------------------------------------------------------------- #
# The single fused Pallas kernel: the entire NetG forward, VMEM-resident.
# --------------------------------------------------------------------------- #
def _netg_kernel(x_ref, slab_ref, out_ref, *, enc1, dec, tail_blk, enc2,
                 avg_blk0, feature_number, nz, gen_w, off2):
    HI = jax.lax.Precision.HIGHEST

    def blk(i):
        return slab_ref[i * LANES:(i + 1) * LANES, :]          # tile-aligned view

    def dot(a, b, prec=None):
        return jnp.dot(a, b, preferred_element_type=jnp.float32, precision=prec)

    def batchnorm(y, avg_idx):
        # Training-mode per-channel stats over (batch, length).  mean(y) and
        # mean(y*y) are cheap sublane reduces; one HIGHEST-precision matmul
        # against the block-averaging matrix pools both over the L positions
        # of each channel and broadcasts back.  Zero-padded lanes stay zero.
        a = blk(avg_blk0 + avg_idx)
        stats = jnp.concatenate(
            [jnp.mean(y, axis=0, keepdims=True),
             jnp.mean(y * y, axis=0, keepdims=True)], axis=0)   # (2, 128)
        pooled = dot(stats, a, HI)
        mean_c = pooled[0:1, :]
        var_c = pooled[1:2, :] - mean_c * mean_c
        return (y - mean_c) * jax.lax.rsqrt(var_c + BN_EPS)

    def act(y, name):
        if name == "relu":
            return jnp.maximum(y, 0.0)
        if name == "lrelu":
            return jnp.where(y > 0.0, y, 0.2 * y)
        if name == "tanh":
            return jnp.tanh(y)
        return y

    def run(h, layer_list):
        for bi, ai, a in layer_list:
            h = dot(h, blk(bi))
            if ai >= 0:
                h = batchnorm(h, ai)
            h = act(h, a)
        return h

    x = x_ref[...]                                  # (B, 128): x | 1 | zeros
    latent_i = run(x, enc1)                         # lanes [0, nz)
    gen = run(latent_i, dec)                        # lanes [0, gen_w), tanh'd

    lane = jax.lax.broadcasted_iota(jnp.int32, gen.shape, 1)
    gen_aug = jnp.where(lane == gen_w, 1.0, gen)    # constant-one lane -> fe_b
    t = dot(gen_aug, blk(tail_blk))                 # [0,F)=imag, [off2,..)=enc2 c0
    imag = jnp.where(lane < feature_number, t, 0.0)
    latent_o = run(act(t, "lrelu"), enc2)           # lanes [0, nz)

    # Pack the three outputs into one lane-dense (B, 128) store:
    #   [0, F) imag_new | [F, F+nz) latent_i | [F+nz, F+2nz) latent_o
    out_ref[...] = (imag
                    + pltpu.roll(latent_i, feature_number, axis=1)
                    + pltpu.roll(latent_o, feature_number + nz, axis=1))


def netg_forward(x, slab, meta):
    B = x.shape[0]
    F = meta["feature_number"]
    nz = meta["nz"]
    x_pad = jnp.zeros((B, LANES), jnp.float32)
    x_pad = x_pad.at[:, :F].set(x.astype(jnp.float32))
    x_pad = x_pad.at[:, F].set(1.0)                 # ones-lane folds fd bias
    vmem = pl.BlockSpec(memory_space=pltpu.MemorySpace.VMEM)
    out = pl.pallas_call(
        functools.partial(_netg_kernel, **meta),
        out_shape=jax.ShapeDtypeStruct((B, LANES), jnp.float32),
        in_specs=[vmem, vmem],
        out_specs=vmem,
    )(x_pad, slab)
    imag = out[:, :F]
    latent_i = out[:, F:F + nz][:, :, None]         # torch Conv1d (B, nz, 1)
    latent_o = out[:, F + nz:F + 2 * nz][:, :, None]
    return imag, latent_i, latent_o


# --------------------------------------------------------------------------- #
# Plain-JAX reference (same semantics as the torch module) for a sanity check.
# --------------------------------------------------------------------------- #
def _ref_conv1d(x, w, stride, pad):
    N, C_in, L = x.shape
    C_out, _, K = w.shape
    xp = jnp.pad(x, ((0, 0), (0, 0), (pad, pad)))
    L_out = (L + 2 * pad - K) // stride + 1
    idx = jnp.arange(L_out)[:, None] * stride + jnp.arange(K)[None, :]
    patches = xp[:, :, idx]                                   # (N, C_in, L_out, K)
    return jnp.einsum("nclk,ock->nol", patches, w)


def _ref_convt1d(x, wt, stride, pad):
    C_in, C_out, K = wt.shape
    N, _, L = x.shape
    xd = jnp.zeros((N, C_in, (L - 1) * stride + 1), x.dtype)
    xd = xd.at[:, :, ::stride].set(x)
    w_conv = jnp.transpose(wt[:, :, ::-1], (1, 0, 2))
    return _ref_conv1d(xd, w_conv, 1, K - 1 - pad)


def _ref_stack(x, weights, shapes, is_transpose):
    for w, (ci, co, k, s, p, has_bn, a) in zip(weights, shapes):
        y = _ref_convt1d(x, w, s, p) if is_transpose else _ref_conv1d(x, w, s, p)
        if has_bn:
            mean = jnp.mean(y, axis=(0, 2), keepdims=True)
            var = jnp.mean((y - mean) ** 2, axis=(0, 2), keepdims=True)
            y = (y - mean) * jax.lax.rsqrt(var + BN_EPS)
        if a == "relu":
            y = jnp.maximum(y, 0.0)
        elif a == "lrelu":
            y = jnp.where(y > 0.0, y, 0.2 * y)
        elif a == "tanh":
            y = jnp.tanh(y)
        x = y
    return x


def netg_reference(params, x, isize, nz, nc, ngf):
    enc_shapes = encoder_layer_shapes(isize, nz, nc, ngf)
    dec_shapes = decoder_layer_shapes(isize, nz, nc, ngf)
    h = (x @ params["fd_w"].T + params["fd_b"])[:, None, :]
    latent_i = _ref_stack(h, params["enc1"], enc_shapes, False)
    gen = _ref_stack(latent_i, params["dec"], dec_shapes, True)
    imag = jnp.squeeze(gen, axis=1) @ params["fe_w"].T + params["fe_b"]
    latent_o = _ref_stack(gen, params["enc2"], enc_shapes, False)
    return imag, latent_i, latent_o


# --------------------------------------------------------------------------- #
if __name__ == "__main__":
    # opt: isize=32 (forced by feature_dec -> 32 + unsqueeze), nc=1, nz=8,
    #      ngf=4, ngpu=1, extralayers=0.  feature_number=24, batch=4.
    FEATURE_NUMBER = 24
    BATCH = 4
    ISIZE, NZ, NC, NGF = 32, 8, 1, 4

    key = jax.random.PRNGKey(0)
    pkey, xkey = jax.random.split(key)
    params = make_netg_params(pkey, FEATURE_NUMBER, ISIZE, NZ, NC, NGF)
    x = jax.random.normal(xkey, (BATCH, FEATURE_NUMBER), jnp.float32)

    # One-time lowering of torch-style weights into the single kernel slab.
    slab, meta = prepare_netg(params, FEATURE_NUMBER, ISIZE, NZ, NC, NGF)

    @jax.jit
    def forward(x_in, slab_in):
        return netg_forward(x_in, slab_in, meta)

    imag_new, latent_i, latent_o = forward(x, slab)
    jax.block_until_ready((imag_new, latent_i, latent_o))

    assert imag_new.shape == (BATCH, FEATURE_NUMBER)
    assert latent_i.shape == (BATCH, NZ, 1)
    assert latent_o.shape == (BATCH, NZ, 1)

    # Sanity check against the plain-JAX reference (loose tolerance covers
    # MXU default-precision matmul differences between the two compute paths).
    ref_imag, ref_li, ref_lo = netg_reference(params, x, ISIZE, NZ, NC, NGF)
    np.testing.assert_allclose(np.asarray(imag_new), np.asarray(ref_imag),
                               rtol=5e-2, atol=5e-2)
    np.testing.assert_allclose(np.asarray(latent_i), np.asarray(ref_li),
                               rtol=5e-2, atol=5e-2)
    np.testing.assert_allclose(np.asarray(latent_o), np.asarray(ref_lo),
                               rtol=5e-2, atol=5e-2)

    print("KERNEL_OK")
</pallas_src>

<mosaic_0001>
module attributes {stable_mosaic.version = 11 : i64} {
  func.func @_netg_kernel(%arg0: memref<4x128xf32, #tpu.memory_space<vmem>>, %arg1: memref<1920x128xf32, #tpu.memory_space<vmem>>, %arg2: memref<4x128xf32, #tpu.memory_space<vmem>>) attributes {dimension_semantics = [], scalar_prefetch = 0 : i64, scratch_operands = 0 : i64, tpu.core_type = #tpu.core_type<tc>} {
    %c0 = arith.constant 0 : index
    %c0_0 = arith.constant 0 : index
    %0 = vector.load %arg0[%c0, %c0_0] : memref<4x128xf32, #tpu.memory_space<vmem>>, vector<4x128xf32>
    %c0_1 = arith.constant 0 : index
    %c0_2 = arith.constant 0 : index
    %1 = vector.load %arg1[%c0_1, %c0_2] : memref<1920x128xf32, #tpu.memory_space<vmem>>, vector<128x128xf32>
    %cst = arith.constant dense<0.000000e+00> : vector<4x128xf32>
    %2 = tpu.matmul %0, %1, %cst {dimension_numbers = #tpu.dot_dimension_numbers<[1], [0], [0], [1], [0, 0, 1, 1], [], []>} : vector<4x128xf32>, vector<128x128xf32>, vector<4x128xf32> -> vector<4x128xf32>
    %cst_3 = arith.constant 0.000000e+00 : f32
    %3 = vector.broadcast %cst_3 : f32 to vector<4x128xf32>
    %4 = arith.cmpf ogt, %2, %3 : vector<4x128xf32>
    %cst_4 = arith.constant 2.000000e-01 : f32
    %5 = vector.broadcast %cst_4 : f32 to vector<4x128xf32>
    %6 = arith.mulf %5, %2 : vector<4x128xf32>
    %7 = arith.select %4, %2, %6 : vector<4x128xi1>, vector<4x128xf32>
    %c128 = arith.constant 128 : index
    %c0_5 = arith.constant 0 : index
    %8 = vector.load %arg1[%c128, %c0_5] : memref<1920x128xf32, #tpu.memory_space<vmem>>, vector<128x128xf32>
    %cst_6 = arith.constant dense<0.000000e+00> : vector<4x128xf32>
    %9 = tpu.matmul %7, %8, %cst_6 {dimension_numbers = #tpu.dot_dimension_numbers<[1], [0], [0], [1], [0, 0, 1, 1], [], []>} : vector<4x128xf32>, vector<128x128xf32>, vector<4x128xf32> -> vector<4x128xf32>
    %c1536 = arith.constant 1536 : index
    %c0_7 = arith.constant 0 : index
    %10 = vector.load %arg1[%c1536, %c0_7] : memref<1920x128xf32, #tpu.memory_space<vmem>>, vector<128x128xf32>
    %cst_8 = arith.constant dense<0.000000e+00> : vector<128xf32>
    %11 = vector.multi_reduction <add>, %9, %cst_8 [0] : vector<4x128xf32> to vector<128xf32>
    %12 = vector.shape_cast %11 : vector<128xf32> to vector<1x128xf32>
    %cst_9 = arith.constant 4.000000e+00 : f32
    %13 = vector.broadcast %cst_9 : f32 to vector<1x128xf32>
    %14 = arith.divf %12, %13 : vector<1x128xf32>
    %15 = arith.mulf %9, %9 : vector<4x128xf32>
    %cst_10 = arith.constant dense<0.000000e+00> : vector<128xf32>
    %16 = vector.multi_reduction <add>, %15, %cst_10 [0] : vector<4x128xf32> to vector<128xf32>
    %17 = vector.shape_cast %16 : vector<128xf32> to vector<1x128xf32>
    %cst_11 = arith.constant 4.000000e+00 : f32
    %18 = vector.broadcast %cst_11 : f32 to vector<1x128xf32>
    %19 = arith.divf %17, %18 : vector<1x128xf32>
    %20 = tpu.concatenate %14, %19 in 0 : vector<1x128xf32>, vector<1x128xf32> -> vector<2x128xf32>
    %cst_12 = arith.constant dense<0.000000e+00> : vector<2x128xf32>
    %21 = tpu.matmul %20, %10, %cst_12 {dimension_numbers = #tpu.dot_dimension_numbers<[1], [0], [0], [1], [0, 0, 1, 1], [], []>, precision = #tpu.contract_precision<fp32>} : vector<2x128xf32>, vector<128x128xf32>, vector<2x128xf32> -> vector<2x128xf32>
    %22 = vector.extract_strided_slice %21 {offsets = [0, 0], sizes = [1, 128], strides = [1, 1]} : vector<2x128xf32> to vector<1x128xf32>
    %23 = vector.extract_strided_slice %21 {offsets = [1, 0], sizes = [1, 128], strides = [1, 1]} : vector<2x128xf32> to vector<1x128xf32>
    %24 = arith.mulf %22, %22 : vector<1x128xf32>
    %25 = arith.subf %23, %24 : vector<1x128xf32>
    %26 = vector.broadcast %22 : vector<1x128xf32> to vector<4x128xf32>
    %27 = arith.subf %9, %26 : vector<4x128xf32>
    %cst_13 = arith.constant 9.99999974E-6 : f32
    %28 = vector.broadcast %cst_13 : f32 to vector<1x128xf32>
    %29 = arith.addf %25, %28 : vector<1x128xf32>
    %30 = math.rsqrt %29 : vector<1x128xf32>
    %31 = vector.broadcast %30 : vector<1x128xf32> to vector<4x128xf32>
    %32 = arith.mulf %27, %31 : vector<4x128xf32>
    %cst_14 = arith.constant 0.000000e+00 : f32
    %33 = vector.broadcast %cst_14 : f32 to vector<4x128xf32>
    %34 = arith.cmpf ogt, %32, %33 : vector<4x128xf32>
    %cst_15 = arith.constant 2.000000e-01 : f32
    %35 = vector.broadcast %cst_15 : f32 to vector<4x128xf32>
    %36 = arith.mulf %35, %32 : vector<4x128xf32>
    %37 = arith.select %34, %32, %36 : vector<4x128xi1>, vector<4x128xf32>
    %c256 = arith.constant 256 : index
    %c0_16 = arith.constant 0 : index
    %38 = vector.load %arg1[%c256, %c0_16] : memref<1920x128xf32, #tpu.memory_space<vmem>>, vector<128x128xf32>
    %cst_17 = arith.constant dense<0.000000e+00> : vector<4x128xf32>
    %39 = tpu.matmul %37, %38, %cst_17 {dimension_numbers = #tpu.dot_dimension_numbers<[1], [0], [0], [1], [0, 0, 1, 1], [], []>} : vector<4x128xf32>, vector<128x128xf32>, vector<4x128xf32> -> vector<4x128xf32>
    %c1664 = arith.constant 1664 : index
    %c0_18 = arith.constant 0 : index
    %40 = vector.load %arg1[%c1664, %c0_18] : memref<1920x128xf32, #tpu.memory_space<vmem>>, vector<128x128xf32>
    %cst_19 = arith.constant dense<0.000000e+00> : vector<128xf32>
    %41 = vector.multi_reduction <add>, %39, %cst_19 [0] : vector<4x128xf32> to vector<128xf32>
    %42 = vector.shape_cast %41 : vector<128xf32> to vector<1x128xf32>
    %cst_20 = arith.constant 4.000000e+00 : f32
    %43 = vector.broadcast %cst_20 : f32 to vector<1x128xf32>
    %44 = arith.divf %42, %43 : vector<1x128xf32>
    %45 = arith.mulf %39, %39 : vector<4x128xf32>
    %cst_21 = arith.constant dense<0.000000e+00> : vector<128xf32>
    %46 = vector.multi_reduction <add>, %45, %cst_21 [0] : vector<4x128xf32> to vector<128xf32>
    %47 = vector.shape_cast %46 : vector<128xf32> to vector<1x128xf32>
    %cst_22 = arith.constant 4.000000e+00 : f32
    %48 = vector.broadcast %cst_22 : f32 to vector<1x128xf32>
    %49 = arith.divf %47, %48 : vector<1x128xf32>
    %50 = tpu.concatenate %44, %49 in 0 : vector<1x128xf32>, vector<1x128xf32> -> vector<2x128xf32>
    %cst_23 = arith.constant dense<0.000000e+00> : vector<2x128xf32>
    %51 = tpu.matmul %50, %40, %cst_23 {dimension_numbers = #tpu.dot_dimension_numbers<[1], [0], [0], [1], [0, 0, 1, 1], [], []>, precision = #tpu.contract_precision<fp32>} : vector<2x128xf32>, vector<128x128xf32>, vector<2x128xf32> -> vector<2x128xf32>
    %52 = vector.extract_strided_slice %51 {offsets = [0, 0], sizes = [1, 128], strides = [1, 1]} : vector<2x128xf32> to vector<1x128xf32>
    %53 = vector.extract_strided_slice %51 {offsets = [1, 0], sizes = [1, 128], strides = [1, 1]} : vector<2x128xf32> to vector<1x128xf32>
    %54 = arith.mulf %52, %52 : vector<1x128xf32>
    %55 = arith.subf %53, %54 : vector<1x128xf32>
    %56 = vector.broadcast %52 : vector<1x128xf32> to vector<4x128xf32>
    %57 = arith.subf %39, %56 : vector<4x128xf32>
    %cst_24 = arith.constant 9.99999974E-6 : f32
    %58 = vector.broadcast %cst_24 : f32 to vector<1x128xf32>
    %59 = arith.addf %55, %58 : vector<1x128xf32>
    %60 = math.rsqrt %59 : vector<1x128xf32>
    %61 = vector.broadcast %60 : vector<1x128xf32> to vector<4x128xf32>
    %62 = arith.mulf %57, %61 : vector<4x128xf32>
    %cst_25 = arith.constant 0.000000e+00 : f32
    %63 = vector.broadcast %cst_25 : f32 to vector<4x128xf32>
    %64 = arith.cmpf ogt, %62, %63 : vector<4x128xf32>
    %cst_26 = arith.constant 2.000000e-01 : f32
    %65 = vector.broadcast %cst_26 : f32 to vector<4x128xf32>
    %66 = arith.mulf %65, %62 : vector<4x128xf32>
    %67 = arith.select %64, %62, %66 : vector<4x128xi1>, vector<4x128xf32>
    %c384 = arith.constant 384 : index
    %c0_27 = arith.constant 0 : index
    %68 = vector.load %arg1[%c384, %c0_27] : memref<1920x128xf32, #tpu.memory_space<vmem>>, vector<128x128xf32>
    %cst_28 = arith.constant dense<0.000000e+00> : vector<4x128xf32>
    %69 = tpu.matmul %67, %68, %cst_28 {dimension_numbers = #tpu.dot_dimension_numbers<[1], [0], [0], [1], [0, 0, 1, 1], [], []>} : vector<4x128xf32>, vector<128x128xf32>, vector<4x128xf32> -> vector<4x128xf32>
    %c512 = arith.constant 512 : index
    %c0_29 = arith.constant 0 : index
    %70 = vector.load %arg1[%c512, %c0_29] : memref<1920x128xf32, #tpu.memory_space<vmem>>, vector<128x128xf32>
    %cst_30 = arith.constant dense<0.000000e+00> : vector<4x128xf32>
    %71 = tpu.matmul %69, %70, %cst_30 {dimension_numbers = #tpu.dot_dimension_numbers<[1], [0], [0], [1], [0, 0, 1, 1], [], []>} : vector<4x128xf32>, vector<128x128xf32>, vector<4x128xf32> -> vector<4x128xf32>
    %c1664_31 = arith.constant 1664 : index
    %c0_32 = arith.constant 0 : index
    %72 = vector.load %arg1[%c1664_31, %c0_32] : memref<1920x128xf32, #tpu.memory_space<vmem>>, vector<128x128xf32>
    %cst_33 = arith.constant dense<0.000000e+00> : vector<128xf32>
    %73 = vector.multi_reduction <add>, %71, %cst_33 [0] : vector<4x128xf32> to vector<128xf32>
    %74 = vector.shape_cast %73 : vector<128xf32> to vector<1x128xf32>
    %cst_34 = arith.constant 4.000000e+00 : f32
    %75 = vector.broadcast %cst_34 : f32 to vector<1x128xf32>
    %76 = arith.divf %74, %75 : vector<1x128xf32>
    %77 = arith.mulf %71, %71 : vector<4x128xf32>
    %cst_35 = arith.constant dense<0.000000e+00> : vector<128xf32>
    %78 = vector.multi_reduction <add>, %77, %cst_35 [0] : vector<4x128xf32> to vector<128xf32>
    %79 = vector.shape_cast %78 : vector<128xf32> to vector<1x128xf32>
    %cst_36 = arith.constant 4.000000e+00 : f32
    %80 = vector.broadcast %cst_36 : f32 to vector<1x128xf32>
    %81 = arith.divf %79, %80 : vector<1x128xf32>
    %82 = tpu.concatenate %76, %81 in 0 : vector<1x128xf32>, vector<1x128xf32> -> vector<2x128xf32>
    %cst_37 = arith.constant dense<0.000000e+00> : vector<2x128xf32>
    %83 = tpu.matmul %82, %72, %cst_37 {dimension_numbers = #tpu.dot_dimension_numbers<[1], [0], [0], [1], [0, 0, 1, 1], [], []>, precision = #tpu.contract_precision<fp32>} : vector<2x128xf32>, vector<128x128xf32>, vector<2x128xf32> -> vector<2x128xf32>
    %84 = vector.extract_strided_slice %83 {offsets = [0, 0], sizes = [1, 128], strides = [1, 1]} : vector<2x128xf32> to vector<1x128xf32>
    %85 = vector.extract_strided_slice %83 {offsets = [1, 0], sizes = [1, 128], strides = [1, 1]} : vector<2x128xf32> to vector<1x128xf32>
    %86 = arith.mulf %84, %84 : vector<1x128xf32>
    %87 = arith.subf %85, %86 : vector<1x128xf32>
    %88 = vector.broadcast %84 : vector<1x128xf32> to vector<4x128xf32>
    %89 = arith.subf %71, %88 : vector<4x128xf32>
    %cst_38 = arith.constant 9.99999974E-6 : f32
    %90 = vector.broadcast %cst_38 : f32 to vector<1x128xf32>
    %91 = arith.addf %87, %90 : vector<1x128xf32>
    %92 = math.rsqrt %91 : vector<1x128xf32>
    %93 = vector.broadcast %92 : vector<1x128xf32> to vector<4x128xf32>
    %94 = arith.mulf %89, %93 : vector<4x128xf32>
    %cst_39 = arith.constant 0.000000e+00 : f32
    %95 = vector.broadcast %cst_39 : f32 to vector<4x128xf32>
    %96 = arith.maximumf %94, %95 : vector<4x128xf32>
    %c640 = arith.constant 640 : index
    %c0_40 = arith.constant 0 : index
    %97 = vector.load %arg1[%c640, %c0_40] : memref<1920x128xf32, #tpu.memory_space<vmem>>, vector<128x128xf32>
    %cst_41 = arith.constant dense<0.000000e+00> : vector<4x128xf32>
    %98 = tpu.matmul %96, %97, %cst_41 {dimension_numbers = #tpu.dot_dimension_numbers<[1], [0], [0], [1], [0, 0, 1, 1], [], []>} : vector<4x128xf32>, vector<128x128xf32>, vector<4x128xf32> -> vector<4x128xf32>
    %c1536_42 = arith.constant 1536 : index
    %c0_43 = arith.constant 0 : index
    %99 = vector.load %arg1[%c1536_42, %c0_43] : memref<1920x128xf32, #tpu.memory_space<vmem>>, vector<128x128xf32>
    %cst_44 = arith.constant dense<0.000000e+00> : vector<128xf32>
    %100 = vector.multi_reduction <add>, %98, %cst_44 [0] : vector<4x128xf32> to vector<128xf32>
    %101 = vector.shape_cast %100 : vector<128xf32> to vector<1x128xf32>
    %cst_45 = arith.constant 4.000000e+00 : f32
    %102 = vector.broadcast %cst_45 : f32 to vector<1x128xf32>
    %103 = arith.divf %101, %102 : vector<1x128xf32>
    %104 = arith.mulf %98, %98 : vector<4x128xf32>
    %cst_46 = arith.constant dense<0.000000e+00> : vector<128xf32>
    %105 = vector.multi_reduction <add>, %104, %cst_46 [0] : vector<4x128xf32> to vector<128xf32>
    %106 = vector.shape_cast %105 : vector<128xf32> to vector<1x128xf32>
    %cst_47 = arith.constant 4.000000e+00 : f32
    %107 = vector.broadcast %cst_47 : f32 to vector<1x128xf32>
    %108 = arith.divf %106, %107 : vector<1x128xf32>
    %109 = tpu.concatenate %103, %108 in 0 : vector<1x128xf32>, vector<1x128xf32> -> vector<2x128xf32>
    %cst_48 = arith.constant dense<0.000000e+00> : vector<2x128xf32>
    %110 = tpu.matmul %109, %99, %cst_48 {dimension_numbers = #tpu.dot_dimension_numbers<[1], [0], [0], [1], [0, 0, 1, 1], [], []>, precision = #tpu.contract_precision<fp32>} : vector<2x128xf32>, vector<128x128xf32>, vector<2x128xf32> -> vector<2x128xf32>
    %111 = vector.extract_strided_slice %110 {offsets = [0, 0], sizes = [1, 128], strides = [1, 1]} : vector<2x128xf32> to vector<1x128xf32>
    %112 = vector.extract_strided_slice %110 {offsets = [1, 0], sizes = [1, 128], strides = [1, 1]} : vector<2x128xf32> to vector<1x128xf32>
    %113 = arith.mulf %111, %111 : vector<1x128xf32>
    %114 = arith.subf %112, %113 : vector<1x128xf32>
    %115 = vector.broadcast %111 : vector<1x128xf32> to vector<4x128xf32>
    %116 = arith.subf %98, %115 : vector<4x128xf32>
    %cst_49 = arith.constant 9.99999974E-6 : f32
    %117 = vector.broadcast %cst_49 : f32 to vector<1x128xf32>
    %118 = arith.addf %114, %117 : vector<1x128xf32>
    %119 = math.rsqrt %118 : vector<1x128xf32>
    %120 = vector.broadcast %119 : vector<1x128xf32> to vector<4x128xf32>
    %121 = arith.mulf %116, %120 : vector<4x128xf32>
    %cst_50 = arith.constant 0.000000e+00 : f32
    %122 = vector.broadcast %cst_50 : f32 to vector<4x128xf32>
    %123 = arith.maximumf %121, %122 : vector<4x128xf32>
    %c768 = arith.constant 768 : index
    %c0_51 = arith.constant 0 : index
    %124 = vector.load %arg1[%c768, %c0_51] : memref<1920x128xf32, #tpu.memory_space<vmem>>, vector<128x128xf32>
    %cst_52 = arith.constant dense<0.000000e+00> : vector<4x128xf32>
    %125 = tpu.matmul %123, %124, %cst_52 {dimension_numbers = #tpu.dot_dimension_numbers<[1], [0], [0], [1], [0, 0, 1, 1], [], []>} : vector<4x128xf32>, vector<128x128xf32>, vector<4x128xf32> -> vector<4x128xf32>
    %c1792 = arith.constant 1792 : index
    %c0_53 = arith.constant 0 : index
    %126 = vector.load %arg1[%c1792, %c0_53] : memref<1920x128xf32, #tpu.memory_space<vmem>>, vector<128x128xf32>
    %cst_54 = arith.constant dense<0.000000e+00> : vector<128xf32>
    %127 = vector.multi_reduction <add>, %125, %cst_54 [0] : vector<4x128xf32> to vector<128xf32>
    %128 = vector.shape_cast %127 : vector<128xf32> to vector<1x128xf32>
    %cst_55 = arith.constant 4.000000e+00 : f32
    %129 = vector.broadcast %cst_55 : f32 to vector<1x128xf32>
    %130 = arith.divf %128, %129 : vector<1x128xf32>
    %131 = arith.mulf %125, %125 : vector<4x128xf32>
    %cst_56 = arith.constant dense<0.000000e+00> : vector<128xf32>
    %132 = vector.multi_reduction <add>, %131, %cst_56 [0] : vector<4x128xf32> to vector<128xf32>
    %133 = vector.shape_cast %132 : vector<128xf32> to vector<1x128xf32>
    %cst_57 = arith.constant 4.000000e+00 : f32
    %134 = vector.broadcast %cst_57 : f32 to vector<1x128xf32>
    %135 = arith.divf %133, %134 : vector<1x128xf32>
    %136 = tpu.concatenate %130, %135 in 0 : vector<1x128xf32>, vector<1x128xf32> -> vector<2x128xf32>
    %cst_58 = arith.constant dense<0.000000e+00> : vector<2x128xf32>
    %137 = tpu.matmul %136, %126, %cst_58 {dimension_numbers = #tpu.dot_dimension_numbers<[1], [0], [0], [1], [0, 0, 1, 1], [], []>, precision = #tpu.contract_precision<fp32>} : vector<2x128xf32>, vector<128x128xf32>, vector<2x128xf32> -> vector<2x128xf32>
    %138 = vector.extract_strided_slice %137 {offsets = [0, 0], sizes = [1, 128], strides = [1, 1]} : vector<2x128xf32> to vector<1x128xf32>
    %139 = vector.extract_strided_slice %137 {offsets = [1, 0], sizes = [1, 128], strides = [1, 1]} : vector<2x128xf32> to vector<1x128xf32>
    %140 = arith.mulf %138, %138 : vector<1x128xf32>
    %141 = arith.subf %139, %140 : vector<1x128xf32>
    %142 = vector.broadcast %138 : vector<1x128xf32> to vector<4x128xf32>
    %143 = arith.subf %125, %142 : vector<4x128xf32>
    %cst_59 = arith.constant 9.99999974E-6 : f32
    %144 = vector.broadcast %cst_59 : f32 to vector<1x128xf32>
    %145 = arith.addf %141, %144 : vector<1x128xf32>
    %146 = math.rsqrt %145 : vector<1x128xf32>
    %147 = vector.broadcast %146 : vector<1x128xf32> to vector<4x128xf32>
    %148 = arith.mulf %143, %147 : vector<4x128xf32>
    %cst_60 = arith.constant 0.000000e+00 : f32
    %149 = vector.broadcast %cst_60 : f32 to vector<4x128xf32>
    %150 = arith.maximumf %148, %149 : vector<4x128xf32>
    %c896 = arith.constant 896 : index
    %c0_61 = arith.constant 0 : index
    %151 = vector.load %arg1[%c896, %c0_61] : memref<1920x128xf32, #tpu.memory_space<vmem>>, vector<128x128xf32>
    %cst_62 = arith.constant dense<0.000000e+00> : vector<4x128xf32>
    %152 = tpu.matmul %150, %151, %cst_62 {dimension_numbers = #tpu.dot_dimension_numbers<[1], [0], [0], [1], [0, 0, 1, 1], [], []>} : vector<4x128xf32>, vector<128x128xf32>, vector<4x128xf32> -> vector<4x128xf32>
    %153 = math.tanh %152 : vector<4x128xf32>
    %154 = tpu.iota {dimensions = array<i32: 1>} : vector<4x128xi32>
    %c32_i32 = arith.constant 32 : i32
    %155 = vector.broadcast %c32_i32 : i32 to vector<4x128xi32>
    %156 = arith.cmpi eq, %154, %155 : vector<4x128xi32>
    %cst_63 = arith.constant 1.000000e+00 : f32
    %157 = vector.broadcast %cst_63 : f32 to vector<4x128xf32>
    %158 = arith.select %156, %157, %153 : vector<4x128xi1>, vector<4x128xf32>
    %c1024 = arith.constant 1024 : index
    %c0_64 = arith.constant 0 : index
    %159 = vector.load %arg1[%c1024, %c0_64] : memref<1920x128xf32, #tpu.memory_space<vmem>>, vector<128x128xf32>
    %cst_65 = arith.constant dense<0.000000e+00> : vector<4x128xf32>
    %160 = tpu.matmul %158, %159, %cst_65 {dimension_numbers = #tpu.dot_dimension_numbers<[1], [0], [0], [1], [0, 0, 1, 1], [], []>} : vector<4x128xf32>, vector<128x128xf32>, vector<4x128xf32> -> vector<4x128xf32>
    %c24_i32 = arith.constant 24 : i32
    %161 = vector.broadcast %c24_i32 : i32 to vector<4x128xi32>
    %162 = arith.cmpi slt, %154, %161 : vector<4x128xi32>
    %cst_66 = arith.constant 0.000000e+00 : f32
    %163 = vector.broadcast %cst_66 : f32 to vector<4x128xf32>
    %164 = arith.select %162, %160, %163 : vector<4x128xi1>, vector<4x128xf32>
    %cst_67 = arith.constant 0.000000e+00 : f32
    %165 = vector.broadcast %cst_67 : f32 to vector<4x128xf32>
    %166 = arith.cmpf ogt, %160, %165 : vector<4x128xf32>
    %cst_68 = arith.constant 2.000000e-01 : f32
    %167 = vector.broadcast %cst_68 : f32 to vector<4x128xf32>
    %168 = arith.mulf %167, %160 : vector<4x128xf32>
    %169 = arith.select %166, %160, %168 : vector<4x128xi1>, vector<4x128xf32>
    %c1152 = arith.constant 1152 : index
    %c0_69 = arith.constant 0 : index
    %170 = vector.load %arg1[%c1152, %c0_69] : memref<1920x128xf32, #tpu.memory_space<vmem>>, vector<128x128xf32>
    %cst_70 = arith.constant dense<0.000000e+00> : vector<4x128xf32>
    %171 = tpu.matmul %169, %170, %cst_70 {dimension_numbers = #tpu.dot_dimension_numbers<[1], [0], [0], [1], [0, 0, 1, 1], [], []>} : vector<4x128xf32>, vector<128x128xf32>, vector<4x128xf32> -> vector<4x128xf32>
    %c1536_71 = arith.constant 1536 : index
    %c0_72 = arith.constant 0 : index
    %172 = vector.load %arg1[%c1536_71, %c0_72] : memref<1920x128xf32, #tpu.memory_space<vmem>>, vector<128x128xf32>
    %cst_73 = arith.constant dense<0.000000e+00> : vector<128xf32>
    %173 = vector.multi_reduction <add>, %171, %cst_73 [0] : vector<4x128xf32> to vector<128xf32>
    %174 = vector.shape_cast %173 : vector<128xf32> to vector<1x128xf32>
    %cst_74 = arith.constant 4.000000e+00 : f32
    %175 = vector.broadcast %cst_74 : f32 to vector<1x128xf32>
    %176 = arith.divf %174, %175 : vector<1x128xf32>
    %177 = arith.mulf %171, %171 : vector<4x128xf32>
    %cst_75 = arith.constant dense<0.000000e+00> : vector<128xf32>
    %178 = vector.multi_reduction <add>, %177, %cst_75 [0] : vector<4x128xf32> to vector<128xf32>
    %179 = vector.shape_cast %178 : vector<128xf32> to vector<1x128xf32>
    %cst_76 = arith.constant 4.000000e+00 : f32
    %180 = vector.broadcast %cst_76 : f32 to vector<1x128xf32>
    %181 = arith.divf %179, %180 : vector<1x128xf32>
    %182 = tpu.concatenate %176, %181 in 0 : vector<1x128xf32>, vector<1x128xf32> -> vector<2x128xf32>
    %cst_77 = arith.constant dense<0.000000e+00> : vector<2x128xf32>
    %183 = tpu.matmul %182, %172, %cst_77 {dimension_numbers = #tpu.dot_dimension_numbers<[1], [0], [0], [1], [0, 0, 1, 1], [], []>, precision = #tpu.contract_precision<fp32>} : vector<2x128xf32>, vector<128x128xf32>, vector<2x128xf32> -> vector<2x128xf32>
    %184 = vector.extract_strided_slice %183 {offsets = [0, 0], sizes = [1, 128], strides = [1, 1]} : vector<2x128xf32> to vector<1x128xf32>
    %185 = vector.extract_strided_slice %183 {offsets = [1, 0], sizes = [1, 128], strides = [1, 1]} : vector<2x128xf32> to vector<1x128xf32>
    %186 = arith.mulf %184, %184 : vector<1x128xf32>
    %187 = arith.subf %185, %186 : vector<1x128xf32>
    %188 = vector.broadcast %184 : vector<1x128xf32> to vector<4x128xf32>
    %189 = arith.subf %171, %188 : vector<4x128xf32>
    %cst_78 = arith.constant 9.99999974E-6 : f32
    %190 = vector.broadcast %cst_78 : f32 to vector<1x128xf32>
    %191 = arith.addf %187, %190 : vector<1x128xf32>
    %192 = math.rsqrt %191 : vector<1x128xf32>
    %193 = vector.broadcast %192 : vector<1x128xf32> to vector<4x128xf32>
    %194 = arith.mulf %189, %193 : vector<4x128xf32>
    %cst_79 = arith.constant 0.000000e+00 : f32
    %195 = vector.broadcast %cst_79 : f32 to vector<4x128xf32>
    %196 = arith.cmpf ogt, %194, %195 : vector<4x128xf32>
    %cst_80 = arith.constant 2.000000e-01 : f32
    %197 = vector.broadcast %cst_80 : f32 to vector<4x128xf32>
    %198 = arith.mulf %197, %194 : vector<4x128xf32>
    %199 = arith.select %196, %194, %198 : vector<4x128xi1>, vector<4x128xf32>
    %c1280 = arith.constant 1280 : index
    %c0_81 = arith.constant 0 : index
    %200 = vector.load %arg1[%c1280, %c0_81] : memref<1920x128xf32, #tpu.memory_space<vmem>>, vector<128x128xf32>
    %cst_82 = arith.constant dense<0.000000e+00> : vector<4x128xf32>
    %201 = tpu.matmul %199, %200, %cst_82 {dimension_numbers = #tpu.dot_dimension_numbers<[1], [0], [0], [1], [0, 0, 1, 1], [], []>} : vector<4x128xf32>, vector<128x128xf32>, vector<4x128xf32> -> vector<4x128xf32>
    %c1664_83 = arith.constant 1664 : index
    %c0_84 = arith.constant 0 : index
    %202 = vector.load %arg1[%c1664_83, %c0_84] : memref<1920x128xf32, #tpu.memory_space<vmem>>, vector<128x128xf32>
    %cst_85 = arith.constant dense<0.000000e+00> : vector<128xf32>
    %203 = vector.multi_reduction <add>, %201, %cst_85 [0] : vector<4x128xf32> to vector<128xf32>
    %204 = vector.shape_cast %203 : vector<128xf32> to vector<1x128xf32>
    %cst_86 = arith.constant 4.000000e+00 : f32
    %205 = vector.broadcast %cst_86 : f32 to vector<1x128xf32>
    %206 = arith.divf %204, %205 : vector<1x128xf32>
    %207 = arith.mulf %201, %201 : vector<4x128xf32>
    %cst_87 = arith.constant dense<0.000000e+00> : vector<128xf32>
    %208 = vector.multi_reduction <add>, %207, %cst_87 [0] : vector<4x128xf32> to vector<128xf32>
    %209 = vector.shape_cast %208 : vector<128xf32> to vector<1x128xf32>
    %cst_88 = arith.constant 4.000000e+00 : f32
    %210 = vector.broadcast %cst_88 : f32 to vector<1x128xf32>
    %211 = arith.divf %209, %210 : vector<1x128xf32>
    %212 = tpu.concatenate %206, %211 in 0 : vector<1x128xf32>, vector<1x128xf32> -> vector<2x128xf32>
    %cst_89 = arith.constant dense<0.000000e+00> : vector<2x128xf32>
    %213 = tpu.matmul %212, %202, %cst_89 {dimension_numbers = #tpu.dot_dimension_numbers<[1], [0], [0], [1], [0, 0, 1, 1], [], []>, precision = #tpu.contract_precision<fp32>} : vector<2x128xf32>, vector<128x128xf32>, vector<2x128xf32> -> vector<2x128xf32>
    %214 = vector.extract_strided_slice %213 {offsets = [0, 0], sizes = [1, 128], strides = [1, 1]} : vector<2x128xf32> to vector<1x128xf32>
    %215 = vector.extract_strided_slice %213 {offsets = [1, 0], sizes = [1, 128], strides = [1, 1]} : vector<2x128xf32> to vector<1x128xf32>
    %216 = arith.mulf %214, %214 : vector<1x128xf32>
    %217 = arith.subf %215, %216 : vector<1x128xf32>
    %218 = vector.broadcast %214 : vector<1x128xf32> to vector<4x128xf32>
    %219 = arith.subf %201, %218 : vector<4x128xf32>
    %cst_90 = arith.constant 9.99999974E-6 : f32
    %220 = vector.broadcast %cst_90 : f32 to vector<1x128xf32>
    %221 = arith.addf %217, %220 : vector<1x128xf32>
    %222 = math.rsqrt %221 : vector<1x128xf32>
    %223 = vector.broadcast %222 : vector<1x128xf32> to vector<4x128xf32>
    %224 = arith.mulf %219, %223 : vector<4x128xf32>
    %cst_91 = arith.constant 0.000000e+00 : f32
    %225 = vector.broadcast %cst_91 : f32 to vector<4x128xf32>
    %226 = arith.cmpf ogt, %224, %225 : vector<4x128xf32>
    %cst_92 = arith.constant 2.000000e-01 : f32
    %227 = vector.broadcast %cst_92 : f32 to vector<4x128xf32>
    %228 = arith.mulf %227, %224 : vector<4x128xf32>
    %229 = arith.select %226, %224, %228 : vector<4x128xi1>, vector<4x128xf32>
    %c1408 = arith.constant 1408 : index
    %c0_93 = arith.constant 0 : index
    %230 = vector.load %arg1[%c1408, %c0_93] : memref<1920x128xf32, #tpu.memory_space<vmem>>, vector<128x128xf32>
    %cst_94 = arith.constant dense<0.000000e+00> : vector<4x128xf32>
    %231 = tpu.matmul %229, %230, %cst_94 {dimension_numbers = #tpu.dot_dimension_numbers<[1], [0], [0], [1], [0, 0, 1, 1], [], []>} : vector<4x128xf32>, vector<128x128xf32>, vector<4x128xf32> -> vector<4x128xf32>
    %c24_i32_95 = arith.constant 24 : i32
    %232 = tpu.dynamic_rotate %69 by %c24_i32_95 dim 1 : vector<4x128xf32>, i32 -> vector<4x128xf32>
    %233 = arith.addf %164, %232 : vector<4x128xf32>
    %c32_i32_96 = arith.constant 32 : i32
    %234 = tpu.dynamic_rotate %231 by %c32_i32_96 dim 1 : vector<4x128xf32>, i32 -> vector<4x128xf32>
    %235 = arith.addf %233, %234 : vector<4x128xf32>
    %c0_97 = arith.constant 0 : index
    %c0_98 = arith.constant 0 : index
    %236 = vector.load %arg2[%c0_97, %c0_98] : memref<4x128xf32, #tpu.memory_space<vmem>>, vector<4x128xf32>
    tpu.vector_store %arg2[%c0_97, %c0_98], %235 {strides = array<i32>} : memref<4x128xf32, #tpu.memory_space<vmem>>, vector<4x128xf32>,
    return
  }
}

</mosaic_0001>

<bundles_post_ra>
// kernel: forward.1
= control target key start
LH: loop header
LB: loop body
LE: loop exit
PB: predicated region body
PF: predicated region fallthrough
CT: control target
= control target key end

     0   :  { %7 = vsyncpa [#allocation3], 0  ;;  %s10103_s9 = smov [#allocation2]   ;;  %s11832_s0 = inlined_call_operand.vmem [shape: f32[4,128], index: 0, kind: input, shape index: {}]   ;;  %s11833_s1 = inlined_call_operand.hbm [shape: f32[1920,128], index: 1, kind: input, shape index: {}]   ;;  %s11834_s2 = inlined_call_operand.vmem [shape: f32[4,128], index: 2, kind: output, shape index: {}]  }
   0x1   :  { %s15_s10 = sshll.u32 %s10103_s9, 4  ;;  %s10079_s13 = scalar_lea.hbm %s11833_s1, 30720  ;;  %s16_s10 = int_to_ptr.vmem [resolvable:$true] %s15_s10 }
   0x2   :  { %p10080_p0 = scmp.ne.s32.totalorder %s11833_s1, %s10079_s13  ;;  %p10083_p1 = scmp.lt.u32.totalorder %s10079_s13, %s11833_s1 }
   0x4   :  { %p10085_p2 = pnand %p10083_p1, %p10080_p0 }
   0x6   :  { %10088 = shalt.err (!%p10085_p2)
}
   0x7   :  { %s10089_s18 = scalar_lea.vmem %s16_s10, 30720  ;;  %p10094_p4 = scmp.lt.s32.totalorder %s16_s10, %s16_s10 }
   0x8   :  { %p10090_p3 = scmp.ne.s32.totalorder %s16_s10, %s10089_s18  ;;  %p10095_p5 = scmp.lt.s32.totalorder %s10089_s18, %s10089_s18 }
   0xa   :  { %p10096_p6 = por %p10095_p5, %p10094_p4 }
   0xc   :  { %p10097_p7 = pnand %p10096_p6, %p10090_p3 }
   0xe   :  { %10100 = shalt.err (!%p10097_p7)
}
   0xf   :  { %s10104_s19 = smov 128   ;;  %s10105_s20 = smov 8  }
  0x10   :  { %21 = dma.hbm_to_vmem [thread:$0]  %s11833_s1, 30720, %s16_s10, [#allocation3], %s10104_s19, %s10104_s19, %s10105_s20  }
  0x11   :  { %10101 = dma.done.wait [#allocation3], 30720  }
  0x12   :  { %10102 = vsyncadd [#allocation3], 4294936576  ;;  %v11878_v0 = vmov 0.0|0.0   ;;  %vm10107_vm0 = vmmov 0   ;;  %v11844_v1 = vmov 0.0   ;;  %v26_v2 = vld [vmem:[#allocation2] sm:$0xff] }
  0x13   :  { %8689 = vmatprep.subr.bf16.mxu0 %v11878_v0  ;;  %6831 = vmatprep.mubr.msk.f32.mxu0 %vm10107_vm0, %v11844_v1  ;;  %v27_v3 = vld [vmem:[#allocation2 + $0x8] sm:$0xff]  ;;  %v28_v4 = vld [vmem:[#allocation2 + $0x10] sm:$0xff]  ;;  %v29_v6 = vld [vmem:[#allocation2 + $0x18] sm:$0xff]  ;;  %vm217_vm2 = vcmask 1043456   ;;  %vm236_vm3 = vcmask 1040384   ;;  %s10110_s24 = smov 32  }
  0x14   :  { %8881 = vmatprep.subr.bf16.mxu1 %v11878_v0  ;;  %7111 = vmatprep.mubr.msk.f32.mxu1 %vm10107_vm0, %v11844_v1  ;;  %v8690_v5 = vpack.c.bf16 %v27_v3, %v26_v2  ;;  %v8693_v7 = vpack.c.bf16 %v29_v6, %v28_v4  ;;  %v30_v8 = vld [vmem:[#allocation2 + $0x20] sm:$0xff]  ;;  %v31_v9 = vld [vmem:[#allocation2 + $0x28] sm:$0xff]  ;;  %v32_v11 = vld [vmem:[#allocation2 + $0x30] sm:$0xff] }
  0x15   :  { %v8696_v10 = vpack.c.bf16 %v31_v9, %v30_v8  ;;  %v33_v12 = vld [vmem:[#allocation2 + $0x38] sm:$0xff]  ;;  %v34_v14 = vld [vmem:[#allocation2 + $0x40] sm:$0xff]  ;;  %v35_v15 = vld [vmem:[#allocation2 + $0x48] sm:$0xff] }
  0x16   :  { %8691 = vmatpush3.bf16.msra.mxu0 %v8690_v5  ;;  %v8699_v13 = vpack.c.bf16 %v33_v12, %v32_v11  ;;  %v8702_v16 = vpack.c.bf16 %v35_v15, %v34_v14  ;;  %v36_v17 = vld [vmem:[#allocation2 + $0x50] sm:$0xff]  ;;  %v37_v18 = vld [vmem:[#allocation2 + $0x58] sm:$0xff]  ;;  %v38_v20 = vld [vmem:[#allocation2 + $0x60] sm:$0xff] }
  0x17   :  { %8692 = vmatprep.subr.bf16.mxu0 %v11878_v0  ;;  %v8705_v19 = vpack.c.bf16 %v37_v18, %v36_v17  ;;  %v39_v21 = vld [vmem:[#allocation2 + $0x68] sm:$0xff]  ;;  %v40_v23 = vld [vmem:[#allocation2 + $0x70] sm:$0xff]  ;;  %v41_v24 = vld [vmem:[#allocation2 + $0x78] sm:$0xff] }
  0x18   :  { %v8708_v22 = vpack.c.bf16 %v39_v21, %v38_v20  ;;  %v8711_v25 = vpack.c.bf16 %v41_v24, %v40_v23  ;;  %v115_v26 = vld [vmem:[#allocation2 + $0x80] sm:$0xff]  ;;  %v116_v27 = vld [vmem:[#allocation2 + $0x88] sm:$0xff]  ;;  %v117_v30 = vld [vmem:[#allocation2 + $0x90] sm:$0xff] }
  0x19   :  { %v25_v28 = vld [vmem:[%s11832_s0] sm:$0xf]  ;;  %v8714_v29 = vpack.c.bf16 %v116_v27, %v115_v26  ;;  %v118_v31 = vld [vmem:[#allocation2 + $0x98] sm:$0xff]  ;;  %v120_v34 = vld [vmem:[#allocation2 + $0xa8] sm:$0xff]  ;;  %s10109_s0 = smov 24  }
  0x1a   :  { %8694 = vmatpush3.bf16.msra.mxu0 %v8693_v7  ;;  %v8717_v32 = vpack.c.bf16 %v118_v31, %v117_v30  ;;  %v119_v33 = vld [vmem:[#allocation2 + $0xa0] sm:$0xff]  ;;  %v121_v36 = vld [vmem:[#allocation2 + $0xb0] sm:$0xff]  ;;  %v122_v37 = vld [vmem:[#allocation2 + $0xb8] sm:$0xff] }
  0x1b   :  { %8695 = vmatprep.subr.bf16.mxu0 %v11878_v0  ;;  %v8720_v35 = vpack.c.bf16 %v120_v34, %v119_v33  ;;  %v8723_v38 = vpack.c.bf16 %v122_v37, %v121_v36  ;;  %v123_v39 = vld [vmem:[#allocation2 + $0xc0] sm:$0xff]  ;;  %v124_v40 = vld [vmem:[#allocation2 + $0xc8] sm:$0xff]  ;;  %v125_v42 = vld [vmem:[#allocation2 + $0xd0] sm:$0xff] }
  0x1c   :  { %v8726_v41 = vpack.c.bf16 %v124_v40, %v123_v39  ;;  %v126_v43 = vld [vmem:[#allocation2 + $0xd8] sm:$0xff]  ;;  %v127_v45 = vld [vmem:[#allocation2 + $0xe0] sm:$0xff]  ;;  %v128_v46 = vld [vmem:[#allocation2 + $0xe8] sm:$0xff] }
  0x1d   :  { %v8729_v44 = vpack.c.bf16 %v126_v43, %v125_v42  ;;  %v8732_v47 = vpack.c.bf16 %v128_v46, %v127_v45  ;;  %v129_v48 = vld [vmem:[#allocation2 + $0xf0] sm:$0xff]  ;;  %v130_v49 = vld [vmem:[#allocation2 + $0xf8] sm:$0xff]  ;;  %v10165_v51 = vld [vmem:[#allocation2 + $0x600] sm:$0xff] }
  0x1e   :  { %8697 = vmatpush3.bf16.msra.mxu0 %v8696_v10  ;;  %v8735_v50 = vpack.c.bf16 %v130_v49, %v129_v48  ;;  %v10167_v52 = vld [vmem:[#allocation2 + $0x608] sm:$0xff]  ;;  %v239_v53 = vand.u32 4294901760, %v10165_v51  ;;  %v203_v60 = vld [vmem:[#allocation2 + $0x610] sm:$0xff]  ;;  %v204_v61 = vld [vmem:[#allocation2 + $0x618] sm:$0xff] }
  0x1f   :  { %8698 = vmatprep.subr.bf16.mxu0 %v11878_v0  ;;  %v242_v54 = vand.u32 4294901760, %v10167_v52  ;;  %v245_v62 = vand.u32 4294901760, %v203_v60  ;;  %v248_v63 = vand.u32 4294901760, %v204_v61  ;;  %v205_v3 = vld [vmem:[#allocation2 + $0x620] sm:$0xff]  ;;  %v206_v4 = vld [vmem:[#allocation2 + $0x628] sm:$0xff]  ;;  %v207_v8 = vld [vmem:[#allocation2 + $0x630] sm:$0xff] }
  0x20   :  { %v251_v5 = vand.u32 4294901760, %v205_v3  ;;  %v254_v6 = vand.u32 4294901760, %v206_v4  ;;  %v208_v9 = vld [vmem:[#allocation2 + $0x638] sm:$0xff]  ;;  %v257_v10 = vand.u32 4294901760, %v207_v8  ;;  %v210_v14 = vld [vmem:[#allocation2 + $0x648] sm:$0xff]  ;;  %v211_v18 = vld [vmem:[#allocation2 + $0x650] sm:$0xff] }
  0x21   :  { %v10175_v58 = vpack.c.bf16 %v242_v54, %v239_v53  ;;  %v10181_v2 = vpack.c.bf16 %v248_v63, %v245_v62  ;;  %v260_v11 = vand.u32 4294901760, %v208_v9  ;;  %v269_v20 = vand.u32 4294901760, %v211_v18  ;;  %v213_v23 = vld [vmem:[#allocation2 + $0x660] sm:$0xff]  ;;  %v214_v24 = vld [vmem:[#allocation2 + $0x668] sm:$0xff] }
  0x22   :  { %8700 = vmatpush3.bf16.msra.mxu0 %v8699_v13  ;;  %v10185_v7 = vpack.c.bf16 %v254_v6, %v251_v5  ;;  %v209_v13 = vld [vmem:[#allocation2 + $0x640] sm:$0xff]  ;;  %v275_v26 = vand.u32 4294901760, %v213_v23  ;;  %v278_v27 = vand.u32 4294901760, %v214_v24  ;;  %v10210_v33 = vsub.f32 %v203_v60, %v245_v62 }
  0x23   :  { %8701 = vmatprep.subr.bf16.mxu0 %v11878_v0  ;;  %v10189_v12 = vpack.c.bf16 %v260_v11, %v257_v10  ;;  %v263_v15 = vand.u32 4294901760, %v209_v13  ;;  %v10212_v34 = vsub.f32 %v204_v61, %v248_v63  ;;  %v10224_v39 = vsub.f32 %v205_v3, %v251_v5 }
  0x24   :  { %v10204_v31 = vpack.c.bf16 %v278_v27, %v275_v26  ;;  %v10226_v40 = vsub.f32 %v206_v4, %v254_v6  ;;  %v10238_v48 = vsub.f32 %v207_v8, %v257_v10  ;;  %v10240_v49 = vsub.f32 %v208_v9, %v260_v11 }
  0x25   :  { %v353_v36 = vand.u32 4294901760, %v10212_v34  ;;  %v360_v43 = vand.u32 4294901760, %v10224_v39  ;;  %v10249_v61 = vsub.f32 %v209_v13, %v263_v15  ;;  %v10264_v10 = vsub.f32 %v211_v18, %v269_v20 }
  0x26   :  { %8703 = vmatpush3.bf16.msra.mxu0 %v8702_v16  ;;  %v266_v16 = vand.u32 4294901760, %v210_v14  ;;  %11978 = vst [vmem:[#allocation6_spill] sm:$0xff] %v10204_v31 }
  0x27   :  { %8704 = vmatprep.subr.bf16.mxu0 %v11878_v0  ;;  %v361_v46 = vsub.f32 %v10224_v39, %v360_v43  ;;  %v11842_v4 = vand.u32 4294901760, %v10249_v61 }
  0x28   :  { %v10193_v17 = vpack.c.bf16 %v266_v16, %v263_v15  ;;  %v10251_v62 = vsub.f32 %v210_v14, %v266_v16  ;;  %v11840_v16 = vand.u32 4294901760, %v10264_v10 }
  0x29   :  { %v389_v8 = vsub.f32 %v10249_v61, %v11842_v4 }
  0x2a   :  { %8706 = vmatpush3.bf16.msra.mxu0 %v8705_v19  ;;  %v212_v19 = vld [vmem:[#allocation2 + $0x658] sm:$0xff]  ;;  %v11841_v5 = vand.u32 4294901760, %v10251_v62 }
  0x2b   :  { %8707 = vmatprep.subr.bf16.mxu0 %v11878_v0  ;;  %v272_v21 = vand.u32 4294901760, %v212_v19  ;;  %v390_v14 = vand.u32 4294901760, %v389_v8 }
  0x2c   :  { %v396_v9 = vsub.f32 %v10251_v62, %v11841_v5  ;;  %v10349_v5 = vsub.f32 %v10165_v51, %v239_v53 }
  0x2d   :  { %v10266_v11 = vsub.f32 %v212_v19, %v272_v21  ;;  %v10280_v19 = vsub.f32 %v213_v23, %v275_v26 }
  0x2e   :  { %8709 = vmatpush3.bf16.msra.mxu0 %v8708_v22  ;;  %v10197_v22 = vpack.c.bf16 %v272_v21, %v269_v20  ;;  %v397_v15 = vand.u32 4294901760, %v396_v9  ;;  %v10282_v20 = vsub.f32 %v214_v24, %v278_v27  ;;  %v10313_v9 = vpack.c.bf16 %v10212_v34, %v10210_v33 }
  0x2f   :  { %8710 = vmatprep.subr.bf16.mxu0 %v11878_v0 }
  0x30   :  { %11977 = vst [vmem:[#allocation5_spill] sm:$0xff] %v10197_v22  ;;  %11987 = vst [vmem:[#allocation15_spill] sm:$0xff] %v10313_v9 }
  0x32   :  { %8712 = vmatpush3.bf16.msra.mxu0 %v8711_v25  ;;  %v10199_v25 = vld [vmem:[#allocation2 + $0x670] sm:$0xff] }
  0x33   :  { %8713 = vmatprep.subr.bf16.mxu0 %v11878_v0 }
  0x35   :  { %6832 = vmatmul.mubr.f32.vlgmr.msra.gmra.mrb[0].mxu0 %v25_v28  ;;  %v216_v28 = vld [vmem:[#allocation2 + $0x678] sm:$0xff] }
  0x36   :  { %8715 = vmatpush3.bf16.msra.mxu0 %v8714_v29  ;;  %6866 = vmatprep.mubr.msk.f32.mxu0 %vm10107_vm0, %v11844_v1  ;;  %v281_v29 = vand.u32 4294901760, %v10199_v25  ;;  %v284_v30 = vand.u32 4294901760, %v216_v28 }
  0x37   :  { %8716 = vmatprep.subr.bf16.mxu0 %v11878_v0 }
  0x3a   :  { %8718 = vmatpush3.bf16.msra.mxu0 %v8717_v32  ;;  %v10207_v32 = vpack.c.bf16 %v284_v30, %v281_v29 }
  0x3b   :  { %8719 = vmatprep.subr.bf16.mxu0 %v11878_v0 }
  0x3c   :  { %11979 = vst [vmem:[#allocation7_spill] sm:$0xff] %v10207_v32 }
  0x3e   :  { %8721 = vmatpush3.bf16.msra.mxu0 %v8720_v35  ;;  %v346_v35 = vand.u32 4294901760, %v10210_v33 }
  0x3f   :  { %8722 = vmatprep.subr.bf16.mxu0 %v11878_v0 }
  0x40   :  { %v347_v37 = vsub.f32 %v10210_v33, %v346_v35 }
  0x42   :  { %8724 = vmatpush3.bf16.msra.mxu0 %v8723_v38  ;;  %v354_v38 = vsub.f32 %v10212_v34, %v353_v36  ;;  %v12000_v34 = vand.u32 4294901760, %v10249_v61 }
  0x43   :  { %8725 = vmatprep.subr.bf16.mxu0 %v11878_v0 }
  0x44   :  { %v355_v42 = vand.u32 4294901760, %v354_v38  ;;  %v10272_v38 = vpack.c.bf16 %v397_v15, %v390_v14  ;;  %v10317_v14 = vpack.c.bf16 %v10226_v40, %v10224_v39  ;;  %v10321_v15 = vpack.c.bf16 %v10240_v49, %v10238_v48 }
  0x45   :  { %v12003_v39 = vand.u32 4294901760, %v10264_v10 }
  0x46   :  { %8727 = vmatpush3.bf16.msra.mxu0 %v8726_v41  ;;  %v348_v41 = vand.u32 4294901760, %v347_v37  ;;  %v11839_v37 = vand.u32 4294901760, %v10266_v11  ;;  %11983 = vst [vmem:[#allocation11_spill] sm:$0xff] %v10272_v38  ;;  %11988 = vst [vmem:[#allocation16_spill] sm:$0xff] %v10317_v14 }
  0x47   :  { %8728 = vmatprep.subr.bf16.mxu0 %v11878_v0  ;;  %11989 = vst [vmem:[#allocation17_spill] sm:$0xff] %v10321_v15 }
  0x48   :  { %v10230_v45 = vpack.c.bf16 %v355_v42, %v348_v41  ;;  %v403_v41 = vsub.f32 %v10264_v10, %v11840_v16  ;;  %v410_v18 = vsub.f32 %v10266_v11, %v11839_v37 }
  0x4a   :  { %8730 = vmatpush3.bf16.msra.mxu0 %v8729_v44  ;;  %v367_v44 = vand.u32 4294901760, %v10226_v40  ;;  %11980 = vst [vmem:[#allocation8_spill] sm:$0xff] %v10230_v45  ;;  %v404_v21 = vand.u32 4294901760, %v403_v41  ;;  %v411_v42 = vand.u32 4294901760, %v410_v18  ;;  %v10325_v41 = vpack.c.bf16 %v10251_v62, %v10249_v61 }
  0x4b   :  { %8731 = vmatprep.subr.bf16.mxu0 %v11878_v0  ;;  %v10329_v18 = vpack.c.bf16 %v10266_v11, %v10264_v10  ;;  %v902_v10 = vld [vmem:[#allocation2 + $0x118] sm:$0xff] }
  0x4c   :  { %11990 = vst [vmem:[#allocation18_spill] sm:$0xff] %v10325_v41 }
  0x4d   :  { %11991 = vst [vmem:[#allocation19_spill] sm:$0xff] %v10329_v18 }
  0x4e   :  { %8733 = vmatpush3.bf16.msra.mxu0 %v8732_v47  ;;  %v368_v47 = vsub.f32 %v10226_v40, %v367_v44  ;;  %v12004_v40 = vand.u32 4294901760, %v10266_v11 }
  0x4f   :  { %8734 = vmatprep.subr.bf16.mxu0 %v11878_v0 }
  0x52   :  { %8736 = vmatpush3.bf16.msra.mxu0 %v8735_v50  ;;  %v362_v50 = vand.u32 4294901760, %v361_v46  ;;  %v11838_v46 = vand.u32 4294901760, %v10280_v19 }
  0x53   :  { %8737 = vmatprep.subr.bf16.mxu0 %v11878_v0 }
 0x108   :  { %v108_v55 = vpop.f32.mrb[0].mxu0 }
 0x109   :  { %vm112_vm1 = vcmp.gt.f32.partialorder %v108_v55, 0.0  ;;  %v113_v56 = vmul.f32 0.2, %v108_v55  ;;  %v6833_v57 = vpop.f32.mrb[1].mxu0 }
 0x10a   :  { %v381_v57 = vand.u32 4294901760, %v10240_v49 }
 0x10b   :  { %v114_v59 = vsel %vm112_vm1, %v108_v55, %v113_v56  ;;  %v369_v55 = vand.u32 4294901760, %v368_v47  ;;  %v374_v56 = vand.u32 4294901760, %v10238_v48  ;;  %v11837_v47 = vand.u32 4294901760, %v10282_v20 }
 0x10c   :  { %6867 = vmatmul.mubr.f32.vlgmr.msra.gmra.mrb[2].mxu0 %v114_v59  ;;  %v382_v63 = vsub.f32 %v10240_v49, %v381_v57 }
 0x10d   :  { %8739 = vmatpush3.bf16.msra.mxu0 %v10175_v58  ;;  %6901 = vmatprep.mubr.msk.f32.mxu0 %vm10107_vm0, %v11844_v1  ;;  %v10244_v59 = vpack.c.bf16 %v369_v55, %v362_v50  ;;  %v375_v60 = vsub.f32 %v10238_v48, %v374_v56  ;;  %v10286_v50 = vpack.c.bf16 %v411_v42, %v404_v21  ;;  %v12007_v48 = vand.u32 4294901760, %v10282_v20 }
 0x10e   :  { %8740 = vmatprep.subr.bf16.mxu0 %v11878_v0  ;;  %v383_v6 = vand.u32 4294901760, %v382_v63  ;;  %v417_v55 = vsub.f32 %v10280_v19, %v11838_v46  ;;  %v10294_v63 = vsub.f32 %v216_v28, %v284_v30  ;;  %v424_v23 = vsub.f32 %v10282_v20, %v11837_v47 }
 0x10f   :  { %11981 = vst [vmem:[#allocation9_spill] sm:$0xff] %v10244_v59  ;;  %v376_v3 = vand.u32 4294901760, %v375_v60  ;;  %11984 = vst [vmem:[#allocation12_spill] sm:$0xff] %v10286_v50  ;;  %v10292_v60 = vsub.f32 %v10199_v25, %v281_v29  ;;  %v10333_v21 = vpack.c.bf16 %v10282_v20, %v10280_v19  ;;  %v10468_v33 = vpack.c.bf16 %v381_v57, %v374_v56  ;;  %v904_v20 = vld [vmem:[#allocation2 + $0x128] sm:$0xff] }
 0x110   :  { %v418_v24 = vand.u32 4294901760, %v417_v55  ;;  %v11835_v27 = vand.u32 4294901760, %v10294_v63  ;;  %v12010_v57 = vand.u32 4294901760, %v10294_v63 }
 0x111   :  { %8742 = vmatpush3.bf16.msra.mxu0 %v10181_v2  ;;  %v10268_v13 = vpack.c.bf16 %v383_v6, %v376_v3  ;;  %v11836_v26 = vand.u32 4294901760, %v10292_v60  ;;  %v425_v3 = vand.u32 4294901760, %v424_v23  ;;  %11992 = vst [vmem:[#allocation20_spill] sm:$0xff] %v10333_v21  ;;  %v10337_v42 = vpack.c.bf16 %v10294_v63, %v10292_v60  ;;  %11999 = vst [vmem:[#allocation27_spill] sm:$0xff] %v10468_v33 }
 0x112   :  { %8743 = vmatprep.subr.bf16.mxu0 %v11878_v0  ;;  %v438_v25 = vsub.f32 %v10294_v63, %v11835_v27  ;;  %v12009_v56 = vand.u32 4294901760, %v10292_v60  ;;  %v905_v63 = vld [vmem:[#allocation2 + $0x130] sm:$0xff] }
 0x113   :  { %11982 = vst [vmem:[#allocation10_spill] sm:$0xff] %v10268_v13  ;;  %v431_v6 = vsub.f32 %v10292_v60, %v11836_v26  ;;  %v10307_v28 = vpack.c.bf16 %v425_v3, %v418_v24  ;;  %11993 = vst [vmem:[#allocation21_spill] sm:$0xff] %v10337_v42 }
 0x114   :  { %v439_v30 = vand.u32 4294901760, %v438_v25  ;;  %v10500_v61 = vpack.c.bf16 %v12010_v57, %v12009_v56 }
 0x115   :  { %8745 = vmatpush3.bf16.msra.mxu0 %v10185_v7  ;;  %11985 = vst [vmem:[#allocation13_spill] sm:$0xff] %v10307_v28  ;;  %v432_v29 = vand.u32 4294901760, %v431_v6 }
 0x116   :  { %8746 = vmatprep.subr.bf16.mxu0 %v11878_v0  ;;  %12011 = vst [vmem:[#allocation31_spill] sm:$0xff] %v10500_v61 }
 0x117   :  { %v10309_v8 = vpack.c.bf16 %v439_v30, %v432_v29 }
 0x119   :  { %8748 = vmatpush3.bf16.msra.mxu0 %v10189_v12  ;;  %11986 = vst [vmem:[#allocation14_spill] sm:$0xff] %v10309_v8 }
 0x11a   :  { %8749 = vmatprep.subr.bf16.mxu0 %v11878_v0 }
 0x11d   :  { %8751 = vmatpush3.bf16.msra.mxu0 %v10193_v17 }
 0x11e   :  { %8752 = vmatprep.subr.bf16.mxu0 %v11878_v0 }
 0x121   :  { %8754 = vmatpush3.bf16.msra.mxu0 %v10197_v22 }
 0x122   :  { %8755 = vmatprep.subr.bf16.mxu0 %v11878_v0 }
 0x125   :  { %8757 = vmatpush3.bf16.msra.mxu0 %v10204_v31 }
 0x126   :  { %8758 = vmatprep.subr.bf16.mxu0 %v11878_v0 }
 0x129   :  { %8760 = vmatpush3.bf16.msra.mxu0 %v10207_v32 }
 0x12a   :  { %8761 = vmatprep.subr.bf16.mxu0 %v11878_v0 }
 0x1df   :  { %v10339_v55 = vpop.f32.mrb[2].mxu0 }
 0x1e0   :  { %v218_v23 = vsel %vm217_vm2, %v10339_v55, 0.0  ;;  %v227_v24 = vmul.f32 %v10339_v55, %v10339_v55  ;;  %v6868_v3 = vpop.f32.mrb[3].mxu0 }
 0x1e1   :  { %v219_v6 = vrot.slane %v218_v23, 4  ;;  %v10354_v3 = vsub.f32 %v10167_v52, %v242_v54 }
 0x1e2   :  { %v228_v25 = vsel %vm217_vm2, %v227_v24, 0.0 }
 0x1e3   :  { %v220_v29 = vadd.f32 %v219_v6, %v218_v23  ;;  %v229_v30 = vrot.slane %v228_v25, 4  ;;  %v332_v6 = vand.u32 4294901760, %v10349_v5 }
 0x1e5   :  { %v221_v27 = vrot.slane %v220_v29, 2  ;;  %v230_v26 = vadd.f32 %v229_v30, %v228_v25  ;;  %v333_v51 = vsub.f32 %v10349_v5, %v332_v6 }
 0x1e7   :  { %v222_v47 = vadd.f32 %v221_v27, %v220_v29  ;;  %v231_v46 = vrot.slane %v230_v26, 2  ;;  %v339_v27 = vand.u32 4294901760, %v10354_v3 }
 0x1e9   :  { %v223_v37 = vrot.slane %v222_v47, 1  ;;  %v232_v16 = vadd.f32 %v231_v46, %v230_v26  ;;  %v340_v52 = vsub.f32 %v10354_v3, %v339_v27 }
 0x1eb   :  { %v224_v4 = vadd.f32 %v223_v37, %v222_v47  ;;  %v233_v24 = vrot.slane %v232_v16, 1  ;;  %v341_v37 = vand.u32 4294901760, %v340_v52  ;;  %v908_v52 = vld [vmem:[#allocation2 + $0x148] sm:$0xff] }
 0x1ed   :  { %v234_v23 = vadd.f32 %v233_v24, %v232_v16  ;;  %v226_v25 = vmul.f32 0.25, %v224_v4  ;;  %v334_v16 = vand.u32 4294901760, %v333_v51  ;;  %v10395_v24 = vpack.c.bf16 %v10354_v3, %v10349_v5  ;;  %v906_v3 = vld [vmem:[#allocation2 + $0x138] sm:$0xff] }
 0x1ee   :  { %v10450_v51 = vpack.c.bf16 %v353_v36, %v346_v35  ;;  %v10460_v5 = vpack.c.bf16 %v367_v44, %v360_v43  ;;  %v12001_v35 = vand.u32 4294901760, %v10251_v62  ;;  %v10484_v43 = vpack.c.bf16 %v12004_v40, %v12003_v39  ;;  %v901_v62 = vld [vmem:[#allocation2 + $0x110] sm:$0xff] }
 0x1ef   :  { %v235_v46 = vmul.f32 0.25, %v234_v23  ;;  %v10374_v29 = vpack.c.bf16 %v341_v37, %v334_v16  ;;  %11995 = vst [vmem:[#allocation23_spill] sm:$0xff] %v10395_v24  ;;  %v899_v23 = vld [vmem:[#allocation2 + $0x100] sm:$0xff]  ;;  %v12006_v44 = vand.u32 4294901760, %v10280_v19  ;;  %v8885_v11 = vpack.c.bf16 %v902_v10, %v901_v62  ;;  %v910_v16 = vld [vmem:[#allocation2 + $0x158] sm:$0xff] }
 0x1f0   :  { %11997 = vst [vmem:[#allocation25_spill] sm:$0xff] %v10450_v51  ;;  %11998 = vst [vmem:[#allocation26_spill] sm:$0xff] %v10460_v5  ;;  %v10476_v36 = vpack.c.bf16 %v12001_v35, %v12000_v34  ;;  %v903_v19 = vld [vmem:[#allocation2 + $0x120] sm:$0xff]  ;;  %v11843_v34 = vlaneseq }
 0x1f1   :  { %v237_v26 = vsel %vm236_vm3, %v226_v25, %v235_v46  ;;  %11994 = vst [vmem:[#allocation22_spill] sm:$0xff] %v10374_v29  ;;  %v900_v25 = vld [vmem:[#allocation2 + $0x108] sm:$0xff]  ;;  %12005 = vst [vmem:[#allocation29_spill] sm:$0xff] %v10484_v43  ;;  %v10492_v49 = vpack.c.bf16 %v12007_v48, %v12006_v44  ;;  %v8888_v60 = vpack.c.bf16 %v904_v20, %v903_v19  ;;  %v10541_v20 = vld [vmem:[#allocation2 + $0x680] sm:$0xff] }
 0x1f2   :  { %v10365_v53 = vand.u32 4294901760, %v237_v26  ;;  %v8882_v46 = vpack.c.bf16 %v900_v25, %v899_v23  ;;  %12002 = vst [vmem:[#allocation28_spill] sm:$0xff] %v10476_v36  ;;  %v913_v23 = vld [vmem:[#allocation2 + $0x170] sm:$0xff]  ;;  %v914_v25 = vld [vmem:[#allocation2 + $0x178] sm:$0xff]  ;;  %v885_v35 = vshrl.u32 %v11843_v34, 7 }
 0x1f3   :  { %12008 = vst [vmem:[#allocation30_spill] sm:$0xff] %v10492_v49 }
 0x1f4   :  { %v10368_v54 = vsub.f32 %v237_v26, %v10365_v53  ;;  %8883 = vmatpush3.bf16.msra.mxu1 %v8882_v46  ;;  %v10440_v26 = vpack.c.bf16 %v339_v27, %v332_v6  ;;  %v8891_v6 = vpack.c.bf16 %v906_v3, %v905_v63  ;;  %v907_v27 = vld [vmem:[#allocation2 + $0x140] sm:$0xff]  ;;  %v8903_v46 = vpack.c.bf16 %v914_v25, %v913_v23  ;;  %v990_v25 = vld [vmem:[#allocation2 + $0x6a8] sm:$0xff] }
 0x1f5   :  { %8884 = vmatprep.subr.bf16.mxu1 %v11878_v0  ;;  %v10535_v39 = vsub.s32 0, %v885_v35  ;;  %v10539_v19 = vsub.s32 1, %v885_v35  ;;  %v989_v23 = vld [vmem:[#allocation2 + $0x6a0] sm:$0xff]  ;;  %v1035_v35 = vand.u32 4294901760, %v990_v25 }
 0x1f6   :  { %v321_v4 = vand.u32 4294901760, %v10368_v54  ;;  %11996 = vst [vmem:[#allocation24_spill] sm:$0xff] %v10440_v26 }
 0x1f8   :  { %v322_v47 = vsub.f32 %v10368_v54, %v321_v4  ;;  %8886 = vmatpush3.bf16.msra.mxu1 %v8885_v11 }
 0x1f9   :  { %8887 = vmatprep.subr.bf16.mxu1 %v11878_v0 }
 0x1fa   :  { %v323_v30 = vand.u32 4294901760, %v322_v47  ;;  %v912_v47 = vld [vmem:[#allocation2 + $0x168] sm:$0xff] }
 0x1fc   :  { %6902 = vmatmul.mubr.f32.vlgmr.msra.gmra.mrb[4].mxu0 %v323_v30  ;;  %8889 = vmatpush3.bf16.msra.mxu1 %v8888_v60  ;;  %v10543_v60 = vld [vmem:[#allocation2 + $0x688] sm:$0xff] }
 0x1fd   :  { %8763 = vmatpush3.bf16.msra.mxu0 %v10374_v29  ;;  %6936 = vmatprep.mubr.msk.f32.mxu0 %vm10107_vm0, %v11844_v1 }
 0x1fe   :  { %8764 = vmatprep.subr.bf16.mxu0 %v11878_v0  ;;  %8890 = vmatprep.subr.bf16.mxu1 %v11878_v0 }
 0x200   :  { %8892 = vmatpush3.bf16.msra.mxu1 %v8891_v6  ;;  %v11847_v6 = vand.u32 4294901760, %v10541_v20 }
 0x201   :  { %8766 = vmatpush3.bf16.msra.mxu0 %v10230_v45  ;;  %8893 = vmatprep.subr.bf16.mxu1 %v11878_v0  ;;  %v12034_v45 = vand.u32 4294901760, %v10541_v20 }
 0x202   :  { %8767 = vmatprep.subr.bf16.mxu0 %v11878_v0 }
 0x203   :  { %v10726_v29 = vsub.f32 %v10541_v20, %v12034_v45 }
 0x205   :  { %8769 = vmatpush3.bf16.msra.mxu0 %v10244_v59 }
 0x206   :  { %8770 = vmatprep.subr.bf16.mxu0 %v11878_v0 }
 0x209   :  { %8772 = vmatpush3.bf16.msra.mxu0 %v10268_v13 }
 0x20a   :  { %8773 = vmatprep.subr.bf16.mxu0 %v11878_v0 }
 0x20d   :  { %8775 = vmatpush3.bf16.msra.mxu0 %v10272_v38 }
 0x20e   :  { %8776 = vmatprep.subr.bf16.mxu0 %v11878_v0 }
 0x211   :  { %8778 = vmatpush3.bf16.msra.mxu0 %v10286_v50 }
 0x212   :  { %8779 = vmatprep.subr.bf16.mxu0 %v11878_v0 }
 0x215   :  { %8781 = vmatpush3.bf16.msra.mxu0 %v10307_v28 }
 0x216   :  { %8782 = vmatprep.subr.bf16.mxu0 %v11878_v0 }
 0x219   :  { %8784 = vmatpush3.bf16.msra.mxu0 %v10309_v8 }
 0x21a   :  { %8785 = vmatprep.subr.bf16.mxu0 %v11878_v0 }
 0x21c   :  { %6937 = vmatmul.mubr.f32.vlgmr.msra.gmra.mrb[4].mxu0 %v10365_v53 }
 0x21d   :  { %8787 = vmatpush3.bf16.msra.mxu0 %v10395_v24  ;;  %6971 = vmatprep.mubr.msk.f32.mxu0 %vm10107_vm0, %v11844_v1 }
 0x21e   :  { %8788 = vmatprep.subr.bf16.mxu0 %v11878_v0 }
 0x221   :  { %8790 = vmatpush3.bf16.msra.mxu0 %v10313_v9 }
 0x222   :  { %8791 = vmatprep.subr.bf16.mxu0 %v11878_v0 }
 0x225   :  { %8793 = vmatpush3.bf16.msra.mxu0 %v10317_v14 }
 0x226   :  { %8794 = vmatprep.subr.bf16.mxu0 %v11878_v0 }
 0x229   :  { %8796 = vmatpush3.bf16.msra.mxu0 %v10321_v15 }
 0x22a   :  { %8797 = vmatprep.subr.bf16.mxu0 %v11878_v0 }
 0x22d   :  { %8799 = vmatpush3.bf16.msra.mxu0 %v10325_v41 }
 0x22e   :  { %8800 = vmatprep.subr.bf16.mxu0 %v11878_v0 }
 0x231   :  { %8802 = vmatpush3.bf16.msra.mxu0 %v10329_v18 }
 0x232   :  { %8803 = vmatprep.subr.bf16.mxu0 %v11878_v0 }
 0x235   :  { %8805 = vmatpush3.bf16.msra.mxu0 %v10333_v21 }
 0x236   :  { %8806 = vmatprep.subr.bf16.mxu0 %v11878_v0 }
 0x239   :  { %8808 = vmatpush3.bf16.msra.mxu0 %v10337_v42 }
 0x23a   :  { %8809 = vmatprep.subr.bf16.mxu0 %v11878_v0 }
 0x23c   :  { %6972 = vmatmul.mubr.f32.vlgmr.msra.gmra.mrb[4].mxu0 %v10368_v54  ;;  %v8894_v54 = vpack.c.bf16 %v908_v52, %v907_v27  ;;  %v11846_v27 = vand.u32 4294901760, %v10543_v60 }
 0x23d   :  { %8811 = vmatpush3.bf16.msra.mxu0 %v10175_v58  ;;  %7006 = vmatprep.mubr.msk.f32.mxu0 %vm10107_vm0, %v11844_v1 }
 0x23e   :  { %8812 = vmatprep.subr.bf16.mxu0 %v11878_v0  ;;  %8895 = vmatpush3.bf16.msra.mxu1 %v8894_v54 }
 0x23f   :  { %8896 = vmatprep.subr.bf16.mxu1 %v11878_v0 }
 0x241   :  { %8814 = vmatpush3.bf16.msra.mxu0 %v10181_v2 }
 0x242   :  { %8815 = vmatprep.subr.bf16.mxu0 %v11878_v0 }
 0x245   :  { %8817 = vmatpush3.bf16.msra.mxu0 %v10185_v7 }
 0x246   :  { %8818 = vmatprep.subr.bf16.mxu0 %v11878_v0 }
 0x249   :  { %8820 = vmatpush3.bf16.msra.mxu0 %v10189_v12 }
 0x24a   :  { %8821 = vmatprep.subr.bf16.mxu0 %v11878_v0 }
 0x24d   :  { %8823 = vmatpush3.bf16.msra.mxu0 %v10193_v17 }
 0x24e   :  { %8824 = vmatprep.subr.bf16.mxu0 %v11878_v0 }
 0x251   :  { %8826 = vmatpush3.bf16.msra.mxu0 %v10197_v22 }
 0x252   :  { %8827 = vmatprep.subr.bf16.mxu0 %v11878_v0 }
 0x255   :  { %8829 = vmatpush3.bf16.msra.mxu0 %v10204_v31 }
 0x256   :  { %8830 = vmatprep.subr.bf16.mxu0 %v11878_v0 }
 0x259   :  { %8832 = vmatpush3.bf16.msra.mxu0 %v10207_v32 }
 0x25a   :  { %8833 = vmatprep.subr.bf16.mxu0 %v11878_v0 }
 0x25c   :  { %7007 = vmatmul.mubr.f32.vlgmr.msra.gmra.mrb[4].mxu0 %v321_v4  ;;  %v911_v4 = vld [vmem:[#allocation2 + $0x160] sm:$0xff] }
 0x25d   :  { %8835 = vmatpush3.bf16.msra.mxu0 %v10440_v26  ;;  %7041 = vmatprep.mubr.msk.f32.mxu0 %vm10107_vm0, %v11844_v1  ;;  %v8900_v30 = vpack.c.bf16 %v912_v47, %v911_v4 }
 0x25e   :  { %8836 = vmatprep.subr.bf16.mxu0 %v11878_v0 }
 0x261   :  { %8838 = vmatpush3.bf16.msra.mxu0 %v10450_v51 }
 0x262   :  { %8839 = vmatprep.subr.bf16.mxu0 %v11878_v0 }
 0x265   :  { %8841 = vmatpush3.bf16.msra.mxu0 %v10460_v5 }
 0x266   :  { %8842 = vmatprep.subr.bf16.mxu0 %v11878_v0 }
 0x269   :  { %8844 = vmatpush3.bf16.msra.mxu0 %v10468_v33  ;;  %v1000_v33 = vld [vmem:[#allocation2 + $0x6f8] sm:$0xff] }
 0x26a   :  { %8845 = vmatprep.subr.bf16.mxu0 %v11878_v0  ;;  %v1065_v51 = vand.u32 4294901760, %v1000_v33 }
 0x26d   :  { %8847 = vmatpush3.bf16.msra.mxu0 %v10476_v36 }
 0x26e   :  { %8848 = vmatprep.subr.bf16.mxu0 %v11878_v0 }
 0x271   :  { %8850 = vmatpush3.bf16.msra.mxu0 %v10484_v43 }
 0x272   :  { %8851 = vmatprep.subr.bf16.mxu0 %v11878_v0 }
 0x275   :  { %8853 = vmatpush3.bf16.msra.mxu0 %v10492_v49  ;;  %v10576_v49 = vld [vmem:[#allocation2 + $0x6f0] sm:$0xff] }
 0x276   :  { %8854 = vmatprep.subr.bf16.mxu0 %v11878_v0  ;;  %v1062_v5 = vand.u32 4294901760, %v10576_v49 }
 0x278   :  { %v10584_v42 = vpack.c.bf16 %v1065_v51, %v1062_v5 }
 0x279   :  { %8856 = vmatpush3.bf16.msra.mxu0 %v10500_v61  ;;  %v998_v61 = vld [vmem:[#allocation2 + $0x6e8] sm:$0xff] }
 0x27a   :  { %8857 = vmatprep.subr.bf16.mxu0 %v11878_v0  ;;  %v1059_v36 = vand.u32 4294901760, %v998_v61  ;;  %12019 = vst [vmem:[#allocation39_spill] sm:$0xff] %v10584_v42 }
 0x27c   :  { %7042 = vmatmul.mubr.f32.vlgmr.msra.gmra.mrb[4].mxu0 %v10365_v53 }
 0x27d   :  { %8859 = vmatpush3.bf16.msra.mxu0 %v10175_v58  ;;  %7076 = vmatprep.mubr.msk.f32.mxu0 %vm10107_vm0, %v11844_v1 }
 0x27e   :  { %8860 = vmatprep.subr.bf16.mxu0 %v11878_v0 }
 0x281   :  { %8862 = vmatpush3.bf16.msra.mxu0 %v10181_v2 }
 0x282   :  { %8863 = vmatprep.subr.bf16.mxu0 %v11878_v0 }
 0x285   :  { %8865 = vmatpush3.bf16.msra.mxu0 %v10185_v7 }
 0x286   :  { %8866 = vmatprep.subr.bf16.mxu0 %v11878_v0 }
 0x289   :  { %8868 = vmatpush3.bf16.msra.mxu0 %v10189_v12 }
 0x28a   :  { %8869 = vmatprep.subr.bf16.mxu0 %v11878_v0 }
 0x28d   :  { %8871 = vmatpush3.bf16.msra.mxu0 %v10193_v17 }
 0x28e   :  { %8872 = vmatprep.subr.bf16.mxu0 %v11878_v0 }
 0x291   :  { %8874 = vmatpush3.bf16.msra.mxu0 %v10197_v22 }
 0x292   :  { %8875 = vmatprep.subr.bf16.mxu0 %v11878_v0 }
 0x295   :  { %8877 = vmatpush3.bf16.msra.mxu0 %v10204_v31 }
 0x296   :  { %8878 = vmatprep.subr.bf16.mxu0 %v11878_v0 }
 0x299   :  { %8880 = vmatpush3.bf16.msra.mxu0 %v10207_v32  ;;  %v12035_v32 = vand.u32 4294901760, %v10543_v60 }
 0x29a   :  { %9049 = vmatprep.subr.bf16.mxu0 %v11878_v0 }
 0x29c   :  { %7077 = vmatmul.mubr.f32.vlgmr.msra.gmra.mrb[4].mxu0 %v10365_v53  ;;  %v909_v53 = vld [vmem:[#allocation2 + $0x150] sm:$0xff] }
 0x29d   :  { %7356 = vmatprep.mubr.msk.f32.mxu0 %vm10107_vm0, %v11844_v1  ;;  %v8897_v37 = vpack.c.bf16 %v910_v16, %v909_v53  ;;  %v987_v16 = vld [vmem:[#allocation2 + $0x690] sm:$0xff] }
 0x29e   :  { %v1026_v4 = vand.u32 4294901760, %v987_v16 }
 0x29f   :  { %8898 = vmatpush3.bf16.msra.mxu1 %v8897_v37  ;;  %v988_v37 = vld [vmem:[#allocation2 + $0x698] sm:$0xff] }
 0x2a0   :  { %8899 = vmatprep.subr.bf16.mxu1 %v11878_v0  ;;  %v1029_v47 = vand.u32 4294901760, %v988_v37  ;;  %v10587_v21 = vsub.f32 %v987_v16, %v1026_v4 }
 0x2a2   :  { %v10589_v18 = vsub.f32 %v988_v37, %v1029_v47  ;;  %v11884_v41 = vand.u32 4294901760, %v10587_v21  ;;  %v10603_v37 = vsub.f32 %v990_v25, %v1035_v35 }
 0x2a3   :  { %8901 = vmatpush3.bf16.msra.mxu1 %v8900_v30  ;;  %v10558_v30 = vpack.c.bf16 %v1029_v47, %v1026_v4 }
 0x2a4   :  { %8902 = vmatprep.subr.bf16.mxu1 %v11878_v0  ;;  %v11885_v15 = vand.u32 4294901760, %v10589_v18  ;;  %v1128_v14 = vsub.f32 %v10587_v21, %v11884_v41  ;;  %v11899_v24 = vand.u32 4294901760, %v10603_v37 }
 0x2a5   :  { %12013 = vst [vmem:[#allocation33_spill] sm:$0xff] %v10558_v30 }
 0x2a6   :  { %v1135_v9 = vsub.f32 %v10589_v18, %v11885_v15  ;;  %v1129_v4 = vand.u32 4294901760, %v1128_v14  ;;  %v1149_v15 = vsub.f32 %v10603_v37, %v11899_v24 }
 0x2a7   :  { %8904 = vmatpush3.bf16.msra.mxu1 %v8903_v46  ;;  %v1032_v46 = vand.u32 4294901760, %v989_v23 }
 0x2a8   :  { %8905 = vmatprep.subr.bf16.mxu1 %v11878_v0  ;;  %v1136_v47 = vand.u32 4294901760, %v1135_v9  ;;  %v1150_v9 = vand.u32 4294901760, %v1149_v15 }
 0x2a9   :  { %v10601_v16 = vsub.f32 %v989_v23, %v1032_v46 }
 0x2aa   :  { %v10607_v8 = vpack.c.bf16 %v1136_v47, %v1129_v4 }
 0x2ac   :  { %12020 = vst [vmem:[#allocation40_spill] sm:$0xff] %v10607_v8 }
 0x36f   :  { %v875_v40 = vpop.f32.mrb[4].mxu0 }
 0x370   :  { %v879_v44 = vmul.f32 %v875_v40, %v875_v40  ;;  %v887_v48 = vrot.slane %v875_v40, %v10535_v39  ;;  %v7078_v56 = vpop.f32.mrb[5].mxu0 }
 0x372   :  { %v881_v57 = vrot.slane %v879_v44, 7  ;;  %v888_v62 = vsub.f32 %v10339_v55, %v887_v48  ;;  %v10552_v55 = vpack.c.bf16 %v11846_v27, %v11847_v6  ;;  %v991_v44 = vld [vmem:[#allocation2 + $0x6b0] sm:$0xff]  ;;  %v992_v48 = vld [vmem:[#allocation2 + $0x6b8] sm:$0xff]  ;;  %v997_v6 = vld [vmem:[#allocation2 + $0x6e0] sm:$0xff] }
 0x373   :  { %v1038_v56 = vand.u32 4294901760, %v991_v44  ;;  %v1056_v43 = vand.u32 4294901760, %v997_v6 }
 0x374   :  { %v883_v10 = vsub.f32 %v875_v40, %v881_v57  ;;  %12012 = vst [vmem:[#allocation32_spill] sm:$0xff] %v10552_v55  ;;  %v10562_v40 = vpack.c.bf16 %v1035_v35, %v1032_v46  ;;  %v1041_v57 = vand.u32 4294901760, %v992_v48 }
 0x375   :  { %v10581_v26 = vpack.c.bf16 %v1059_v36, %v1056_v43  ;;  %v10615_v23 = vsub.f32 %v991_v44, %v1038_v56 }
 0x376   :  { %v889_v11 = vadd.f32 1e-05, %v883_v10  ;;  %12014 = vst [vmem:[#allocation34_spill] sm:$0xff] %v10562_v40  ;;  %v993_v10 = vld [vmem:[#allocation2 + $0x6c0] sm:$0xff]  ;;  %v10617_v25 = vsub.f32 %v992_v48, %v1041_v57 }
 0x377   :  { %12018 = vst [vmem:[#allocation38_spill] sm:$0xff] %v10581_v26  ;;  %v11898_v46 = vand.u32 4294901760, %v10615_v23 }
 0x378   :  { %10063 = vrsqrt.f32 %v889_v11  ;;  %v994_v11 = vld [vmem:[#allocation2 + $0x6c8] sm:$0xff]  ;;  %v11889_v35 = vand.u32 4294901760, %v10617_v25 }
 0x379   :  { %v1156_v47 = vsub.f32 %v10615_v23, %v11898_v46 }
 0x37a   :  { %v1163_v44 = vsub.f32 %v10617_v25, %v11889_v35 }
 0x382   :  { %v10064_v63 = vpop.eup %10063 }
 0x383   :  { %v894_v3 = vrot.slane %v10064_v63, %v10539_v19  ;;  %v1044_v63 = vand.u32 4294901760, %v993_v10 }
 0x385   :  { %v895_v52 = vmul.f32 %v894_v3, %v888_v62  ;;  %v10566_v62 = vpack.c.bf16 %v1041_v57, %v1038_v56  ;;  %v1047_v3 = vand.u32 4294901760, %v994_v11  ;;  %v1164_v56 = vand.u32 4294901760, %v1163_v44 }
 0x387   :  { %vm896_vm4 = vcmp.gt.f32.partialorder %v895_v52, 0.0  ;;  %v897_v53 = vmul.f32 0.2, %v895_v52  ;;  %12015 = vst [vmem:[#allocation35_spill] sm:$0xff] %v10566_v62  ;;  %v10628_v28 = vsub.f32 %v994_v11, %v1047_v3 }
 0x389   :  { %v898_v54 = vsel %vm896_vm4, %v895_v52, %v897_v53  ;;  %v10570_v52 = vpack.c.bf16 %v1047_v3, %v1044_v63  ;;  %v995_v53 = vld [vmem:[#allocation2 + $0x6d0] sm:$0xff]  ;;  %v11897_v48 = vand.u32 4294901760, %v10628_v28 }
 0x38a   :  { %7112 = vmatmul.mubr.f32.vlgmr.msra.gmra.mrb[0].mxu1 %v898_v54  ;;  %v996_v54 = vld [vmem:[#allocation2 + $0x6d8] sm:$0xff]  ;;  %v1050_v34 = vand.u32 4294901760, %v995_v53 }
 0x38b   :  { %8907 = vmatpush3.bf16.msra.mxu1 %v10552_v55  ;;  %7146 = vmatprep.mubr.msk.f32.mxu1 %vm10107_vm0, %v11844_v1  ;;  %12016 = vst [vmem:[#allocation36_spill] sm:$0xff] %v10570_v52  ;;  %v1053_v1 = vand.u32 4294901760, %v996_v54 }
 0x38c   :  { %8908 = vmatprep.subr.bf16.mxu1 %v11878_v0  ;;  %v10641_v11 = vsub.f32 %v995_v53, %v1050_v34  ;;  %v10659_v53 = vsub.f32 %v998_v61, %v1059_v36 }
 0x38d   :  { %v10574_v27 = vpack.c.bf16 %v1053_v1, %v1050_v34 }
 0x38f   :  { %8910 = vmatpush3.bf16.msra.mxu1 %v10558_v30  ;;  %12017 = vst [vmem:[#allocation37_spill] sm:$0xff] %v10574_v27 }
 0x390   :  { %8911 = vmatprep.subr.bf16.mxu1 %v11878_v0 }
 0x393   :  { %8913 = vmatpush3.bf16.msra.mxu1 %v10562_v40 }
 0x394   :  { %8914 = vmatprep.subr.bf16.mxu1 %v11878_v0 }
 0x397   :  { %8916 = vmatpush3.bf16.msra.mxu1 %v10566_v62 }
 0x398   :  { %8917 = vmatprep.subr.bf16.mxu1 %v11878_v0 }
 0x39b   :  { %8919 = vmatpush3.bf16.msra.mxu1 %v10570_v52 }
 0x39c   :  { %8920 = vmatprep.subr.bf16.mxu1 %v11878_v0 }
 0x39f   :  { %8922 = vmatpush3.bf16.msra.mxu1 %v10574_v27 }
 0x3a0   :  { %8923 = vmatprep.subr.bf16.mxu1 %v11878_v0 }
 0x3a3   :  { %8925 = vmatpush3.bf16.msra.mxu1 %v10581_v26 }
 0x3a4   :  { %8926 = vmatprep.subr.bf16.mxu1 %v11878_v0 }
 0x3a7   :  { %8928 = vmatpush3.bf16.msra.mxu1 %v10584_v42 }
 0x3a8   :  { %8929 = vmatprep.subr.bf16.mxu1 %v11878_v0  ;;  %v11886_v0 = vand.u32 4294901760, %v10601_v16 }
 0x3aa   :  { %v1142_v41 = vsub.f32 %v10601_v16, %v11886_v0  ;;  %v10626_v0 = vsub.f32 %v993_v10, %v1044_v63  ;;  %v1177_v10 = vsub.f32 %v10628_v28, %v11897_v48  ;;  %v10643_v63 = vsub.f32 %v996_v54, %v1053_v1 }
 0x3ab   :  { %v10657_v1 = vsub.f32 %v997_v6, %v1056_v43 }
 0x3ac   :  { %v1143_v14 = vand.u32 4294901760, %v1142_v41  ;;  %v1157_v41 = vand.u32 4294901760, %v1156_v47  ;;  %v11890_v15 = vand.u32 4294901760, %v10626_v0  ;;  %v11896_v47 = vand.u32 4294901760, %v10641_v11 }
 0x3ad   :  { %v11891_v44 = vand.u32 4294901760, %v10643_v63 }
 0x3ae   :  { %v10621_v4 = vpack.c.bf16 %v1150_v9, %v1143_v14  ;;  %v1170_v57 = vsub.f32 %v10626_v0, %v11890_v15  ;;  %v10645_v3 = vpack.c.bf16 %v1164_v56, %v1157_v41  ;;  %v1178_v9 = vand.u32 4294901760, %v1177_v10 }
 0x3af   :  { %v1184_v15 = vsub.f32 %v10641_v11, %v11896_v47  ;;  %v1191_v34 = vsub.f32 %v10643_v63, %v11891_v44  ;;  %v11895_v56 = vand.u32 4294901760, %v10657_v1  ;;  %v10671_v44 = vsub.f32 %v1000_v33, %v1065_v51 }
 0x3b0   :  { %12021 = vst [vmem:[#allocation41_spill] sm:$0xff] %v10621_v4  ;;  %12022 = vst [vmem:[#allocation42_spill] sm:$0xff] %v10645_v3  ;;  %v1171_v14 = vand.u32 4294901760, %v1170_v57  ;;  %v11894_v57 = vand.u32 4294901760, %v10659_v53 }
 0x3b1   :  { %v1185_v54 = vand.u32 4294901760, %v1184_v15  ;;  %v1192_v41 = vand.u32 4294901760, %v1191_v34  ;;  %v11892_v6 = vand.u32 4294901760, %v10671_v44 }
 0x3b2   :  { %v10649_v35 = vpack.c.bf16 %v1178_v9, %v1171_v14  ;;  %v1198_v14 = vsub.f32 %v10657_v1, %v11895_v56  ;;  %v10669_v9 = vsub.f32 %v10576_v49, %v1062_v5  ;;  %v1205_v36 = vsub.f32 %v10659_v53, %v11894_v57 }
 0x3b3   :  { %v10663_v10 = vpack.c.bf16 %v1192_v41, %v1185_v54  ;;  %v1219_v5 = vsub.f32 %v10671_v44, %v11892_v6  ;;  %v10690_v41 = vpack.c.bf16 %v10589_v18, %v10587_v21 }
 0x3b4   :  { %12023 = vst [vmem:[#allocation43_spill] sm:$0xff] %v10649_v35  ;;  %v1199_v43 = vand.u32 4294901760, %v1198_v14  ;;  %v11893_v61 = vand.u32 4294901760, %v10669_v9  ;;  %v1206_v15 = vand.u32 4294901760, %v1205_v36  ;;  %v10694_v14 = vpack.c.bf16 %v10603_v37, %v10601_v16 }
 0x3b5   :  { %12024 = vst [vmem:[#allocation44_spill] sm:$0xff] %v10663_v10  ;;  %v1220_v49 = vand.u32 4294901760, %v1219_v5  ;;  %12027 = vst [vmem:[#allocation47_spill] sm:$0xff] %v10690_v41  ;;  %v10698_v36 = vpack.c.bf16 %v10617_v25, %v10615_v23  ;;  %v10714_v5 = vpack.c.bf16 %v10671_v44, %v10669_v9 }
 0x3b6   :  { %v1212_v34 = vsub.f32 %v10669_v9, %v11893_v61  ;;  %v10684_v51 = vpack.c.bf16 %v1206_v15, %v1199_v43  ;;  %12028 = vst [vmem:[#allocation48_spill] sm:$0xff] %v10694_v14  ;;  %v10702_v43 = vpack.c.bf16 %v10628_v28, %v10626_v0  ;;  %v10706_v15 = vpack.c.bf16 %v10643_v63, %v10641_v11 }
 0x3b7   :  { %12029 = vst [vmem:[#allocation49_spill] sm:$0xff] %v10698_v36  ;;  %12033 = vst [vmem:[#allocation53_spill] sm:$0xff] %v10714_v5 }
 0x3b8   :  { %12025 = vst [vmem:[#allocation45_spill] sm:$0xff] %v10684_v51  ;;  %v1213_v33 = vand.u32 4294901760, %v1212_v34  ;;  %12030 = vst [vmem:[#allocation50_spill] sm:$0xff] %v10702_v43  ;;  %v10710_v34 = vpack.c.bf16 %v10659_v53, %v10657_v1 }
 0x3b9   :  { %12031 = vst [vmem:[#allocation51_spill] sm:$0xff] %v10706_v15 }
 0x3ba   :  { %v10686_v54 = vpack.c.bf16 %v1220_v49, %v1213_v33  ;;  %12032 = vst [vmem:[#allocation52_spill] sm:$0xff] %v10710_v34 }
 0x3bc   :  { %12026 = vst [vmem:[#allocation46_spill] sm:$0xff] %v10686_v54 }
 0x45d   :  { %v10716_v33 = vpop.f32.mrb[0].mxu1 }
 0x45e   :  { %v1001_v49 = vsel %vm217_vm2, %v10716_v33, 0.0  ;;  %v1009_v6 = vmul.f32 %v10716_v33, %v10716_v33  ;;  %v7113_v61 = vpop.f32.mrb[1].mxu1 }
 0x45f   :  { %v1002_v57 = vrot.slane %v1001_v49, 4  ;;  %v10731_v61 = vsub.f32 %v10543_v60, %v12035_v32 }
 0x460   :  { %v1010_v56 = vsel %vm217_vm2, %v1009_v6, 0.0 }
 0x461   :  { %v1003_v47 = vadd.f32 %v1002_v57, %v1001_v49  ;;  %v1011_v48 = vrot.slane %v1010_v56, 4  ;;  %v1113_v49 = vand.u32 4294901760, %v10726_v29 }
 0x463   :  { %v1004_v46 = vrot.slane %v1003_v47, 2  ;;  %v1012_v24 = vadd.f32 %v1011_v48, %v1010_v56  ;;  %v1114_v45 = vsub.f32 %v10726_v29, %v1113_v49 }
 0x465   :  { %v1005_v50 = vadd.f32 %v1004_v46, %v1003_v47  ;;  %v1013_v38 = vrot.slane %v1012_v24, 2  ;;  %v1120_v46 = vand.u32 4294901760, %v10731_v61 }
 0x467   :  { %v1006_v13 = vrot.slane %v1005_v50, 1  ;;  %v1014_v59 = vadd.f32 %v1013_v38, %v1012_v24  ;;  %v1121_v32 = vsub.f32 %v10731_v61, %v1120_v46 }
 0x469   :  { %v1007_v31 = vadd.f32 %v1006_v13, %v1005_v50  ;;  %v1015_v6 = vrot.slane %v1014_v59, 1  ;;  %v1115_v13 = vand.u32 4294901760, %v1114_v45  ;;  %v1122_v50 = vand.u32 4294901760, %v1121_v32 }
 0x46a   :  { %v10817_v32 = vpack.c.bf16 %v1120_v46, %v1113_v49 }
 0x46b   :  { %v1016_v57 = vadd.f32 %v1015_v6, %v1014_v59  ;;  %v1008_v48 = vmul.f32 0.25, %v1007_v31  ;;  %v10751_v60 = vpack.c.bf16 %v1122_v50, %v1115_v13  ;;  %v12037_v6 = vmov 0.0  }
 0x46c   :  { %12040 = vst [vmem:[#allocation56_spill] sm:$0xff] %v10817_v32  ;;  %v12041_v13 = vand.u32 4294901760, %v10587_v21  ;;  %v12042_v50 = vand.u32 4294901760, %v10589_v18  ;;  %v12047_v18 = vand.u32 4294901760, %v10615_v23  ;;  %v12048_v21 = vand.u32 4294901760, %v10617_v25 }
 0x46d   :  { %v1017_v47 = vmul.f32 0.25, %v1016_v57  ;;  %12036 = vst [vmem:[#allocation54_spill] sm:$0xff] %v10751_v60  ;;  %v12038_v57 = vmov 0.0|0.0   ;;  %v12053_v23 = vand.u32 4294901760, %v10641_v11  ;;  %v12054_v25 = vand.u32 4294901760, %v10643_v63 }
 0x46e   :  { %v10845_v46 = vpack.c.bf16 %v12048_v21, %v12047_v18  ;;  %v12059_v11 = vand.u32 4294901760, %v10669_v9  ;;  %v12060_v63 = vand.u32 4294901760, %v10671_v44  ;;  %v1682_v44 = vld [vmem:[#allocation2 + $0x190] sm:$0xff]  ;;  %v1684_v9 = vld [vmem:[#allocation2 + $0x1a0] sm:$0xff] }
 0x46f   :  { %v1018_v38 = vsel %vm236_vm3, %v1008_v48, %v1017_v47  ;;  %v10772_v48 = vpack.c.bf16 %v10731_v61, %v10726_v29  ;;  %v1680_v47 = vld [vmem:[#allocation2 + $0x180] sm:$0xff]  ;;  %v12044_v29 = vand.u32 4294901760, %v10601_v16  ;;  %v12045_v61 = vand.u32 4294901760, %v10603_v37  ;;  %v1690_v21 = vld [vmem:[#allocation2 + $0x1d0] sm:$0xff] }
 0x470   :  { %v10742_v24 = vand.u32 4294901760, %v1018_v38  ;;  %12049 = vst [vmem:[#allocation59_spill] sm:$0xff] %v10845_v46  ;;  %v12050_v16 = vand.u32 4294901760, %v10626_v0  ;;  %v12051_v37 = vand.u32 4294901760, %v10628_v28  ;;  %v12056_v0 = vand.u32 4294901760, %v10657_v1  ;;  %v1683_v1 = vld [vmem:[#allocation2 + $0x198] sm:$0xff] }
 0x471   :  { %12039 = vst [vmem:[#allocation55_spill] sm:$0xff] %v10772_v48  ;;  %v10837_v49 = vpack.c.bf16 %v12045_v61, %v12044_v29  ;;  %v12057_v28 = vand.u32 4294901760, %v10659_v53  ;;  %v9053_v53 = vpack.c.bf16 %v1683_v1, %v1682_v44  ;;  %v1688_v29 = vld [vmem:[#allocation2 + $0x1c0] sm:$0xff]  ;;  %v1689_v61 = vld [vmem:[#allocation2 + $0x1c8] sm:$0xff] }
 0x472   :  { %v10745_v59 = vsub.f32 %v1018_v38, %v10742_v24  ;;  %v1681_v38 = vld [vmem:[#allocation2 + $0x188] sm:$0xff]  ;;  %v9062_v18 = vpack.c.bf16 %v1689_v61, %v1688_v29  ;;  %v1766_v61 = vld [vmem:[#allocation2 + $0x200] sm:$0xff] }
 0x473   :  { %v9050_v45 = vpack.c.bf16 %v1681_v38, %v1680_v47  ;;  %12046 = vst [vmem:[#allocation58_spill] sm:$0xff] %v10837_v49  ;;  %v10877_v47 = vpack.c.bf16 %v12060_v63, %v12059_v11  ;;  %v1695_v11 = vld [vmem:[#allocation2 + $0x1f8] sm:$0xff] }
 0x474   :  { %v1102_v31 = vand.u32 4294901760, %v10745_v59 }
 0x475   :  { %9051 = vmatpush3.bf16.msra.mxu0 %v9050_v45  ;;  %12061 = vst [vmem:[#allocation63_spill] sm:$0xff] %v10877_v47  ;;  %v1686_v45 = vld [vmem:[#allocation2 + $0x1b0] sm:$0xff] }
 0x476   :  { %v1103_v20 = vsub.f32 %v10745_v59, %v1102_v31  ;;  %9052 = vmatprep.subr.bf16.mxu0 %v12038_v57 }
 0x478   :  { %v1104_v56 = vand.u32 4294901760, %v1103_v20  ;;  %v10827_v20 = vpack.c.bf16 %v12042_v50, %v12041_v13  ;;  %v1687_v13 = vld [vmem:[#allocation2 + $0x1b8] sm:$0xff] }
 0x479   :  { %9054 = vmatpush3.bf16.msra.mxu0 %v9053_v53  ;;  %v9059_v50 = vpack.c.bf16 %v1687_v13, %v1686_v45 }
 0x47a   :  { %7147 = vmatmul.mubr.f32.vlgmr.msra.gmra.mrb[2].mxu1 %v1104_v56  ;;  %12043 = vst [vmem:[#allocation57_spill] sm:$0xff] %v10827_v20  ;;  %v10869_v56 = vpack.c.bf16 %v12057_v28, %v12056_v0  ;;  %9055 = vmatprep.subr.bf16.mxu0 %v12038_v57  ;;  %v1694_v28 = vld [vmem:[#allocation2 + $0x1f0] sm:$0xff] }
 0x47b   :  { %8931 = vmatpush3.bf16.msra.mxu1 %v10751_v60  ;;  %7181 = vmatprep.mubr.msk.f32.mxu1 %vm10107_vm0, %v12037_v6  ;;  %v9071_v63 = vpack.c.bf16 %v1695_v11, %v1694_v28  ;;  %v1771_v11 = vld [vmem:[#allocation2 + $0x228] sm:$0xff] }
 0x47c   :  { %8932 = vmatprep.subr.bf16.mxu1 %v12038_v57  ;;  %12058 = vst [vmem:[#allocation62_spill] sm:$0xff] %v10869_v56 }
 0x47f   :  { %8934 = vmatpush3.bf16.msra.mxu1 %v10607_v8 }
 0x480   :  { %8935 = vmatprep.subr.bf16.mxu1 %v12038_v57 }
 0x483   :  { %8937 = vmatpush3.bf16.msra.mxu1 %v10621_v4 }
 0x484   :  { %8938 = vmatprep.subr.bf16.mxu1 %v12038_v57 }
 0x487   :  { %8940 = vmatpush3.bf16.msra.mxu1 %v10645_v3 }
 0x488   :  { %8941 = vmatprep.subr.bf16.mxu1 %v12038_v57 }
 0x48b   :  { %8943 = vmatpush3.bf16.msra.mxu1 %v10649_v35 }
 0x48c   :  { %8944 = vmatprep.subr.bf16.mxu1 %v12038_v57 }
 0x48f   :  { %8946 = vmatpush3.bf16.msra.mxu1 %v10663_v10 }
 0x490   :  { %8947 = vmatprep.subr.bf16.mxu1 %v12038_v57 }
 0x493   :  { %8949 = vmatpush3.bf16.msra.mxu1 %v10684_v51 }
 0x494   :  { %8950 = vmatprep.subr.bf16.mxu1 %v12038_v57 }
 0x497   :  { %8952 = vmatpush3.bf16.msra.mxu1 %v10686_v54 }
 0x498   :  { %8953 = vmatprep.subr.bf16.mxu1 %v12038_v57 }
 0x49a   :  { %7182 = vmatmul.mubr.f32.vlgmr.msra.gmra.mrb[2].mxu1 %v10742_v24 }
 0x49b   :  { %8955 = vmatpush3.bf16.msra.mxu1 %v10772_v48  ;;  %7216 = vmatprep.mubr.msk.f32.mxu1 %vm10107_vm0, %v12037_v6 }
 0x49c   :  { %8956 = vmatprep.subr.bf16.mxu1 %v12038_v57 }
 0x49f   :  { %8958 = vmatpush3.bf16.msra.mxu1 %v10690_v41 }
 0x4a0   :  { %8959 = vmatprep.subr.bf16.mxu1 %v12038_v57 }
 0x4a3   :  { %8961 = vmatpush3.bf16.msra.mxu1 %v10694_v14 }
 0x4a4   :  { %8962 = vmatprep.subr.bf16.mxu1 %v12038_v57 }
 0x4a7   :  { %8964 = vmatpush3.bf16.msra.mxu1 %v10698_v36 }
 0x4a8   :  { %8965 = vmatprep.subr.bf16.mxu1 %v12038_v57 }
 0x4ab   :  { %8967 = vmatpush3.bf16.msra.mxu1 %v10702_v43 }
 0x4ac   :  { %8968 = vmatprep.subr.bf16.mxu1 %v12038_v57 }
 0x4af   :  { %8970 = vmatpush3.bf16.msra.mxu1 %v10706_v15 }
 0x4b0   :  { %8971 = vmatprep.subr.bf16.mxu1 %v12038_v57 }
 0x4b3   :  { %8973 = vmatpush3.bf16.msra.mxu1 %v10710_v34 }
 0x4b4   :  { %8974 = vmatprep.subr.bf16.mxu1 %v12038_v57 }
 0x4b7   :  { %8976 = vmatpush3.bf16.msra.mxu1 %v10714_v5 }
 0x4b8   :  { %8977 = vmatprep.subr.bf16.mxu1 %v12038_v57 }
 0x4ba   :  { %7217 = vmatmul.mubr.f32.vlgmr.msra.gmra.mrb[2].mxu1 %v10745_v59  ;;  %v10853_v59 = vpack.c.bf16 %v12051_v37, %v12050_v16  ;;  %v1691_v16 = vld [vmem:[#allocation2 + $0x1d8] sm:$0xff] }
 0x4bb   :  { %8979 = vmatpush3.bf16.msra.mxu1 %v10552_v55  ;;  %7251 = vmatprep.mubr.msk.f32.mxu1 %vm10107_vm0, %v12037_v6  ;;  %v9065_v37 = vpack.c.bf16 %v1691_v16, %v1690_v21 }
 0x4bc   :  { %8980 = vmatprep.subr.bf16.mxu1 %v12038_v57  ;;  %12052 = vst [vmem:[#allocation60_spill] sm:$0xff] %v10853_v59 }
 0x4bf   :  { %8982 = vmatpush3.bf16.msra.mxu1 %v10558_v30 }
 0x4c0   :  { %8983 = vmatprep.subr.bf16.mxu1 %v12038_v57 }
 0x4c3   :  { %8985 = vmatpush3.bf16.msra.mxu1 %v10562_v40 }
 0x4c4   :  { %8986 = vmatprep.subr.bf16.mxu1 %v12038_v57 }
 0x4c7   :  { %8988 = vmatpush3.bf16.msra.mxu1 %v10566_v62 }
 0x4c8   :  { %8989 = vmatprep.subr.bf16.mxu1 %v12038_v57 }
 0x4cb   :  { %8991 = vmatpush3.bf16.msra.mxu1 %v10570_v52 }
 0x4cc   :  { %8992 = vmatprep.subr.bf16.mxu1 %v12038_v57 }
 0x4cf   :  { %8994 = vmatpush3.bf16.msra.mxu1 %v10574_v27 }
 0x4d0   :  { %8995 = vmatprep.subr.bf16.mxu1 %v12038_v57 }
 0x4d3   :  { %8997 = vmatpush3.bf16.msra.mxu1 %v10581_v26 }
 0x4d4   :  { %8998 = vmatprep.subr.bf16.mxu1 %v12038_v57 }
 0x4d7   :  { %9000 = vmatpush3.bf16.msra.mxu1 %v10584_v42 }
 0x4d8   :  { %9001 = vmatprep.subr.bf16.mxu1 %v12038_v57 }
 0x4da   :  { %7252 = vmatmul.mubr.f32.vlgmr.msra.gmra.mrb[2].mxu1 %v1102_v31  ;;  %v10861_v31 = vpack.c.bf16 %v12054_v25, %v12053_v23  ;;  %v1692_v23 = vld [vmem:[#allocation2 + $0x1e0] sm:$0xff]  ;;  %v1693_v25 = vld [vmem:[#allocation2 + $0x1e8] sm:$0xff] }
 0x4db   :  { %9003 = vmatpush3.bf16.msra.mxu1 %v10817_v32  ;;  %7286 = vmatprep.mubr.msk.f32.mxu1 %vm10107_vm0, %v12037_v6  ;;  %v9068_v0 = vpack.c.bf16 %v1693_v25, %v1692_v23  ;;  %v1768_v23 = vld [vmem:[#allocation2 + $0x210] sm:$0xff]  ;;  %v1769_v25 = vld [vmem:[#allocation2 + $0x218] sm:$0xff] }
 0x4dc   :  { %9004 = vmatprep.subr.bf16.mxu1 %v12038_v57  ;;  %12055 = vst [vmem:[#allocation61_spill] sm:$0xff] %v10861_v31  ;;  %v9077_v28 = vpack.c.bf16 %v1769_v25, %v1768_v23 }
 0x4df   :  { %9006 = vmatpush3.bf16.msra.mxu1 %v10827_v20 }
 0x4e0   :  { %9007 = vmatprep.subr.bf16.mxu1 %v12038_v57 }
 0x4e3   :  { %9009 = vmatpush3.bf16.msra.mxu1 %v10837_v49 }
 0x4e4   :  { %9010 = vmatprep.subr.bf16.mxu1 %v12038_v57 }
 0x4e7   :  { %9012 = vmatpush3.bf16.msra.mxu1 %v10845_v46 }
 0x4e8   :  { %9013 = vmatprep.subr.bf16.mxu1 %v12038_v57 }
 0x4eb   :  { %9015 = vmatpush3.bf16.msra.mxu1 %v10853_v59 }
 0x4ec   :  { %9016 = vmatprep.subr.bf16.mxu1 %v12038_v57 }
 0x4ef   :  { %9018 = vmatpush3.bf16.msra.mxu1 %v10861_v31 }
 0x4f0   :  { %9019 = vmatprep.subr.bf16.mxu1 %v12038_v57 }
 0x4f3   :  { %9021 = vmatpush3.bf16.msra.mxu1 %v10869_v56 }
 0x4f4   :  { %9022 = vmatprep.subr.bf16.mxu1 %v12038_v57 }
 0x4f7   :  { %9024 = vmatpush3.bf16.msra.mxu1 %v10877_v47 }
 0x4f8   :  { %9025 = vmatprep.subr.bf16.mxu1 %v12038_v57 }
 0x4fa   :  { %7287 = vmatmul.mubr.f32.vlgmr.msra.gmra.mrb[2].mxu1 %v10742_v24 }
 0x4fb   :  { %9027 = vmatpush3.bf16.msra.mxu1 %v10552_v55  ;;  %7321 = vmatprep.mubr.msk.f32.mxu1 %vm10107_vm0, %v12037_v6 }
 0x4fc   :  { %9028 = vmatprep.subr.bf16.mxu1 %v12038_v57 }
 0x4ff   :  { %9030 = vmatpush3.bf16.msra.mxu1 %v10558_v30 }
 0x500   :  { %9031 = vmatprep.subr.bf16.mxu1 %v12038_v57 }
 0x503   :  { %9033 = vmatpush3.bf16.msra.mxu1 %v10562_v40 }
 0x504   :  { %9034 = vmatprep.subr.bf16.mxu1 %v12038_v57 }
 0x507   :  { %9036 = vmatpush3.bf16.msra.mxu1 %v10566_v62 }
 0x508   :  { %9037 = vmatprep.subr.bf16.mxu1 %v12038_v57 }
 0x50b   :  { %9039 = vmatpush3.bf16.msra.mxu1 %v10570_v52 }
 0x50c   :  { %9040 = vmatprep.subr.bf16.mxu1 %v12038_v57 }
 0x50f   :  { %9042 = vmatpush3.bf16.msra.mxu1 %v10574_v27 }
 0x510   :  { %9043 = vmatprep.subr.bf16.mxu1 %v12038_v57 }
 0x513   :  { %9045 = vmatpush3.bf16.msra.mxu1 %v10581_v26 }
 0x514   :  { %9046 = vmatprep.subr.bf16.mxu1 %v12038_v57 }
 0x517   :  { %9048 = vmatpush3.bf16.msra.mxu1 %v10584_v42 }
 0x518   :  { %9097 = vmatprep.subr.bf16.mxu1 %v12038_v57 }
 0x51a   :  { %7322 = vmatmul.mubr.f32.vlgmr.msra.gmra.mrb[2].mxu1 %v10742_v24  ;;  %v1685_v24 = vld [vmem:[#allocation2 + $0x1a8] sm:$0xff] }
 0x51b   :  { %9099 = vmatpush3.bf16.msra.mxu1 %v10552_v55  ;;  %7426 = vmatprep.mubr.msk.f32.mxu1 %vm10107_vm0, %v12037_v6  ;;  %v9056_v38 = vpack.c.bf16 %v1685_v24, %v1684_v9 }
 0x51c   :  { %9100 = vmatprep.subr.bf16.mxu1 %v12038_v57 }
 0x51d   :  { %9057 = vmatpush3.bf16.msra.mxu0 %v9056_v38 }
 0x51e   :  { %9058 = vmatprep.subr.bf16.mxu0 %v12038_v57 }
 0x51f   :  { %9102 = vmatpush3.bf16.msra.mxu1 %v10558_v30 }
 0x520   :  { %9103 = vmatprep.subr.bf16.mxu1 %v12038_v57 }
 0x521   :  { %9060 = vmatpush3.bf16.msra.mxu0 %v9059_v50 }
 0x522   :  { %9061 = vmatprep.subr.bf16.mxu0 %v12038_v57 }
 0x523   :  { %9105 = vmatpush3.bf16.msra.mxu1 %v10562_v40 }
 0x524   :  { %9106 = vmatprep.subr.bf16.mxu1 %v12038_v57 }
 0x525   :  { %9063 = vmatpush3.bf16.msra.mxu0 %v9062_v18  ;;  %v1767_v18 = vld [vmem:[#allocation2 + $0x208] sm:$0xff] }
 0x526   :  { %9064 = vmatprep.subr.bf16.mxu0 %v12038_v57 }
 0x527   :  { %9108 = vmatpush3.bf16.msra.mxu1 %v10566_v62 }
 0x528   :  { %9109 = vmatprep.subr.bf16.mxu1 %v12038_v57 }
 0x529   :  { %9066 = vmatpush3.bf16.msra.mxu0 %v9065_v37  ;;  %v9074_v37 = vpack.c.bf16 %v1767_v18, %v1766_v61  ;;  %v1779_v61 = vld [vmem:[#allocation2 + $0x268] sm:$0xff] }
 0x52a   :  { %9067 = vmatprep.subr.bf16.mxu0 %v12038_v57 }
 0x52b   :  { %9111 = vmatpush3.bf16.msra.mxu1 %v10570_v52 }
 0x52c   :  { %9112 = vmatprep.subr.bf16.mxu1 %v12038_v57 }
 0x52d   :  { %9069 = vmatpush3.bf16.msra.mxu0 %v9068_v0 }
 0x52e   :  { %9070 = vmatprep.subr.bf16.mxu0 %v12038_v57 }
 0x52f   :  { %9114 = vmatpush3.bf16.msra.mxu1 %v10574_v27 }
 0x530   :  { %9115 = vmatprep.subr.bf16.mxu1 %v12038_v57 }
 0x531   :  { %9072 = vmatpush3.bf16.msra.mxu0 %v9071_v63 }
 0x532   :  { %9073 = vmatprep.subr.bf16.mxu0 %v12038_v57 }
 0x533   :  { %9117 = vmatpush3.bf16.msra.mxu1 %v10581_v26 }
 0x534   :  { %9118 = vmatprep.subr.bf16.mxu1 %v12038_v57 }
 0x537   :  { %9120 = vmatpush3.bf16.msra.mxu1 %v10584_v42 }
 0x538   :  { %9121 = vmatprep.subr.bf16.mxu1 %v12038_v57 }
 0x5ed   :  { %v1656_v44 = vpop.f32.mrb[2].mxu1 }
 0x5ee   :  { %v1660_v1 = vmul.f32 %v1656_v44, %v1656_v44  ;;  %v1668_v53 = vrot.slane %v1656_v44, %v10535_v39  ;;  %v7323_v9 = vpop.f32.mrb[3].mxu1 }
 0x5ef   :  { %v1774_v9 = vld [vmem:[#allocation2 + $0x240] sm:$0xff] }
 0x5f0   :  { %v1662_v24 = vrot.slane %v1660_v1, 7  ;;  %v1669_v38 = vsub.f32 %v10716_v33, %v1668_v53  ;;  %v1770_v33 = vld [vmem:[#allocation2 + $0x220] sm:$0xff]  ;;  %v1773_v1 = vld [vmem:[#allocation2 + $0x238] sm:$0xff] }
 0x5f1   :  { %v9080_v63 = vpack.c.bf16 %v1771_v11, %v1770_v33 }
 0x5f2   :  { %v1664_v45 = vsub.f32 %v1656_v44, %v1662_v24  ;;  %v1772_v44 = vld [vmem:[#allocation2 + $0x230] sm:$0xff]  ;;  %v1775_v24 = vld [vmem:[#allocation2 + $0x248] sm:$0xff] }
 0x5f3   :  { %v9083_v53 = vpack.c.bf16 %v1773_v1, %v1772_v44 }
 0x5f4   :  { %v1670_v13 = vadd.f32 1e-05, %v1664_v45  ;;  %v1776_v45 = vld [vmem:[#allocation2 + $0x250] sm:$0xff] }
 0x5f6   :  { %10065 = vrsqrt.f32 %v1670_v13  ;;  %v1777_v13 = vld [vmem:[#allocation2 + $0x258] sm:$0xff] }
 0x600   :  { %v10066_v50 = vpop.eup %10065 }
 0x601   :  { %v1675_v29 = vrot.slane %v10066_v50, %v10539_v19  ;;  %v9089_v50 = vpack.c.bf16 %v1777_v13, %v1776_v45 }
 0x603   :  { %v1676_v21 = vmul.f32 %v1675_v29, %v1669_v38  ;;  %v9086_v38 = vpack.c.bf16 %v1775_v24, %v1774_v9  ;;  %v1778_v29 = vld [vmem:[#allocation2 + $0x260] sm:$0xff] }
 0x604   :  { %v9092_v18 = vpack.c.bf16 %v1779_v61, %v1778_v29 }
 0x605   :  { %vm1677_vm5 = vcmp.gt.f32.partialorder %v1676_v21, 0.0  ;;  %v1678_v16 = vmul.f32 0.2, %v1676_v21 }
 0x607   :  { %v1679_v0 = vsel %vm1677_vm5, %v1676_v21, %v1678_v16  ;;  %v1780_v21 = vld [vmem:[#allocation2 + $0x270] sm:$0xff]  ;;  %v1781_v16 = vld [vmem:[#allocation2 + $0x278] sm:$0xff] }
 0x608   :  { %7357 = vmatmul.mubr.f32.vlgmr.msra.gmra.mrb[6].mxu0 %v1679_v0 }
 0x609   :  { %9075 = vmatpush3.bf16.msra.mxu0 %v9074_v37  ;;  %7391 = vmatprep.mubr.msk.f32.mxu0 %vm10107_vm0, %v12037_v6  ;;  %v9095_v37 = vpack.c.bf16 %v1781_v16, %v1780_v21 }
 0x60a   :  { %9076 = vmatprep.subr.bf16.mxu0 %v12038_v57 }
 0x60d   :  { %9078 = vmatpush3.bf16.msra.mxu0 %v9077_v28 }
 0x60e   :  { %9079 = vmatprep.subr.bf16.mxu0 %v12038_v57 }
 0x611   :  { %9081 = vmatpush3.bf16.msra.mxu0 %v9080_v63 }
 0x612   :  { %9082 = vmatprep.subr.bf16.mxu0 %v12038_v57 }
 0x615   :  { %9084 = vmatpush3.bf16.msra.mxu0 %v9083_v53 }
 0x616   :  { %9085 = vmatprep.subr.bf16.mxu0 %v12038_v57 }
 0x619   :  { %9087 = vmatpush3.bf16.msra.mxu0 %v9086_v38 }
 0x61a   :  { %9088 = vmatprep.subr.bf16.mxu0 %v12038_v57 }
 0x61d   :  { %9090 = vmatpush3.bf16.msra.mxu0 %v9089_v50 }
 0x61e   :  { %9091 = vmatprep.subr.bf16.mxu0 %v12038_v57 }
 0x621   :  { %9093 = vmatpush3.bf16.msra.mxu0 %v9092_v18 }
 0x622   :  { %9094 = vmatprep.subr.bf16.mxu0 %v12038_v57 }
 0x625   :  { %9096 = vmatpush3.bf16.msra.mxu0 %v9095_v37 }
 0x626   :  { %9241 = vmatprep.subr.bf16.mxu0 %v12038_v57 }
 0x6db   :  { %v1762_v23 = vpop.f32.mrb[6].mxu0 }
 0x6dc   :  { %5869 = vrot.lane.b32.xlu0 %v1762_v23, %s10109_s0  ;;  %v7358_v25 = vpop.f32.mrb[7].mxu0  ;;  %7392 = vmatmul.mubr.f32.vlgmr.msra.gmra.mrb[8].mxu0 %v1762_v23 }
 0x6dd   :  { %7636 = vmatprep.mubr.msk.f32.mxu0 %vm10107_vm0, %v12037_v6 }
 0x7af   :  { %v10942_v0 = vpop.f32.mrb[8].mxu0 }
 0x7b0   :  { %v1852_v28 = vsel %vm217_vm2, %v10942_v0, 0.0  ;;  %v1860_v33 = vmul.f32 %v10942_v0, %v10942_v0  ;;  %v7393_v11 = vpop.f32.mrb[9].mxu0 }
 0x7b1   :  { %v1853_v63 = vrot.slane %v1852_v28, 4 }
 0x7b2   :  { %v1861_v44 = vsel %vm217_vm2, %v1860_v33, 0.0 }
 0x7b3   :  { %v1854_v1 = vadd.f32 %v1853_v63, %v1852_v28  ;;  %v1862_v53 = vrot.slane %v1861_v44, 4  ;;  %v2529_v63 = vld [vmem:[#allocation2 + $0x280] sm:$0xff] }
 0x7b5   :  { %v1855_v9 = vrot.slane %v1854_v1, 2  ;;  %v1863_v24 = vadd.f32 %v1862_v53, %v1861_v44  ;;  %v2530_v44 = vld [vmem:[#allocation2 + $0x288] sm:$0xff] }
 0x7b6   :  { %v9242_v53 = vpack.c.bf16 %v2530_v44, %v2529_v63  ;;  %v2543_v63 = vld [vmem:[#allocation2 + $0x2f0] sm:$0xff]  ;;  %v2544_v44 = vld [vmem:[#allocation2 + $0x2f8] sm:$0xff] }
 0x7b7   :  { %v1856_v38 = vadd.f32 %v1855_v9, %v1854_v1  ;;  %v1864_v45 = vrot.slane %v1863_v24, 2  ;;  %v2531_v1 = vld [vmem:[#allocation2 + $0x290] sm:$0xff]  ;;  %v2532_v9 = vld [vmem:[#allocation2 + $0x298] sm:$0xff] }
 0x7b8   :  { %9243 = vmatpush3.bf16.msra.mxu0 %v9242_v53 }
 0x7b9   :  { %v1857_v13 = vrot.slane %v1856_v38, 1  ;;  %v1865_v50 = vadd.f32 %v1864_v45, %v1863_v24  ;;  %v9245_v24 = vpack.c.bf16 %v2532_v9, %v2531_v1  ;;  %9244 = vmatprep.subr.bf16.mxu0 %v12038_v57  ;;  %v2534_v45 = vld [vmem:[#allocation2 + $0x2a8] sm:$0xff]  ;;  %v9263_v1 = vpack.c.bf16 %v2544_v44, %v2543_v63 }
 0x7bb   :  { %v1858_v29 = vadd.f32 %v1857_v13, %v1856_v38  ;;  %v1866_v61 = vrot.slane %v1865_v50, 1  ;;  %v2533_v38 = vld [vmem:[#allocation2 + $0x2a0] sm:$0xff] }
 0x7bc   :  { %9246 = vmatpush3.bf16.msra.mxu0 %v9245_v24  ;;  %v9248_v13 = vpack.c.bf16 %v2534_v45, %v2533_v38 }
 0x7bd   :  { %v1867_v18 = vadd.f32 %v1866_v61, %v1865_v50  ;;  %v1859_v21 = vmul.f32 0.25, %v1858_v29  ;;  %9247 = vmatprep.subr.bf16.mxu0 %v12038_v57  ;;  %v2535_v50 = vld [vmem:[#allocation2 + $0x2b0] sm:$0xff]  ;;  %v2536_v29 = vld [vmem:[#allocation2 + $0x2b8] sm:$0xff] }
 0x7be   :  { %v9251_v61 = vpack.c.bf16 %v2536_v29, %v2535_v50 }
 0x7bf   :  { %v1868_v16 = vmul.f32 0.25, %v1867_v18  ;;  %v2537_v18 = vld [vmem:[#allocation2 + $0x2c0] sm:$0xff] }
 0x7c0   :  { %9249 = vmatpush3.bf16.msra.mxu0 %v9248_v13 }
 0x7c1   :  { %v1869_v37 = vsel %vm236_vm3, %v1859_v21, %v1868_v16  ;;  %9250 = vmatprep.subr.bf16.mxu0 %v12038_v57  ;;  %v2538_v21 = vld [vmem:[#allocation2 + $0x2c8] sm:$0xff] }
 0x7c2   :  { %v10950_v23 = vand.u32 4294901760, %v1869_v37  ;;  %v9254_v16 = vpack.c.bf16 %v2538_v21, %v2537_v18 }
 0x7c4   :  { %v10953_v25 = vsub.f32 %v1869_v37, %v10950_v23  ;;  %9252 = vmatpush3.bf16.msra.mxu0 %v9251_v61  ;;  %v2539_v37 = vld [vmem:[#allocation2 + $0x2d0] sm:$0xff] }
 0x7c5   :  { %9253 = vmatprep.subr.bf16.mxu0 %v12038_v57 }
 0x7c6   :  { %v1953_v28 = vand.u32 4294901760, %v10953_v25 }
 0x7c8   :  { %v1954_v33 = vsub.f32 %v10953_v25, %v1953_v28  ;;  %9255 = vmatpush3.bf16.msra.mxu0 %v9254_v16 }
 0x7c9   :  { %9256 = vmatprep.subr.bf16.mxu0 %v12038_v57 }
 0x7ca   :  { %v1955_v11 = vand.u32 4294901760, %v1954_v33  ;;  %v2542_v33 = vld [vmem:[#allocation2 + $0x2e8] sm:$0xff] }
 0x7cc   :  { %7427 = vmatmul.mubr.f32.vlgmr.msra.gmra.mrb[4].mxu1 %v1955_v11 }
 0x7cd   :  { %9123 = vmatpush3.bf16.msra.mxu1 %v10751_v60  ;;  %7461 = vmatprep.mubr.msk.f32.mxu1 %vm10107_vm0, %v12037_v6  ;;  %v3387_v60 = vld [vmem:[#allocation2 + $0x748] sm:$0xff] }
 0x7ce   :  { %9124 = vmatprep.subr.bf16.mxu1 %v12038_v57 }
 0x7d1   :  { %9126 = vmatpush3.bf16.msra.mxu1 %v10607_v8 }
 0x7d2   :  { %9127 = vmatprep.subr.bf16.mxu1 %v12038_v57 }
 0x7d5   :  { %9129 = vmatpush3.bf16.msra.mxu1 %v10621_v4 }
 0x7d6   :  { %9130 = vmatprep.subr.bf16.mxu1 %v12038_v57 }
 0x7d9   :  { %9132 = vmatpush3.bf16.msra.mxu1 %v10645_v3 }
 0x7da   :  { %9133 = vmatprep.subr.bf16.mxu1 %v12038_v57 }
 0x7dd   :  { %9135 = vmatpush3.bf16.msra.mxu1 %v10649_v35 }
 0x7de   :  { %9136 = vmatprep.subr.bf16.mxu1 %v12038_v57 }
 0x7e1   :  { %9138 = vmatpush3.bf16.msra.mxu1 %v10663_v10 }
 0x7e2   :  { %9139 = vmatprep.subr.bf16.mxu1 %v12038_v57 }
 0x7e5   :  { %9141 = vmatpush3.bf16.msra.mxu1 %v10684_v51 }
 0x7e6   :  { %9142 = vmatprep.subr.bf16.mxu1 %v12038_v57 }
 0x7e9   :  { %9144 = vmatpush3.bf16.msra.mxu1 %v10686_v54 }
 0x7ea   :  { %9145 = vmatprep.subr.bf16.mxu1 %v12038_v57 }
 0x7ec   :  { %7462 = vmatmul.mubr.f32.vlgmr.msra.gmra.mrb[4].mxu1 %v10950_v23 }
 0x7ed   :  { %9147 = vmatpush3.bf16.msra.mxu1 %v10772_v48  ;;  %7496 = vmatprep.mubr.msk.f32.mxu1 %vm10107_vm0, %v12037_v6  ;;  %v3303_v48 = vld [vmem:[#allocation2 + $0x358] sm:$0xff] }
 0x7ee   :  { %9148 = vmatprep.subr.bf16.mxu1 %v12038_v57 }
 0x7f1   :  { %9150 = vmatpush3.bf16.msra.mxu1 %v10690_v41 }
 0x7f2   :  { %9151 = vmatprep.subr.bf16.mxu1 %v12038_v57 }
 0x7f5   :  { %9153 = vmatpush3.bf16.msra.mxu1 %v10694_v14  ;;  %v3301_v14 = vld [vmem:[#allocation2 + $0x348] sm:$0xff] }
 0x7f6   :  { %9154 = vmatprep.subr.bf16.mxu1 %v12038_v57 }
 0x7f9   :  { %9156 = vmatpush3.bf16.msra.mxu1 %v10698_v36  ;;  %v3300_v36 = vld [vmem:[#allocation2 + $0x340] sm:$0xff] }
 0x7fa   :  { %9157 = vmatprep.subr.bf16.mxu1 %v12038_v57  ;;  %v9422_v41 = vpack.c.bf16 %v3301_v14, %v3300_v36  ;;  %v3379_v14 = vld [vmem:[#allocation2 + $0x708] sm:$0xff] }
 0x7fb   :  { %v3416_v51 = vand.u32 4294901760, %v3379_v14 }
 0x7fd   :  { %9159 = vmatpush3.bf16.msra.mxu1 %v10702_v43 }
 0x7fe   :  { %9160 = vmatprep.subr.bf16.mxu1 %v12038_v57 }
 0x801   :  { %9162 = vmatpush3.bf16.msra.mxu1 %v10706_v15  ;;  %v3299_v15 = vld [vmem:[#allocation2 + $0x338] sm:$0xff] }
 0x802   :  { %9163 = vmatprep.subr.bf16.mxu1 %v12038_v57 }
 0x805   :  { %9165 = vmatpush3.bf16.msra.mxu1 %v10710_v34  ;;  %v3298_v34 = vld [vmem:[#allocation2 + $0x330] sm:$0xff] }
 0x806   :  { %9166 = vmatprep.subr.bf16.mxu1 %v12038_v57  ;;  %v9419_v43 = vpack.c.bf16 %v3299_v15, %v3298_v34  ;;  %v3307_v15 = vld [vmem:[#allocation2 + $0x378] sm:$0xff] }
 0x809   :  { %9168 = vmatpush3.bf16.msra.mxu1 %v10714_v5 }
 0x80a   :  { %9169 = vmatprep.subr.bf16.mxu1 %v12038_v57 }
 0x80c   :  { %7497 = vmatmul.mubr.f32.vlgmr.msra.gmra.mrb[4].mxu1 %v10953_v25 }
 0x80d   :  { %9171 = vmatpush3.bf16.msra.mxu1 %v10552_v55  ;;  %7531 = vmatprep.mubr.msk.f32.mxu1 %vm10107_vm0, %v12037_v6 }
 0x80e   :  { %9172 = vmatprep.subr.bf16.mxu1 %v12038_v57 }
 0x811   :  { %9174 = vmatpush3.bf16.msra.mxu1 %v10558_v30 }
 0x812   :  { %9175 = vmatprep.subr.bf16.mxu1 %v12038_v57 }
 0x815   :  { %9177 = vmatpush3.bf16.msra.mxu1 %v10562_v40 }
 0x816   :  { %9178 = vmatprep.subr.bf16.mxu1 %v12038_v57 }
 0x819   :  { %9180 = vmatpush3.bf16.msra.mxu1 %v10566_v62 }
 0x81a   :  { %9181 = vmatprep.subr.bf16.mxu1 %v12038_v57 }
 0x81d   :  { %9183 = vmatpush3.bf16.msra.mxu1 %v10570_v52 }
 0x81e   :  { %9184 = vmatprep.subr.bf16.mxu1 %v12038_v57 }
 0x821   :  { %9186 = vmatpush3.bf16.msra.mxu1 %v10574_v27 }
 0x822   :  { %9187 = vmatprep.subr.bf16.mxu1 %v12038_v57 }
 0x825   :  { %9189 = vmatpush3.bf16.msra.mxu1 %v10581_v26 }
 0x826   :  { %9190 = vmatprep.subr.bf16.mxu1 %v12038_v57 }
 0x829   :  { %9192 = vmatpush3.bf16.msra.mxu1 %v10584_v42 }
 0x82a   :  { %9193 = vmatprep.subr.bf16.mxu1 %v12038_v57 }
 0x82c   :  { %7532 = vmatmul.mubr.f32.vlgmr.msra.gmra.mrb[4].mxu1 %v1953_v28  ;;  %v2541_v28 = vld [vmem:[#allocation2 + $0x2e0] sm:$0xff] }
 0x82d   :  { %9195 = vmatpush3.bf16.msra.mxu1 %v10817_v32  ;;  %7566 = vmatprep.mubr.msk.f32.mxu1 %vm10107_vm0, %v12037_v6  ;;  %v9260_v11 = vpack.c.bf16 %v2542_v33, %v2541_v28  ;;  %v3297_v32 = vld [vmem:[#allocation2 + $0x328] sm:$0xff] }
 0x82e   :  { %9196 = vmatprep.subr.bf16.mxu1 %v12038_v57 }
 0x831   :  { %9198 = vmatpush3.bf16.msra.mxu1 %v10827_v20  ;;  %v3296_v20 = vld [vmem:[#allocation2 + $0x320] sm:$0xff] }
 0x832   :  { %9199 = vmatprep.subr.bf16.mxu1 %v12038_v57  ;;  %v9416_v5 = vpack.c.bf16 %v3297_v32, %v3296_v20  ;;  %v3305_v32 = vld [vmem:[#allocation2 + $0x368] sm:$0xff] }
 0x835   :  { %9201 = vmatpush3.bf16.msra.mxu1 %v10837_v49  ;;  %v12088_v49 = vld [vmem:[#allocation31_spill] sm:$0xff] }
 0x836   :  { %9202 = vmatprep.subr.bf16.mxu1 %v12038_v57 }
 0x839   :  { %9204 = vmatpush3.bf16.msra.mxu1 %v10845_v46  ;;  %v12087_v46 = vld [vmem:[#allocation30_spill] sm:$0xff] }
 0x83a   :  { %9205 = vmatprep.subr.bf16.mxu1 %v12038_v57 }
 0x83d   :  { %9207 = vmatpush3.bf16.msra.mxu1 %v10853_v59  ;;  %v12084_v59 = vld [vmem:[#allocation27_spill] sm:$0xff] }
 0x83e   :  { %9208 = vmatprep.subr.bf16.mxu1 %v12038_v57 }
 0x841   :  { %9210 = vmatpush3.bf16.msra.mxu1 %v10861_v31  ;;  %v12083_v31 = vld [vmem:[#allocation26_spill] sm:$0xff] }
 0x842   :  { %9211 = vmatprep.subr.bf16.mxu1 %v12038_v57 }
 0x845   :  { %9213 = vmatpush3.bf16.msra.mxu1 %v10869_v56  ;;  %v12082_v56 = vld [vmem:[#allocation25_spill] sm:$0xff] }
 0x846   :  { %9214 = vmatprep.subr.bf16.mxu1 %v12038_v57 }
 0x849   :  { %9216 = vmatpush3.bf16.msra.mxu1 %v10877_v47 }
 0x84a   :  { %9217 = vmatprep.subr.bf16.mxu1 %v12038_v57 }
 0x84c   :  { %7567 = vmatmul.mubr.f32.vlgmr.msra.gmra.mrb[4].mxu1 %v10950_v23 }
 0x84d   :  { %9219 = vmatpush3.bf16.msra.mxu1 %v10552_v55  ;;  %7601 = vmatprep.mubr.msk.f32.mxu1 %vm10107_vm0, %v12037_v6 }
 0x84e   :  { %9220 = vmatprep.subr.bf16.mxu1 %v12038_v57 }
 0x851   :  { %9222 = vmatpush3.bf16.msra.mxu1 %v10558_v30 }
 0x852   :  { %9223 = vmatprep.subr.bf16.mxu1 %v12038_v57 }
 0x855   :  { %9225 = vmatpush3.bf16.msra.mxu1 %v10562_v40 }
 0x856   :  { %9226 = vmatprep.subr.bf16.mxu1 %v12038_v57 }
 0x859   :  { %9228 = vmatpush3.bf16.msra.mxu1 %v10566_v62  ;;  %v3389_v62 = vld [vmem:[#allocation2 + $0x758] sm:$0xff] }
 0x85a   :  { %9229 = vmatprep.subr.bf16.mxu1 %v12038_v57  ;;  %v3446_v30 = vand.u32 4294901760, %v3389_v62 }
 0x85d   :  { %9231 = vmatpush3.bf16.msra.mxu1 %v10570_v52  ;;  %v3388_v52 = vld [vmem:[#allocation2 + $0x750] sm:$0xff] }
 0x85e   :  { %9232 = vmatprep.subr.bf16.mxu1 %v12038_v57  ;;  %v3443_v40 = vand.u32 4294901760, %v3388_v52 }
 0x860   :  { %v11238_v55 = vpack.c.bf16 %v3446_v30, %v3443_v40 }
 0x861   :  { %9234 = vmatpush3.bf16.msra.mxu1 %v10574_v27 }
 0x862   :  { %9235 = vmatprep.subr.bf16.mxu1 %v12038_v57 }
 0x865   :  { %9237 = vmatpush3.bf16.msra.mxu1 %v10581_v26  ;;  %v3440_v26 = vand.u32 4294901760, %v3387_v60 }
 0x866   :  { %9238 = vmatprep.subr.bf16.mxu1 %v12038_v57 }
 0x869   :  { %9240 = vmatpush3.bf16.msra.mxu1 %v10584_v42 }
 0x86a   :  { %9409 = vmatprep.subr.bf16.mxu1 %v12038_v57 }
 0x86c   :  { %7602 = vmatmul.mubr.f32.vlgmr.msra.gmra.mrb[4].mxu1 %v10950_v23  ;;  %v2540_v23 = vld [vmem:[#allocation2 + $0x2d8] sm:$0xff] }
 0x86d   :  { %7881 = vmatprep.mubr.msk.f32.mxu1 %vm10107_vm0, %v12037_v6  ;;  %v9257_v25 = vpack.c.bf16 %v2540_v23, %v2539_v37  ;;  %v12063_v37 = vld [vmem:[#allocation7_spill] sm:$0xff] }
 0x86f   :  { %9258 = vmatpush3.bf16.msra.mxu0 %v9257_v25 }
 0x870   :  { %9259 = vmatprep.subr.bf16.mxu0 %v12038_v57 }
 0x873   :  { %9261 = vmatpush3.bf16.msra.mxu0 %v9260_v11 }
 0x874   :  { %9262 = vmatprep.subr.bf16.mxu0 %v12038_v57 }
 0x877   :  { %9264 = vmatpush3.bf16.msra.mxu0 %v9263_v1 }
 0x878   :  { %9265 = vmatprep.subr.bf16.mxu0 %v12038_v57 }
 0x93f   :  { %v2507_v53 = vpop.f32.mrb[4].mxu1 }
 0x940   :  { %v2511_v9 = vmul.f32 %v2507_v53, %v2507_v53  ;;  %v2519_v24 = vrot.slane %v2507_v53, %v10535_v39  ;;  %v7603_v38 = vpop.f32.mrb[5].mxu1 }
 0x942   :  { %v2513_v45 = vrot.slane %v2511_v9, 7  ;;  %v2520_v13 = vsub.f32 %v10942_v0, %v2519_v24  ;;  %v12062_v0 = vld [vmem:[#allocation6_spill] sm:$0xff] }
 0x944   :  { %v2515_v50 = vsub.f32 %v2507_v53, %v2513_v45 }
 0x946   :  { %v2521_v29 = vadd.f32 1e-05, %v2515_v50 }
 0x948   :  { %10067 = vrsqrt.f32 %v2521_v29 }
 0x952   :  { %v10068_v61 = vpop.eup %10067 }
 0x953   :  { %v2526_v18 = vrot.slane %v10068_v61, %v10539_v19 }
 0x955   :  { %v2527_v21 = vmul.f32 %v2526_v18, %v2520_v13 }
 0x957   :  { %v2528_v16 = vmax.f32 %v2527_v21, 0.0 }
 0x959   :  { %7637 = vmatmul.mubr.f32.vlgmr.msra.gmra.mrb[10].mxu0 %v2528_v16 }
 0x95a   :  { %9267 = vmatpush3.bf16.msra.mxu0 %v10175_v58  ;;  %7671 = vmatprep.mubr.msk.f32.mxu0 %vm10107_vm0, %v12037_v6 }
 0x95b   :  { %9268 = vmatprep.subr.bf16.mxu0 %v12038_v57 }
 0x95e   :  { %9270 = vmatpush3.bf16.msra.mxu0 %v10181_v2 }
 0x95f   :  { %9271 = vmatprep.subr.bf16.mxu0 %v12038_v57 }
 0x962   :  { %9273 = vmatpush3.bf16.msra.mxu0 %v10185_v7 }
 0x963   :  { %9274 = vmatprep.subr.bf16.mxu0 %v12038_v57 }
 0x966   :  { %9276 = vmatpush3.bf16.msra.mxu0 %v10189_v12 }
 0x967   :  { %9277 = vmatprep.subr.bf16.mxu0 %v12038_v57 }
 0x96a   :  { %9279 = vmatpush3.bf16.msra.mxu0 %v10193_v17 }
 0x96b   :  { %9280 = vmatprep.subr.bf16.mxu0 %v12038_v57 }
 0x96e   :  { %9282 = vmatpush3.bf16.msra.mxu0 %v10197_v22 }
 0x96f   :  { %9283 = vmatprep.subr.bf16.mxu0 %v12038_v57 }
 0x972   :  { %9285 = vmatpush3.bf16.msra.mxu0 %v12062_v0 }
 0x973   :  { %9286 = vmatprep.subr.bf16.mxu0 %v12038_v57 }
 0x976   :  { %9288 = vmatpush3.bf16.msra.mxu0 %v12063_v37 }
 0x977   :  { %9289 = vmatprep.subr.bf16.mxu0 %v12038_v57 }
 0xa2c   :  { %v11086_v23 = vpop.f32.mrb[10].mxu0 }
 0xa2d   :  { %v2615_v25 = vsel %vm217_vm2, %v11086_v23, 0.0  ;;  %v2623_v28 = vmul.f32 %v11086_v23, %v11086_v23  ;;  %v7638_v33 = vpop.f32.mrb[11].mxu0 }
 0xa2e   :  { %v2616_v11 = vrot.slane %v2615_v25, 4 }
 0xa2f   :  { %v2624_v63 = vsel %vm217_vm2, %v2623_v28, 0.0 }
 0xa30   :  { %v2617_v44 = vadd.f32 %v2616_v11, %v2615_v25  ;;  %v2625_v1 = vrot.slane %v2624_v63, 4 }
 0xa32   :  { %v2618_v53 = vrot.slane %v2617_v44, 2  ;;  %v2626_v9 = vadd.f32 %v2625_v1, %v2624_v63  ;;  %v12064_v63 = vld [vmem:[#allocation22_spill] sm:$0xff]  ;;  %v12066_v1 = vld [vmem:[#allocation9_spill] sm:$0xff] }
 0xa34   :  { %v2619_v24 = vadd.f32 %v2618_v53, %v2617_v44  ;;  %v2627_v38 = vrot.slane %v2626_v9, 2  ;;  %v12065_v44 = vld [vmem:[#allocation8_spill] sm:$0xff]  ;;  %v12067_v53 = vld [vmem:[#allocation10_spill] sm:$0xff] }
 0xa36   :  { %v2620_v45 = vrot.slane %v2619_v24, 1  ;;  %v2628_v13 = vadd.f32 %v2627_v38, %v2626_v9  ;;  %v12068_v9 = vld [vmem:[#allocation11_spill] sm:$0xff]  ;;  %v12070_v38 = vld [vmem:[#allocation13_spill] sm:$0xff] }
 0xa38   :  { %v2621_v50 = vadd.f32 %v2620_v45, %v2619_v24  ;;  %v2629_v29 = vrot.slane %v2628_v13, 1  ;;  %v12069_v24 = vld [vmem:[#allocation12_spill] sm:$0xff]  ;;  %v12071_v45 = vld [vmem:[#allocation14_spill] sm:$0xff] }
 0xa3a   :  { %v2630_v61 = vadd.f32 %v2629_v29, %v2628_v13  ;;  %v2622_v18 = vmul.f32 0.25, %v2621_v50  ;;  %v3292_v13 = vld [vmem:[#allocation2 + $0x300] sm:$0xff]  ;;  %v3293_v50 = vld [vmem:[#allocation2 + $0x308] sm:$0xff]  ;;  %v3294_v29 = vld [vmem:[#allocation2 + $0x310] sm:$0xff] }
 0xa3c   :  { %v2631_v21 = vmul.f32 0.25, %v2630_v61  ;;  %v12072_v61 = vld [vmem:[#allocation23_spill] sm:$0xff] }
 0xa3e   :  { %v2632_v16 = vsel %vm236_vm3, %v2622_v18, %v2631_v21  ;;  %v9410_v18 = vpack.c.bf16 %v3293_v50, %v3292_v13  ;;  %v3295_v21 = vld [vmem:[#allocation2 + $0x318] sm:$0xff]  ;;  %v12076_v13 = vld [vmem:[#allocation18_spill] sm:$0xff]  ;;  %v12077_v50 = vld [vmem:[#allocation19_spill] sm:$0xff] }
 0xa3f   :  { %v11094_v47 = vand.u32 4294901760, %v2632_v16 }
 0xa40   :  { %9411 = vmatpush3.bf16.msra.mxu1 %v9410_v18  ;;  %v12079_v18 = vld [vmem:[#allocation21_spill] sm:$0xff] }
 0xa41   :  { %v11097_v33 = vsub.f32 %v2632_v16, %v11094_v47  ;;  %v9413_v16 = vpack.c.bf16 %v3295_v21, %v3294_v29  ;;  %9412 = vmatprep.subr.bf16.mxu1 %v12038_v57  ;;  %v12078_v29 = vld [vmem:[#allocation20_spill] sm:$0xff] }
 0xa43   :  { %v11917_v25 = vand.u32 4294901760, %v11097_v33  ;;  %v12080_v21 = vand.u32 4294901760, %v11097_v33 }
 0xa44   :  { %9414 = vmatpush3.bf16.msra.mxu1 %v9413_v16  ;;  %v12081_v16 = vld [vmem:[#allocation24_spill] sm:$0xff] }
 0xa45   :  { %v2717_v28 = vsub.f32 %v11097_v33, %v11917_v25  ;;  %9415 = vmatprep.subr.bf16.mxu1 %v12038_v57  ;;  %v12075_v25 = vld [vmem:[#allocation17_spill] sm:$0xff] }
 0xa47   :  { %v2718_v11 = vand.u32 4294901760, %v2717_v28  ;;  %v12073_v28 = vld [vmem:[#allocation15_spill] sm:$0xff] }
 0xa48   :  { %9417 = vmatpush3.bf16.msra.mxu1 %v9416_v5  ;;  %v3304_v5 = vld [vmem:[#allocation2 + $0x360] sm:$0xff] }
 0xa49   :  { %7672 = vmatmul.mubr.f32.vlgmr.msra.gmra.mrb[12].mxu0 %v2718_v11  ;;  %v12074_v11 = vld [vmem:[#allocation16_spill] sm:$0xff]  ;;  %9418 = vmatprep.subr.bf16.mxu1 %v12038_v57  ;;  %v9428_v20 = vpack.c.bf16 %v3305_v32, %v3304_v5 }
 0xa4a   :  { %9291 = vmatpush3.bf16.msra.mxu0 %v12064_v63  ;;  %7706 = vmatprep.mubr.msk.f32.mxu0 %vm10107_vm0, %v12037_v6 }
 0xa4b   :  { %9292 = vmatprep.subr.bf16.mxu0 %v12038_v57 }
 0xa4c   :  { %9420 = vmatpush3.bf16.msra.mxu1 %v9419_v43  ;;  %v3306_v43 = vld [vmem:[#allocation2 + $0x370] sm:$0xff] }
 0xa4d   :  { %9421 = vmatprep.subr.bf16.mxu1 %v12038_v57  ;;  %v9431_v34 = vpack.c.bf16 %v3307_v15, %v3306_v43 }
 0xa4e   :  { %9294 = vmatpush3.bf16.msra.mxu0 %v12065_v44 }
 0xa4f   :  { %9295 = vmatprep.subr.bf16.mxu0 %v12038_v57 }
 0xa50   :  { %9423 = vmatpush3.bf16.msra.mxu1 %v9422_v41  ;;  %v3378_v41 = vld [vmem:[#allocation2 + $0x700] sm:$0xff] }
 0xa51   :  { %9424 = vmatprep.subr.bf16.mxu1 %v12038_v57  ;;  %v3413_v36 = vand.u32 4294901760, %v3378_v41 }
 0xa52   :  { %9297 = vmatpush3.bf16.msra.mxu0 %v12066_v1 }
 0xa53   :  { %9298 = vmatprep.subr.bf16.mxu0 %v12038_v57  ;;  %v11216_v8 = vpack.c.bf16 %v3416_v51, %v3413_v36 }
 0xa56   :  { %9300 = vmatpush3.bf16.msra.mxu0 %v12067_v53 }
 0xa57   :  { %9301 = vmatprep.subr.bf16.mxu0 %v12038_v57 }
 0xa5a   :  { %9303 = vmatpush3.bf16.msra.mxu0 %v12068_v9 }
 0xa5b   :  { %9304 = vmatprep.subr.bf16.mxu0 %v12038_v57 }
 0xa5e   :  { %9306 = vmatpush3.bf16.msra.mxu0 %v12069_v24 }
 0xa5f   :  { %9307 = vmatprep.subr.bf16.mxu0 %v12038_v57 }
 0xa62   :  { %9309 = vmatpush3.bf16.msra.mxu0 %v12070_v38 }
 0xa63   :  { %9310 = vmatprep.subr.bf16.mxu0 %v12038_v57 }
 0xa66   :  { %9312 = vmatpush3.bf16.msra.mxu0 %v12071_v45 }
 0xa67   :  { %9313 = vmatprep.subr.bf16.mxu0 %v12038_v57 }
 0xa69   :  { %7707 = vmatmul.mubr.f32.vlgmr.msra.gmra.mrb[12].mxu0 %v11094_v47 }
 0xa6a   :  { %9315 = vmatpush3.bf16.msra.mxu0 %v12072_v61  ;;  %7741 = vmatprep.mubr.msk.f32.mxu0 %vm10107_vm0, %v12037_v6 }
 0xa6b   :  { %9316 = vmatprep.subr.bf16.mxu0 %v12038_v57 }
 0xa6e   :  { %9318 = vmatpush3.bf16.msra.mxu0 %v12073_v28 }
 0xa6f   :  { %9319 = vmatprep.subr.bf16.mxu0 %v12038_v57 }
 0xa72   :  { %9321 = vmatpush3.bf16.msra.mxu0 %v12074_v11 }
 0xa73   :  { %9322 = vmatprep.subr.bf16.mxu0 %v12038_v57 }
 0xa76   :  { %9324 = vmatpush3.bf16.msra.mxu0 %v12075_v25 }
 0xa77   :  { %9325 = vmatprep.subr.bf16.mxu0 %v12038_v57 }
 0xa7a   :  { %9327 = vmatpush3.bf16.msra.mxu0 %v12076_v13 }
 0xa7b   :  { %9328 = vmatprep.subr.bf16.mxu0 %v12038_v57 }
 0xa7e   :  { %9330 = vmatpush3.bf16.msra.mxu0 %v12077_v50  ;;  %v11254_v50 = vsub.f32 %v3387_v60, %v3440_v26 }
 0xa7f   :  { %9331 = vmatprep.subr.bf16.mxu0 %v12038_v57 }
 0xa82   :  { %9333 = vmatpush3.bf16.msra.mxu0 %v12078_v29 }
 0xa83   :  { %9334 = vmatprep.subr.bf16.mxu0 %v12038_v57 }
 0xa86   :  { %9336 = vmatpush3.bf16.msra.mxu0 %v12079_v18 }
 0xa87   :  { %9337 = vmatprep.subr.bf16.mxu0 %v12038_v57 }
 0xa89   :  { %7742 = vmatmul.mubr.f32.vlgmr.msra.gmra.mrb[12].mxu0 %v11097_v33  ;;  %v12085_v33 = vld [vmem:[#allocation28_spill] sm:$0xff] }
 0xa8a   :  { %9339 = vmatpush3.bf16.msra.mxu0 %v10175_v58  ;;  %7776 = vmatprep.mubr.msk.f32.mxu0 %vm10107_vm0, %v12037_v6 }
 0xa8b   :  { %9340 = vmatprep.subr.bf16.mxu0 %v12038_v57 }
 0xa8e   :  { %9342 = vmatpush3.bf16.msra.mxu0 %v10181_v2 }
 0xa8f   :  { %9343 = vmatprep.subr.bf16.mxu0 %v12038_v57 }
 0xa92   :  { %9345 = vmatpush3.bf16.msra.mxu0 %v10185_v7 }
 0xa93   :  { %9346 = vmatprep.subr.bf16.mxu0 %v12038_v57 }
 0xa96   :  { %9348 = vmatpush3.bf16.msra.mxu0 %v10189_v12 }
 0xa97   :  { %9349 = vmatprep.subr.bf16.mxu0 %v12038_v57 }
 0xa9a   :  { %9351 = vmatpush3.bf16.msra.mxu0 %v10193_v17 }
 0xa9b   :  { %9352 = vmatprep.subr.bf16.mxu0 %v12038_v57 }
 0xa9e   :  { %9354 = vmatpush3.bf16.msra.mxu0 %v10197_v22 }
 0xa9f   :  { %9355 = vmatprep.subr.bf16.mxu0 %v12038_v57 }
 0xaa2   :  { %9357 = vmatpush3.bf16.msra.mxu0 %v12062_v0 }
 0xaa3   :  { %9358 = vmatprep.subr.bf16.mxu0 %v12038_v57 }
 0xaa6   :  { %9360 = vmatpush3.bf16.msra.mxu0 %v12063_v37 }
 0xaa7   :  { %9361 = vmatprep.subr.bf16.mxu0 %v12038_v57 }
 0xaa9   :  { %7777 = vmatmul.mubr.f32.vlgmr.msra.gmra.mrb[12].mxu0 %v12080_v21  ;;  %v12086_v21 = vld [vmem:[#allocation29_spill] sm:$0xff] }
 0xaaa   :  { %9363 = vmatpush3.bf16.msra.mxu0 %v12081_v16  ;;  %7811 = vmatprep.mubr.msk.f32.mxu0 %vm10107_vm0, %v12037_v6 }
 0xaab   :  { %9364 = vmatprep.subr.bf16.mxu0 %v12038_v57 }
 0xaae   :  { %9366 = vmatpush3.bf16.msra.mxu0 %v12082_v56  ;;  %v3392_v56 = vld [vmem:[#allocation2 + $0x770] sm:$0xff] }
 0xaaf   :  { %9367 = vmatprep.subr.bf16.mxu0 %v12038_v57 }
 0xab2   :  { %9369 = vmatpush3.bf16.msra.mxu0 %v12083_v31  ;;  %v3391_v31 = vld [vmem:[#allocation2 + $0x768] sm:$0xff] }
 0xab3   :  { %9370 = vmatprep.subr.bf16.mxu0 %v12038_v57 }
 0xab6   :  { %9372 = vmatpush3.bf16.msra.mxu0 %v12084_v59  ;;  %v3390_v59 = vld [vmem:[#allocation2 + $0x760] sm:$0xff] }
 0xab7   :  { %9373 = vmatprep.subr.bf16.mxu0 %v12038_v57 }
 0xaba   :  { %9375 = vmatpush3.bf16.msra.mxu0 %v12085_v33 }
 0xabb   :  { %9376 = vmatprep.subr.bf16.mxu0 %v12038_v57 }
 0xabe   :  { %9378 = vmatpush3.bf16.msra.mxu0 %v12086_v21 }
 0xabf   :  { %9379 = vmatprep.subr.bf16.mxu0 %v12038_v57 }
 0xac2   :  { %9381 = vmatpush3.bf16.msra.mxu0 %v12087_v46 }
 0xac3   :  { %9382 = vmatprep.subr.bf16.mxu0 %v12038_v57 }
 0xac6   :  { %9384 = vmatpush3.bf16.msra.mxu0 %v12088_v49 }
 0xac7   :  { %9385 = vmatprep.subr.bf16.mxu0 %v12038_v57 }
 0xac9   :  { %7812 = vmatmul.mubr.f32.vlgmr.msra.gmra.mrb[12].mxu0 %v11094_v47 }
 0xaca   :  { %9387 = vmatpush3.bf16.msra.mxu0 %v10175_v58  ;;  %7846 = vmatprep.mubr.msk.f32.mxu0 %vm10107_vm0, %v12037_v6 }
 0xacb   :  { %9388 = vmatprep.subr.bf16.mxu0 %v12038_v57 }
 0xace   :  { %9390 = vmatpush3.bf16.msra.mxu0 %v10181_v2 }
 0xacf   :  { %9391 = vmatprep.subr.bf16.mxu0 %v12038_v57 }
 0xad2   :  { %9393 = vmatpush3.bf16.msra.mxu0 %v10185_v7 }
 0xad3   :  { %9394 = vmatprep.subr.bf16.mxu0 %v12038_v57 }
 0xad6   :  { %9396 = vmatpush3.bf16.msra.mxu0 %v10189_v12 }
 0xad7   :  { %9397 = vmatprep.subr.bf16.mxu0 %v12038_v57 }
 0xada   :  { %9399 = vmatpush3.bf16.msra.mxu0 %v10193_v17 }
 0xadb   :  { %9400 = vmatprep.subr.bf16.mxu0 %v12038_v57 }
 0xade   :  { %9402 = vmatpush3.bf16.msra.mxu0 %v10197_v22 }
 0xadf   :  { %9403 = vmatprep.subr.bf16.mxu0 %v12038_v57 }
 0xae2   :  { %9405 = vmatpush3.bf16.msra.mxu0 %v12062_v0 }
 0xae3   :  { %9406 = vmatprep.subr.bf16.mxu0 %v12038_v57 }
 0xae6   :  { %9408 = vmatpush3.bf16.msra.mxu0 %v12063_v37 }
 0xae7   :  { %9577 = vmatprep.subr.bf16.mxu0 %v12038_v57 }
 0xae9   :  { %7847 = vmatmul.mubr.f32.vlgmr.msra.gmra.mrb[12].mxu0 %v11094_v47  ;;  %v3302_v47 = vld [vmem:[#allocation2 + $0x350] sm:$0xff] }
 0xaea   :  { %8126 = vmatprep.mubr.msk.f32.mxu0 %vm10107_vm0, %v12037_v6  ;;  %v9425_v54 = vpack.c.bf16 %v3303_v48, %v3302_v47  ;;  %v11209_v48 = vsub.f32 %v3378_v41, %v3413_v36  ;;  %v3385_v36 = vld [vmem:[#allocation2 + $0x738] sm:$0xff] }
 0xaec   :  { %9426 = vmatpush3.bf16.msra.mxu1 %v9425_v54  ;;  %v11211_v54 = vsub.f32 %v3379_v14, %v3416_v51  ;;  %v3384_v51 = vld [vmem:[#allocation2 + $0x730] sm:$0xff] }
 0xaed   :  { %9427 = vmatprep.subr.bf16.mxu1 %v12038_v57 }
 0xaf0   :  { %9429 = vmatpush3.bf16.msra.mxu1 %v9428_v20 }
 0xaf1   :  { %9430 = vmatprep.subr.bf16.mxu1 %v12038_v57 }
 0xaf4   :  { %9432 = vmatpush3.bf16.msra.mxu1 %v9431_v34 }
 0xaf5   :  { %9433 = vmatprep.subr.bf16.mxu1 %v12038_v57 }
 0xbbc   :  { %v3270_v47 = vpop.f32.mrb[12].mxu0 }
 0xbbd   :  { %v3274_v10 = vmul.f32 %v3270_v47, %v3270_v47  ;;  %v3282_v5 = vrot.slane %v3270_v47, %v10535_v39  ;;  %v7848_v32 = vpop.f32.mrb[13].mxu0 }
 0xbbe   :  { %v3382_v32 = vld [vmem:[#allocation2 + $0x720] sm:$0xff] }
 0xbbf   :  { %v3276_v20 = vrot.slane %v3274_v10, 7  ;;  %v3283_v35 = vsub.f32 %v11086_v23, %v3282_v5  ;;  %v3380_v10 = vld [vmem:[#allocation2 + $0x710] sm:$0xff]  ;;  %v3381_v23 = vld [vmem:[#allocation2 + $0x718] sm:$0xff] }
 0xbc0   :  { %v3419_v14 = vand.u32 4294901760, %v3380_v10 }
 0xbc1   :  { %v3278_v43 = vsub.f32 %v3270_v47, %v3276_v20  ;;  %v3422_v47 = vand.u32 4294901760, %v3381_v23  ;;  %v3383_v20 = vld [vmem:[#allocation2 + $0x728] sm:$0xff] }
 0xbc2   :  { %v11240_v49 = vsub.f32 %v3380_v10, %v3419_v14  ;;  %v3393_v10 = vld [vmem:[#allocation2 + $0x778] sm:$0xff] }
 0xbc3   :  { %v3284_v15 = vadd.f32 1e-05, %v3278_v43  ;;  %v11222_v5 = vpack.c.bf16 %v3422_v47, %v3419_v14  ;;  %v3431_v43 = vand.u32 4294901760, %v3384_v51  ;;  %v11242_v46 = vsub.f32 %v3381_v23, %v3422_v47 }
 0xbc4   :  { %v11257_v23 = vsub.f32 %v3388_v52, %v3443_v40  ;;  %v11259_v14 = vsub.f32 %v3389_v62, %v3446_v30  ;;  %v3449_v47 = vand.u32 4294901760, %v3390_v59  ;;  %v11963_v40 = vand.u32 4294901760, %v11209_v48 }
 0xbc5   :  { %10069 = vrsqrt.f32 %v3284_v15  ;;  %v3434_v15 = vand.u32 4294901760, %v3385_v36  ;;  %v11248_v16 = vsub.f32 %v3384_v51, %v3431_v43  ;;  %v11960_v62 = vand.u32 4294901760, %v11211_v54 }
 0xbc6   :  { %v11264_v51 = vsub.f32 %v3390_v59, %v3449_v47  ;;  %v3507_v52 = vsub.f32 %v11209_v48, %v11963_v40 }
 0xbc7   :  { %v11250_v18 = vsub.f32 %v3385_v36, %v3434_v15  ;;  %v3514_v59 = vsub.f32 %v11211_v54, %v11960_v62  ;;  %v11957_v36 = vand.u32 4294901760, %v11240_v49 }
 0xbc8   :  { %v11969_v25 = vand.u32 4294901760, %v11264_v51 }
 0xbcf   :  { %v10070_v34 = vpop.eup %10069 }
 0xbd0   :  { %v3289_v3 = vrot.slane %v10070_v34, %v10539_v19  ;;  %v11230_v34 = vpack.c.bf16 %v3434_v15, %v3431_v43  ;;  %v11958_v43 = vand.u32 4294901760, %v11242_v46 }
 0xbd2   :  { %v3290_v4 = vmul.f32 %v3289_v3, %v3283_v35  ;;  %v3425_v35 = vand.u32 4294901760, %v3382_v32 }
 0xbd4   :  { %v3291_v41 = vmax.f32 %v3290_v4, 0.0  ;;  %v3428_v4 = vand.u32 4294901760, %v3383_v20  ;;  %v11244_v21 = vsub.f32 %v3382_v32, %v3425_v35  ;;  %v3452_v32 = vand.u32 4294901760, %v3391_v31 }
 0xbd6   :  { %7882 = vmatmul.mubr.f32.vlgmr.msra.gmra.mrb[6].mxu1 %v3291_v41  ;;  %v11226_v3 = vpack.c.bf16 %v3428_v4, %v3425_v35  ;;  %v3386_v41 = vld [vmem:[#allocation2 + $0x740] sm:$0xff]  ;;  %v11246_v33 = vsub.f32 %v3383_v20, %v3428_v4  ;;  %v3455_v20 = vand.u32 4294901760, %v3392_v56  ;;  %v3458_v35 = vand.u32 4294901760, %v3393_v10 }
 0xbd7   :  { %9435 = vmatpush3.bf16.msra.mxu1 %v11216_v8  ;;  %7916 = vmatprep.mubr.msk.f32.mxu1 %vm10107_vm0, %v12037_v6  ;;  %v3437_v42 = vand.u32 4294901760, %v3386_v41  ;;  %v11262_v4 = vpack.c.bf16 %v3452_v32, %v3449_v47 }
 0xbd8   :  { %9436 = vmatprep.subr.bf16.mxu1 %v12038_v57  ;;  %v11270_v60 = vsub.f32 %v3393_v10, %v3458_v35  ;;  %v11274_v30 = vpack.c.bf16 %v3458_v35, %v3455_v20  ;;  %v3528_v10 = vsub.f32 %v11242_v46, %v11958_v43  ;;  %v11961_v35 = vand.u32 4294901760, %v11246_v33 }
 0xbd9   :  { %v11234_v27 = vpack.c.bf16 %v3440_v26, %v3437_v42  ;;  %v11252_v29 = vsub.f32 %v3386_v41, %v3437_v42  ;;  %v11266_v42 = vsub.f32 %v3391_v31, %v3452_v32  ;;  %v11268_v26 = vsub.f32 %v3392_v56, %v3455_v20 }
 0xbda   :  { %v3508_v31 = vand.u32 4294901760, %v3507_v52  ;;  %v3515_v56 = vand.u32 4294901760, %v3514_v59  ;;  %v3521_v41 = vsub.f32 %v11240_v49, %v11957_v36  ;;  %v3529_v32 = vand.u32 4294901760, %v3528_v10 }
 0xbdb   :  { %9438 = vmatpush3.bf16.msra.mxu1 %v11222_v5  ;;  %v11959_v20 = vand.u32 4294901760, %v11244_v21  ;;  %v11962_v43 = vand.u32 4294901760, %v11248_v16  ;;  %v11970_v11 = vand.u32 4294901760, %v11268_v26 }
 0xbdc   :  { %9439 = vmatprep.subr.bf16.mxu1 %v12038_v57  ;;  %v11288_v15 = vpack.c.bf16 %v3515_v56, %v3508_v31  ;;  %v3522_v47 = vand.u32 4294901760, %v3521_v41  ;;  %v3542_v31 = vsub.f32 %v11246_v33, %v11961_v35  ;;  %v11964_v41 = vand.u32 4294901760, %v11250_v18 }
 0xbdd   :  { %v3535_v59 = vsub.f32 %v11244_v21, %v11959_v20  ;;  %v11965_v35 = vand.u32 4294901760, %v11252_v29 }
 0xbde   :  { %v11298_v52 = vpack.c.bf16 %v3529_v32, %v3522_v47  ;;  %v3543_v36 = vand.u32 4294901760, %v3542_v31  ;;  %v3549_v47 = vsub.f32 %v11248_v16, %v11962_v43  ;;  %v3556_v32 = vsub.f32 %v11250_v18, %v11964_v41 }
 0xbdf   :  { %9441 = vmatpush3.bf16.msra.mxu1 %v11226_v3  ;;  %v3536_v56 = vand.u32 4294901760, %v3535_v59  ;;  %v11966_v59 = vand.u32 4294901760, %v11254_v50  ;;  %v11967_v41 = vand.u32 4294901760, %v11257_v23 }
 0xbe0   :  { %9442 = vmatprep.subr.bf16.mxu1 %v12038_v57  ;;  %v3550_v20 = vand.u32 4294901760, %v3549_v47  ;;  %v3557_v62 = vand.u32 4294901760, %v3556_v32  ;;  %v11968_v47 = vand.u32 4294901760, %v11259_v14 }
 0xbe1   :  { %v11308_v10 = vpack.c.bf16 %v3543_v36, %v3536_v56  ;;  %v3563_v36 = vsub.f32 %v11252_v29, %v11965_v35  ;;  %v3570_v56 = vsub.f32 %v11254_v50, %v11966_v59  ;;  %v3591_v59 = vsub.f32 %v11264_v51, %v11969_v25 }
 0xbe2   :  { %v11318_v31 = vpack.c.bf16 %v3557_v62, %v3550_v20  ;;  %v3577_v62 = vsub.f32 %v11257_v23, %v11967_v41  ;;  %v3584_v20 = vsub.f32 %v11259_v14, %v11968_v47  ;;  %v3605_v47 = vsub.f32 %v11268_v26, %v11970_v11 }
 0xbe3   :  { %9444 = vmatpush3.bf16.msra.mxu1 %v11230_v34  ;;  %v3564_v43 = vand.u32 4294901760, %v3563_v36  ;;  %v3571_v40 = vand.u32 4294901760, %v3570_v56  ;;  %v11972_v36 = vand.u32 4294901760, %v11266_v42 }
 0xbe4   :  { %9445 = vmatprep.subr.bf16.mxu1 %v12038_v57  ;;  %v3578_v35 = vand.u32 4294901760, %v3577_v62  ;;  %v3585_v13 = vand.u32 4294901760, %v3584_v20  ;;  %v11971_v62 = vand.u32 4294901760, %v11270_v60 }
 0xbe5   :  { %v9470_v32 = vpack.c.bf16 %v3571_v40, %v3564_v43  ;;  %v3598_v40 = vsub.f32 %v11266_v42, %v11972_v36  ;;  %v3592_v43 = vand.u32 4294901760, %v3591_v59  ;;  %v9482_v59 = vpack.c.bf16 %v11211_v54, %v11209_v48 }
 0xbe6   :  { %v9473_v56 = vpack.c.bf16 %v3585_v13, %v3578_v35  ;;  %v3612_v13 = vsub.f32 %v11270_v60, %v11971_v62  ;;  %v3606_v35 = vand.u32 4294901760, %v3605_v47 }
 0xbe7   :  { %9447 = vmatpush3.bf16.msra.mxu1 %v11234_v27  ;;  %v3599_v41 = vand.u32 4294901760, %v3598_v40  ;;  %v9485_v40 = vpack.c.bf16 %v11242_v46, %v11240_v49 }
 0xbe8   :  { %9448 = vmatprep.subr.bf16.mxu1 %v12038_v57  ;;  %v3613_v25 = vand.u32 4294901760, %v3612_v13 }
 0xbe9   :  { %v9476_v20 = vpack.c.bf16 %v3599_v41, %v3592_v43 }
 0xbea   :  { %v9479_v28 = vpack.c.bf16 %v3613_v25, %v3606_v35 }
 0xbeb   :  { %9450 = vmatpush3.bf16.msra.mxu1 %v11238_v55 }
 0xbec   :  { %9451 = vmatprep.subr.bf16.mxu1 %v12038_v57 }
 0xbef   :  { %9453 = vmatpush3.bf16.msra.mxu1 %v11262_v4 }
 0xbf0   :  { %9454 = vmatprep.subr.bf16.mxu1 %v12038_v57 }
 0xbf3   :  { %9456 = vmatpush3.bf16.msra.mxu1 %v11274_v30 }
 0xbf4   :  { %9457 = vmatprep.subr.bf16.mxu1 %v12038_v57 }
 0xca9   :  { %v11366_v35 = vpop.f32.mrb[6].mxu1 }
 0xcaa   :  { %v3394_v62 = vsel %vm217_vm2, %v11366_v35, 0.0  ;;  %v3402_v36 = vmul.f32 %v11366_v35, %v11366_v35  ;;  %v7883_v43 = vpop.f32.mrb[7].mxu1 }
 0xcab   :  { %v3395_v41 = vrot.slane %v3394_v62, 4 }
 0xcac   :  { %v3403_v11 = vsel %vm217_vm2, %v3402_v36, 0.0 }
 0xcad   :  { %v3396_v61 = vadd.f32 %v3395_v41, %v3394_v62  ;;  %v3404_v47 = vrot.slane %v3403_v11, 4  ;;  %v12104_v41 = vand.u32 4294901760, %v11254_v50 }
 0xcaf   :  { %v3397_v45 = vrot.slane %v3396_v61, 2  ;;  %v3405_v38 = vadd.f32 %v3404_v47, %v3403_v11  ;;  %v12093_v11 = vpack.c.bf16 %v11266_v42, %v11264_v51 }
 0xcb1   :  { %v3398_v25 = vadd.f32 %v3397_v45, %v3396_v61  ;;  %v3406_v24 = vrot.slane %v3405_v38, 2 }
 0xcb3   :  { %v3399_v9 = vrot.slane %v3398_v25, 1  ;;  %v3407_v13 = vadd.f32 %v3406_v24, %v3405_v38  ;;  %v12090_v24 = vpack.c.bf16 %v11250_v18, %v11248_v16  ;;  %v12091_v38 = vpack.c.bf16 %v11254_v50, %v11252_v29 }
 0xcb4   :  { %v12109_v50 = vand.u32 4294901760, %v11268_v26 }
 0xcb5   :  { %v3400_v53 = vadd.f32 %v3399_v9, %v3398_v25  ;;  %v3408_v1 = vrot.slane %v3407_v13, 1  ;;  %v12089_v9 = vpack.c.bf16 %v11246_v33, %v11244_v21 }
 0xcb7   :  { %v3409_v44 = vadd.f32 %v3408_v1, %v3407_v13  ;;  %v3401_v63 = vmul.f32 0.25, %v3400_v53  ;;  %v4074_v1 = vld [vmem:[#allocation2 + $0x398] sm:$0xff] }
 0xcb9   :  { %v3410_v37 = vmul.f32 0.25, %v3409_v44 }
 0xcbb   :  { %v3411_v0 = vsel %vm236_vm3, %v3401_v63, %v3410_v37  ;;  %v4072_v37 = vld [vmem:[#allocation2 + $0x388] sm:$0xff]  ;;  %v4073_v63 = vld [vmem:[#allocation2 + $0x390] sm:$0xff] }
 0xcbc   :  { %v11374_v22 = vand.u32 4294901760, %v3411_v0  ;;  %v9581_v53 = vpack.c.bf16 %v4074_v1, %v4073_v63 }
 0xcbe   :  { %v11377_v43 = vsub.f32 %v3411_v0, %v11374_v22  ;;  %v4071_v0 = vld [vmem:[#allocation2 + $0x380] sm:$0xff] }
 0xcbf   :  { %v9578_v44 = vpack.c.bf16 %v4072_v37, %v4071_v0 }
 0xcc0   :  { %v3495_v36 = vand.u32 4294901760, %v11377_v43 }
 0xcc1   :  { %9579 = vmatpush3.bf16.msra.mxu0 %v9578_v44 }
 0xcc2   :  { %v3496_v45 = vsub.f32 %v11377_v43, %v3495_v36  ;;  %9580 = vmatprep.subr.bf16.mxu0 %v12038_v57 }
 0xcc4   :  { %v3497_v61 = vand.u32 4294901760, %v3496_v45  ;;  %v4086_v45 = vld [vmem:[#allocation2 + $0x3f8] sm:$0xff] }
 0xcc5   :  { %9582 = vmatpush3.bf16.msra.mxu0 %v9581_v53 }
 0xcc6   :  { %7917 = vmatmul.mubr.f32.vlgmr.msra.gmra.mrb[8].mxu1 %v3497_v61  ;;  %9583 = vmatprep.subr.bf16.mxu0 %v12038_v57 }
 0xcc7   :  { %9459 = vmatpush3.bf16.msra.mxu1 %v11288_v15  ;;  %7951 = vmatprep.mubr.msk.f32.mxu1 %vm10107_vm0, %v12037_v6  ;;  %v12094_v15 = vpack.c.bf16 %v11270_v60, %v11268_v26  ;;  %v4083_v26 = vld [vmem:[#allocation2 + $0x3e0] sm:$0xff] }
 0xcc8   :  { %9460 = vmatprep.subr.bf16.mxu1 %v12038_v57 }
 0xccb   :  { %9462 = vmatpush3.bf16.msra.mxu1 %v11298_v52  ;;  %v12095_v52 = vand.u32 4294901760, %v11209_v48  ;;  %v12099_v48 = vand.u32 4294901760, %v11244_v21  ;;  %v12106_v21 = vand.u32 4294901760, %v11259_v14 }
 0xccc   :  { %9463 = vmatprep.subr.bf16.mxu1 %v12038_v57 }
 0xccf   :  { %9465 = vmatpush3.bf16.msra.mxu1 %v11308_v10  ;;  %v12096_v10 = vand.u32 4294901760, %v11211_v54  ;;  %v12100_v54 = vand.u32 4294901760, %v11246_v33  ;;  %v12105_v33 = vand.u32 4294901760, %v11257_v23 }
 0xcd0   :  { %9466 = vmatprep.subr.bf16.mxu1 %v12038_v57 }
 0xcd1   :  { %v9545_v25 = vpack.c.bf16 %v12106_v21, %v12105_v33  ;;  %v4173_v33 = vld [vmem:[#allocation2 + $0x458] sm:$0xff] }
 0xcd3   :  { %9468 = vmatpush3.bf16.msra.mxu1 %v11318_v31  ;;  %v9530_v31 = vpack.c.bf16 %v12096_v10, %v12095_v52 }
 0xcd4   :  { %9469 = vmatprep.subr.bf16.mxu1 %v12038_v57 }
 0xcd7   :  { %9471 = vmatpush3.bf16.msra.mxu1 %v9470_v32  ;;  %v12097_v32 = vand.u32 4294901760, %v11240_v49  ;;  %v12102_v49 = vand.u32 4294901760, %v11250_v18  ;;  %v12107_v18 = vand.u32 4294901760, %v11264_v51  ;;  %v4082_v51 = vld [vmem:[#allocation2 + $0x3d8] sm:$0xff] }
 0xcd8   :  { %9472 = vmatprep.subr.bf16.mxu1 %v12038_v57 }
 0xcdb   :  { %9474 = vmatpush3.bf16.msra.mxu1 %v9473_v56  ;;  %v12098_v56 = vand.u32 4294901760, %v11242_v46 }
 0xcdc   :  { %9475 = vmatprep.subr.bf16.mxu1 %v12038_v57 }
 0xcdd   :  { %v9533_v62 = vpack.c.bf16 %v12098_v56, %v12097_v32  ;;  %v4164_v32 = vld [vmem:[#allocation2 + $0x410] sm:$0xff]  ;;  %v4165_v56 = vld [vmem:[#allocation2 + $0x418] sm:$0xff] }
 0xcdf   :  { %9477 = vmatpush3.bf16.msra.mxu1 %v9476_v20  ;;  %v9536_v20 = vpack.c.bf16 %v12100_v54, %v12099_v48  ;;  %v4167_v48 = vld [vmem:[#allocation2 + $0x428] sm:$0xff] }
 0xce0   :  { %9478 = vmatprep.subr.bf16.mxu1 %v12038_v57 }
 0xce3   :  { %9480 = vmatpush3.bf16.msra.mxu1 %v9479_v28  ;;  %v12092_v28 = vpack.c.bf16 %v11259_v14, %v11257_v23  ;;  %v4079_v23 = vld [vmem:[#allocation2 + $0x3c0] sm:$0xff]  ;;  %v4080_v14 = vld [vmem:[#allocation2 + $0x3c8] sm:$0xff] }
 0xce4   :  { %9481 = vmatprep.subr.bf16.mxu1 %v12038_v57 }
 0xce6   :  { %7952 = vmatmul.mubr.f32.vlgmr.msra.gmra.mrb[8].mxu1 %v11374_v22 }
 0xce7   :  { %9483 = vmatpush3.bf16.msra.mxu1 %v9482_v59  ;;  %7986 = vmatprep.mubr.msk.f32.mxu1 %vm10107_vm0, %v12037_v6  ;;  %v12101_v59 = vand.u32 4294901760, %v11248_v16  ;;  %v12108_v16 = vand.u32 4294901760, %v11266_v42 }
 0xce8   :  { %9484 = vmatprep.subr.bf16.mxu1 %v12038_v57 }
 0xce9   :  { %v9539_v46 = vpack.c.bf16 %v12102_v49, %v12101_v59  ;;  %v9548_v13 = vpack.c.bf16 %v12108_v16, %v12107_v18  ;;  %v4169_v59 = vld [vmem:[#allocation2 + $0x438] sm:$0xff]  ;;  %v4175_v18 = vld [vmem:[#allocation2 + $0x468] sm:$0xff] }
 0xceb   :  { %9486 = vmatpush3.bf16.msra.mxu1 %v9485_v40  ;;  %v12103_v40 = vand.u32 4294901760, %v11252_v29  ;;  %v12110_v29 = vand.u32 4294901760, %v11270_v60  ;;  %v4084_v60 = vld [vmem:[#allocation2 + $0x3e8] sm:$0xff] }
 0xcec   :  { %9487 = vmatprep.subr.bf16.mxu1 %v12038_v57 }
 0xced   :  { %v9542_v47 = vpack.c.bf16 %v12104_v41, %v12103_v40  ;;  %v4171_v40 = vld [vmem:[#allocation2 + $0x448] sm:$0xff] }
 0xcef   :  { %9489 = vmatpush3.bf16.msra.mxu1 %v12089_v9 }
 0xcf0   :  { %9490 = vmatprep.subr.bf16.mxu1 %v12038_v57 }
 0xcf3   :  { %9492 = vmatpush3.bf16.msra.mxu1 %v12090_v24 }
 0xcf4   :  { %9493 = vmatprep.subr.bf16.mxu1 %v12038_v57 }
 0xcf7   :  { %9495 = vmatpush3.bf16.msra.mxu1 %v12091_v38 }
 0xcf8   :  { %9496 = vmatprep.subr.bf16.mxu1 %v12038_v57 }
 0xcfb   :  { %9498 = vmatpush3.bf16.msra.mxu1 %v12092_v28 }
 0xcfc   :  { %9499 = vmatprep.subr.bf16.mxu1 %v12038_v57 }
 0xcff   :  { %9501 = vmatpush3.bf16.msra.mxu1 %v12093_v11  ;;  %v4162_v11 = vld [vmem:[#allocation2 + $0x400] sm:$0xff] }
 0xd00   :  { %9502 = vmatprep.subr.bf16.mxu1 %v12038_v57 }
 0xd03   :  { %9504 = vmatpush3.bf16.msra.mxu1 %v12094_v15  ;;  %v4163_v15 = vld [vmem:[#allocation2 + $0x408] sm:$0xff] }
 0xd04   :  { %9505 = vmatprep.subr.bf16.mxu1 %v12038_v57  ;;  %v9602_v10 = vpack.c.bf16 %v4163_v15, %v4162_v11 }
 0xd06   :  { %7987 = vmatmul.mubr.f32.vlgmr.msra.gmra.mrb[8].mxu1 %v11377_v43  ;;  %v9551_v43 = vpack.c.bf16 %v12110_v29, %v12109_v50  ;;  %v4177_v50 = vld [vmem:[#allocation2 + $0x478] sm:$0xff] }
 0xd07   :  { %9507 = vmatpush3.bf16.msra.mxu1 %v11216_v8  ;;  %8021 = vmatprep.mubr.msk.f32.mxu1 %vm10107_vm0, %v12037_v6 }
 0xd08   :  { %9508 = vmatprep.subr.bf16.mxu1 %v12038_v57 }
 0xd0b   :  { %9510 = vmatpush3.bf16.msra.mxu1 %v11222_v5 }
 0xd0c   :  { %9511 = vmatprep.subr.bf16.mxu1 %v12038_v57 }
 0xd0f   :  { %9513 = vmatpush3.bf16.msra.mxu1 %v11226_v3 }
 0xd10   :  { %9514 = vmatprep.subr.bf16.mxu1 %v12038_v57 }
 0xd13   :  { %9516 = vmatpush3.bf16.msra.mxu1 %v11230_v34 }
 0xd14   :  { %9517 = vmatprep.subr.bf16.mxu1 %v12038_v57 }
 0xd17   :  { %9519 = vmatpush3.bf16.msra.mxu1 %v11234_v27 }
 0xd18   :  { %9520 = vmatprep.subr.bf16.mxu1 %v12038_v57 }
 0xd1b   :  { %9522 = vmatpush3.bf16.msra.mxu1 %v11238_v55 }
 0xd1c   :  { %9523 = vmatprep.subr.bf16.mxu1 %v12038_v57 }
 0xd1f   :  { %9525 = vmatpush3.bf16.msra.mxu1 %v11262_v4 }
 0xd20   :  { %9526 = vmatprep.subr.bf16.mxu1 %v12038_v57 }
 0xd23   :  { %9528 = vmatpush3.bf16.msra.mxu1 %v11274_v30 }
 0xd24   :  { %9529 = vmatprep.subr.bf16.mxu1 %v12038_v57 }
 0xd26   :  { %8022 = vmatmul.mubr.f32.vlgmr.msra.gmra.mrb[8].mxu1 %v3495_v36  ;;  %v4085_v36 = vld [vmem:[#allocation2 + $0x3f0] sm:$0xff] }
 0xd27   :  { %9531 = vmatpush3.bf16.msra.mxu1 %v9530_v31  ;;  %8056 = vmatprep.mubr.msk.f32.mxu1 %vm10107_vm0, %v12037_v6  ;;  %v9599_v61 = vpack.c.bf16 %v4086_v45, %v4085_v36  ;;  %v4260_v36 = vld [vmem:[#allocation2 + $0x4b8] sm:$0xff] }
 0xd28   :  { %9532 = vmatprep.subr.bf16.mxu1 %v12038_v57 }
 0xd2b   :  { %9534 = vmatpush3.bf16.msra.mxu1 %v9533_v62  ;;  %v9605_v62 = vpack.c.bf16 %v4165_v56, %v4164_v32  ;;  %v12112_v32 = vld [vmem:[#allocation5_spill] sm:$0xff]  ;;  %v12113_v56 = vld [vmem:[#allocation6_spill] sm:$0xff] }
 0xd2c   :  { %9535 = vmatprep.subr.bf16.mxu1 %v12038_v57 }
 0xd2f   :  { %9537 = vmatpush3.bf16.msra.mxu1 %v9536_v20  ;;  %v4168_v20 = vld [vmem:[#allocation2 + $0x430] sm:$0xff] }
 0xd30   :  { %9538 = vmatprep.subr.bf16.mxu1 %v12038_v57  ;;  %v9611_v49 = vpack.c.bf16 %v4169_v59, %v4168_v20 }
 0xd33   :  { %9540 = vmatpush3.bf16.msra.mxu1 %v9539_v46  ;;  %v4170_v46 = vld [vmem:[#allocation2 + $0x440] sm:$0xff] }
 0xd34   :  { %9541 = vmatprep.subr.bf16.mxu1 %v12038_v57  ;;  %v9614_v41 = vpack.c.bf16 %v4171_v40, %v4170_v46 }
 0xd37   :  { %9543 = vmatpush3.bf16.msra.mxu1 %v9542_v47  ;;  %v4172_v47 = vld [vmem:[#allocation2 + $0x450] sm:$0xff] }
 0xd38   :  { %9544 = vmatprep.subr.bf16.mxu1 %v12038_v57  ;;  %v9617_v21 = vpack.c.bf16 %v4173_v33, %v4172_v47 }
 0xd3b   :  { %9546 = vmatpush3.bf16.msra.mxu1 %v9545_v25  ;;  %v4174_v25 = vld [vmem:[#allocation2 + $0x460] sm:$0xff] }
 0xd3c   :  { %9547 = vmatprep.subr.bf16.mxu1 %v12038_v57  ;;  %v9620_v16 = vpack.c.bf16 %v4175_v18, %v4174_v25 }
 0xd3f   :  { %9549 = vmatpush3.bf16.msra.mxu1 %v9548_v13  ;;  %v4176_v13 = vld [vmem:[#allocation2 + $0x470] sm:$0xff] }
 0xd40   :  { %9550 = vmatprep.subr.bf16.mxu1 %v12038_v57  ;;  %v9623_v29 = vpack.c.bf16 %v4177_v50, %v4176_v13 }
 0xd43   :  { %9552 = vmatpush3.bf16.msra.mxu1 %v9551_v43 }
 0xd44   :  { %9553 = vmatprep.subr.bf16.mxu1 %v12038_v57 }
 0xd46   :  { %8057 = vmatmul.mubr.f32.vlgmr.msra.gmra.mrb[8].mxu1 %v11374_v22 }
 0xd47   :  { %9555 = vmatpush3.bf16.msra.mxu1 %v11216_v8  ;;  %8091 = vmatprep.mubr.msk.f32.mxu1 %vm10107_vm0, %v12037_v6  ;;  %v4075_v8 = vld [vmem:[#allocation2 + $0x3a0] sm:$0xff] }
 0xd48   :  { %9556 = vmatprep.subr.bf16.mxu1 %v12038_v57 }
 0xd4b   :  { %9558 = vmatpush3.bf16.msra.mxu1 %v11222_v5 }
 0xd4c   :  { %9559 = vmatprep.subr.bf16.mxu1 %v12038_v57 }
 0xd4f   :  { %9561 = vmatpush3.bf16.msra.mxu1 %v11226_v3  ;;  %v4078_v3 = vld [vmem:[#allocation2 + $0x3b8] sm:$0xff] }
 0xd50   :  { %9562 = vmatprep.subr.bf16.mxu1 %v12038_v57 }
 0xd53   :  { %9564 = vmatpush3.bf16.msra.mxu1 %v11230_v34 }
 0xd54   :  { %9565 = vmatprep.subr.bf16.mxu1 %v12038_v57 }
 0xd57   :  { %9567 = vmatpush3.bf16.msra.mxu1 %v11234_v27  ;;  %v4076_v27 = vld [vmem:[#allocation2 + $0x3a8] sm:$0xff] }
 0xd58   :  { %9568 = vmatprep.subr.bf16.mxu1 %v12038_v57  ;;  %v9584_v5 = vpack.c.bf16 %v4076_v27, %v4075_v8  ;;  %v12111_v27 = vlaneseq }
 0xd5a   :  { %9585 = vmatpush3.bf16.msra.mxu0 %v9584_v5  ;;  %v11533_v5 = vand.u32 127, %v12111_v27 }
 0xd5b   :  { %9570 = vmatpush3.bf16.msra.mxu1 %v11238_v55  ;;  %9586 = vmatprep.subr.bf16.mxu0 %v12038_v57  ;;  %v4077_v55 = vld [vmem:[#allocation2 + $0x3b0] sm:$0xff] }
 0xd5c   :  { %9571 = vmatprep.subr.bf16.mxu1 %v12038_v57  ;;  %v9587_v34 = vpack.c.bf16 %v4078_v3, %v4077_v55  ;;  %v4253_v55 = vld [vmem:[#allocation2 + $0x480] sm:$0xff]  ;;  %v4254_v3 = vld [vmem:[#allocation2 + $0x488] sm:$0xff]  ;;  %vm4160_vm6 = vcmp.eq.s32.totalorder %v11533_v5, 32  ;;  %vm4248_vm10 = vcmp.lt.s32.totalorder %v11533_v5, 24 }
 0xd5e   :  { %9588 = vmatpush3.bf16.msra.mxu0 %v9587_v34  ;;  %v9626_v34 = vpack.c.bf16 %v4254_v3, %v4253_v55 }
 0xd5f   :  { %9573 = vmatpush3.bf16.msra.mxu1 %v11262_v4  ;;  %9589 = vmatprep.subr.bf16.mxu0 %v12038_v57  ;;  %v9590_v4 = vpack.c.bf16 %v4080_v14, %v4079_v23  ;;  %v4255_v14 = vld [vmem:[#allocation2 + $0x490] sm:$0xff] }
 0xd60   :  { %9574 = vmatprep.subr.bf16.mxu1 %v12038_v57 }
 0xd62   :  { %9591 = vmatpush3.bf16.msra.mxu0 %v9590_v4  ;;  %v4256_v4 = vld [vmem:[#allocation2 + $0x498] sm:$0xff] }
 0xd63   :  { %9576 = vmatpush3.bf16.msra.mxu1 %v11274_v30  ;;  %9592 = vmatprep.subr.bf16.mxu0 %v12038_v57  ;;  %v9596_v30 = vpack.c.bf16 %v4084_v60, %v4083_v26  ;;  %v4258_v26 = vld [vmem:[#allocation2 + $0x4a8] sm:$0xff] }
 0xd64   :  { %9793 = vmatprep.subr.bf16.mxu1 %v12038_v57 }
 0xd66   :  { %8092 = vmatmul.mubr.f32.vlgmr.msra.gmra.mrb[8].mxu1 %v11374_v22  ;;  %v4081_v22 = vld [vmem:[#allocation2 + $0x3d0] sm:$0xff] }
 0xd67   :  { %8441 = vmatprep.mubr.msk.f32.mxu1 %vm10107_vm0, %v12037_v6  ;;  %v9593_v42 = vpack.c.bf16 %v4082_v51, %v4081_v22  ;;  %v9629_v51 = vpack.c.bf16 %v4256_v4, %v4255_v14  ;;  %v12115_v14 = vld [vmem:[#allocation22_spill] sm:$0xff]  ;;  %v12116_v4 = vld [vmem:[#allocation8_spill] sm:$0xff] }
 0xd69   :  { %9594 = vmatpush3.bf16.msra.mxu0 %v9593_v42  ;;  %v4257_v42 = vld [vmem:[#allocation2 + $0x4a0] sm:$0xff] }
 0xd6a   :  { %9595 = vmatprep.subr.bf16.mxu0 %v12038_v57  ;;  %v9632_v60 = vpack.c.bf16 %v4258_v26, %v4257_v42  ;;  %v12119_v42 = vld [vmem:[#allocation11_spill] sm:$0xff]  ;;  %v12120_v26 = vld [vmem:[#allocation12_spill] sm:$0xff] }
 0xd6d   :  { %9597 = vmatpush3.bf16.msra.mxu0 %v9596_v30  ;;  %v4259_v30 = vld [vmem:[#allocation2 + $0x4b0] sm:$0xff] }
 0xd6e   :  { %9598 = vmatprep.subr.bf16.mxu0 %v12038_v57  ;;  %v9635_v45 = vpack.c.bf16 %v4260_v36, %v4259_v30  ;;  %v12122_v30 = vld [vmem:[#allocation14_spill] sm:$0xff]  ;;  %v5018_v36 = vld [vmem:[#allocation2 + $0x500] sm:$0xff] }
 0xd71   :  { %9600 = vmatpush3.bf16.msra.mxu0 %v9599_v61  ;;  %v4261_v61 = vld [vmem:[#allocation2 + $0x4c0] sm:$0xff] }
 0xd72   :  { %9601 = vmatprep.subr.bf16.mxu0 %v12038_v57 }
 0xe39   :  { %v4049_v0 = vpop.f32.mrb[8].mxu1 }
 0xe3a   :  { %v4053_v37 = vmul.f32 %v4049_v0, %v4049_v0  ;;  %v4061_v63 = vrot.slane %v4049_v0, %v10535_v39  ;;  %v8093_v44 = vpop.f32.mrb[9].mxu1 }
 0xe3b   :  { %v4264_v44 = vld [vmem:[#allocation2 + $0x4d8] sm:$0xff] }
 0xe3c   :  { %v4055_v1 = vrot.slane %v4053_v37, 7  ;;  %v4062_v53 = vsub.f32 %v11366_v35, %v4061_v63  ;;  %v4166_v35 = vld [vmem:[#allocation2 + $0x420] sm:$0xff]  ;;  %v4263_v63 = vld [vmem:[#allocation2 + $0x4d0] sm:$0xff] }
 0xe3d   :  { %v9608_v54 = vpack.c.bf16 %v4167_v48, %v4166_v35 }
 0xe3e   :  { %v4057_v9 = vsub.f32 %v4049_v0, %v4055_v1  ;;  %v4262_v0 = vld [vmem:[#allocation2 + $0x4c8] sm:$0xff]  ;;  %v9641_v1 = vpack.c.bf16 %v4264_v44, %v4263_v63  ;;  %v12125_v63 = vld [vmem:[#allocation16_spill] sm:$0xff]  ;;  %v12126_v44 = vld [vmem:[#allocation17_spill] sm:$0xff] }
 0xe3f   :  { %v9638_v37 = vpack.c.bf16 %v4262_v0, %v4261_v61  ;;  %v12123_v61 = vld [vmem:[#allocation23_spill] sm:$0xff] }
 0xe40   :  { %v4063_v24 = vadd.f32 1e-05, %v4057_v9  ;;  %v4266_v9 = vld [vmem:[#allocation2 + $0x4e8] sm:$0xff] }
 0xe42   :  { %10071 = vrsqrt.f32 %v4063_v24 }
 0xe4c   :  { %v10072_v38 = vpop.eup %10071 }
 0xe4d   :  { %v4068_v28 = vrot.slane %v10072_v38, %v10539_v19  ;;  %v4267_v38 = vld [vmem:[#allocation2 + $0x4f0] sm:$0xff] }
 0xe4f   :  { %v4069_v52 = vmul.f32 %v4068_v28, %v4062_v53  ;;  %v4265_v53 = vld [vmem:[#allocation2 + $0x4e0] sm:$0xff]  ;;  %v4268_v28 = vld [vmem:[#allocation2 + $0x4f8] sm:$0xff] }
 0xe50   :  { %v9644_v24 = vpack.c.bf16 %v4266_v9, %v4265_v53  ;;  %v9647_v11 = vpack.c.bf16 %v4268_v28, %v4267_v38  ;;  %v12128_v53 = vld [vmem:[#allocation19_spill] sm:$0xff]  ;;  %v12129_v9 = vld [vmem:[#allocation20_spill] sm:$0xff]  ;;  %v12132_v28 = vld [vmem:[#allocation25_spill] sm:$0xff] }
 0xe51   :  { %v4070_v31 = vmax.f32 %v4069_v52, 0.0  ;;  %v12131_v38 = vld [vmem:[#allocation24_spill] sm:$0xff] }
 0xe53   :  { %8127 = vmatmul.mubr.f32.vlgmr.msra.gmra.mrb[14].mxu0 %v4070_v31 }
 0xe54   :  { %9603 = vmatpush3.bf16.msra.mxu0 %v9602_v10  ;;  %8161 = vmatprep.mubr.msk.f32.mxu0 %vm10107_vm0, %v12037_v6 }
 0xe55   :  { %9604 = vmatprep.subr.bf16.mxu0 %v12038_v57 }
 0xe58   :  { %9606 = vmatpush3.bf16.msra.mxu0 %v9605_v62  ;;  %v12114_v62 = vld [vmem:[#allocation7_spill] sm:$0xff] }
 0xe59   :  { %9607 = vmatprep.subr.bf16.mxu0 %v12038_v57 }
 0xe5c   :  { %9609 = vmatpush3.bf16.msra.mxu0 %v9608_v54 }
 0xe5d   :  { %9610 = vmatprep.subr.bf16.mxu0 %v12038_v57 }
 0xe60   :  { %9612 = vmatpush3.bf16.msra.mxu0 %v9611_v49 }
 0xe61   :  { %9613 = vmatprep.subr.bf16.mxu0 %v12038_v57 }
 0xe64   :  { %9615 = vmatpush3.bf16.msra.mxu0 %v9614_v41 }
 0xe65   :  { %9616 = vmatprep.subr.bf16.mxu0 %v12038_v57 }
 0xe68   :  { %9618 = vmatpush3.bf16.msra.mxu0 %v9617_v21 }
 0xe69   :  { %9619 = vmatprep.subr.bf16.mxu0 %v12038_v57 }
 0xe6c   :  { %9621 = vmatpush3.bf16.msra.mxu0 %v9620_v16 }
 0xe6d   :  { %9622 = vmatprep.subr.bf16.mxu0 %v12038_v57 }
 0xe70   :  { %9624 = vmatpush3.bf16.msra.mxu0 %v9623_v29 }
 0xe71   :  { %9625 = vmatprep.subr.bf16.mxu0 %v12038_v57 }
 0xf26   :  { %v4153_v43 = vpop.f32.mrb[14].mxu0 }
 0xf27   :  { %10073 = vtanh.f32 %v4153_v43  ;;  %v8128_v8 = vpop.f32.mrb[15].mxu0 }
 0xf31   :  { %v10074_v23 = vpop.eup %10073 }
 0xf32   :  { %v4161_v22 = vsel %vm4160_vm6, 1.0, %v10074_v23 }
 0xf33   :  { %8162 = vmatmul.mubr.f32.vlgmr.msra.gmra.mrb[16].mxu0 %v4161_v22  ;;  %v12117_v22 = vld [vmem:[#allocation9_spill] sm:$0xff] }
 0xf34   :  { %9627 = vmatpush3.bf16.msra.mxu0 %v9626_v34  ;;  %8196 = vmatprep.mubr.msk.f32.mxu0 %vm10107_vm0, %v12037_v6 }
 0xf35   :  { %9628 = vmatprep.subr.bf16.mxu0 %v12038_v57 }
 0xf38   :  { %9630 = vmatpush3.bf16.msra.mxu0 %v9629_v51  ;;  %v12118_v51 = vld [vmem:[#allocation10_spill] sm:$0xff] }
 0xf39   :  { %9631 = vmatprep.subr.bf16.mxu0 %v12038_v57 }
 0xf3c   :  { %9633 = vmatpush3.bf16.msra.mxu0 %v9632_v60  ;;  %v12121_v60 = vld [vmem:[#allocation13_spill] sm:$0xff] }
 0xf3d   :  { %9634 = vmatprep.subr.bf16.mxu0 %v12038_v57 }
 0xf40   :  { %9636 = vmatpush3.bf16.msra.mxu0 %v9635_v45  ;;  %v5019_v45 = vld [vmem:[#allocation2 + $0x508] sm:$0xff] }
 0xf41   :  { %9637 = vmatprep.subr.bf16.mxu0 %v12038_v57  ;;  %v9794_v0 = vpack.c.bf16 %v5019_v45, %v5018_v36  ;;  %v12144_v36 = vld [vmem:[#allocation37_spill] sm:$0xff]  ;;  %v12145_v45 = vld [vmem:[#allocation38_spill] sm:$0xff] }
 0xf43   :  { %9795 = vmatpush3.bf16.msra.mxu1 %v9794_v0 }
 0xf44   :  { %9639 = vmatpush3.bf16.msra.mxu0 %v9638_v37  ;;  %9796 = vmatprep.subr.bf16.mxu1 %v12038_v57  ;;  %v12124_v37 = vld [vmem:[#allocation15_spill] sm:$0xff] }
 0xf45   :  { %9640 = vmatprep.subr.bf16.mxu0 %v12038_v57 }
 0xf48   :  { %9642 = vmatpush3.bf16.msra.mxu0 %v9641_v1  ;;  %v12127_v1 = vld [vmem:[#allocation18_spill] sm:$0xff] }
 0xf49   :  { %9643 = vmatprep.subr.bf16.mxu0 %v12038_v57 }
 0xf4c   :  { %9645 = vmatpush3.bf16.msra.mxu0 %v9644_v24  ;;  %v12130_v24 = vld [vmem:[#allocation21_spill] sm:$0xff] }
 0xf4d   :  { %9646 = vmatprep.subr.bf16.mxu0 %v12038_v57 }
 0xf50   :  { %9648 = vmatpush3.bf16.msra.mxu0 %v9647_v11  ;;  %v12133_v11 = vld [vmem:[#allocation26_spill] sm:$0xff] }
 0xf51   :  { %9649 = vmatprep.subr.bf16.mxu0 %v12038_v57 }
0x1006   :  { %v11546_v15 = vpop.f32.mrb[16].mxu0 }
0x1007   :  { %v4251_v52 = vmul.f32 0.2, %v11546_v15  ;;  %v8163_v10 = vpop.f32.mrb[17].mxu0  ;;  %vm4250_vm7 = vcmp.gt.f32.partialorder %v11546_v15, 0.0 }
0x1008   :  { %v12135_v10 = vld [vmem:[#allocation28_spill] sm:$0xff] }
0x1009   :  { %v4252_v31 = vsel %vm4250_vm7, %v11546_v15, %v4251_v52  ;;  %v12134_v52 = vld [vmem:[#allocation27_spill] sm:$0xff] }
0x100a   :  { %8197 = vmatmul.mubr.f32.vlgmr.msra.gmra.mrb[18].mxu0 %v4252_v31  ;;  %v12136_v31 = vld [vmem:[#allocation29_spill] sm:$0xff] }
0x100b   :  { %9651 = vmatpush3.bf16.msra.mxu0 %v10175_v58  ;;  %8231 = vmatprep.mubr.msk.f32.mxu0 %vm10107_vm0, %v12037_v6 }
0x100c   :  { %9652 = vmatprep.subr.bf16.mxu0 %v12038_v57 }
0x100f   :  { %9654 = vmatpush3.bf16.msra.mxu0 %v10181_v2 }
0x1010   :  { %9655 = vmatprep.subr.bf16.mxu0 %v12038_v57 }
0x1013   :  { %9657 = vmatpush3.bf16.msra.mxu0 %v10185_v7 }
0x1014   :  { %9658 = vmatprep.subr.bf16.mxu0 %v12038_v57 }
0x1017   :  { %9660 = vmatpush3.bf16.msra.mxu0 %v10189_v12 }
0x1018   :  { %9661 = vmatprep.subr.bf16.mxu0 %v12038_v57 }
0x101b   :  { %9663 = vmatpush3.bf16.msra.mxu0 %v10193_v17 }
0x101c   :  { %9664 = vmatprep.subr.bf16.mxu0 %v12038_v57 }
0x101f   :  { %9666 = vmatpush3.bf16.msra.mxu0 %v12112_v32 }
0x1020   :  { %9667 = vmatprep.subr.bf16.mxu0 %v12038_v57 }
0x1023   :  { %9669 = vmatpush3.bf16.msra.mxu0 %v12113_v56 }
0x1024   :  { %9670 = vmatprep.subr.bf16.mxu0 %v12038_v57 }
0x1027   :  { %9672 = vmatpush3.bf16.msra.mxu0 %v12114_v62 }
0x1028   :  { %9673 = vmatprep.subr.bf16.mxu0 %v12038_v57 }
0x10dd   :  { %v11569_v35 = vpop.f32.mrb[18].mxu0 }
0x10de   :  { %v4339_v48 = vsel %vm217_vm2, %v11569_v35, 0.0  ;;  %v4347_v54 = vmul.f32 %v11569_v35, %v11569_v35  ;;  %v8198_v20 = vpop.f32.mrb[19].mxu0 }
0x10df   :  { %v4340_v59 = vrot.slane %v4339_v48, 4 }
0x10e0   :  { %v4348_v49 = vsel %vm217_vm2, %v4347_v54, 0.0  ;;  %v12138_v54 = vld [vmem:[#allocation31_spill] sm:$0xff] }
0x10e1   :  { %v4341_v46 = vadd.f32 %v4340_v59, %v4339_v48  ;;  %v4349_v40 = vrot.slane %v4348_v49, 4  ;;  %v12137_v48 = vld [vmem:[#allocation30_spill] sm:$0xff]  ;;  %v5026_v59 = vld [vmem:[#allocation2 + $0x540] sm:$0xff] }
0x10e3   :  { %v4342_v41 = vrot.slane %v4341_v46, 2  ;;  %v4350_v47 = vadd.f32 %v4349_v40, %v4348_v49  ;;  %v5027_v49 = vld [vmem:[#allocation2 + $0x548] sm:$0xff]  ;;  %v5028_v40 = vld [vmem:[#allocation2 + $0x550] sm:$0xff] }
0x10e5   :  { %v4343_v33 = vadd.f32 %v4342_v41, %v4341_v46  ;;  %v4351_v21 = vrot.slane %v4350_v47, 2  ;;  %v9806_v46 = vpack.c.bf16 %v5027_v49, %v5026_v59  ;;  %v5029_v41 = vld [vmem:[#allocation2 + $0x558] sm:$0xff]  ;;  %v12147_v59 = vld [vmem:[#allocation54_spill] sm:$0xff] }
0x10e6   :  { %v12148_v49 = vld [vmem:[#allocation40_spill] sm:$0xff] }
0x10e7   :  { %v4344_v25 = vrot.slane %v4343_v33, 1  ;;  %v4352_v18 = vadd.f32 %v4351_v21, %v4350_v47  ;;  %v9809_v47 = vpack.c.bf16 %v5029_v41, %v5028_v40  ;;  %v5031_v21 = vld [vmem:[#allocation2 + $0x568] sm:$0xff]  ;;  %v12151_v41 = vld [vmem:[#allocation43_spill] sm:$0xff] }
0x10e8   :  { %v12150_v40 = vld [vmem:[#allocation42_spill] sm:$0xff] }
0x10e9   :  { %v4345_v16 = vadd.f32 %v4344_v25, %v4343_v33  ;;  %v4353_v13 = vrot.slane %v4352_v18, 1  ;;  %v5030_v33 = vld [vmem:[#allocation2 + $0x560] sm:$0xff] }
0x10ea   :  { %v9812_v25 = vpack.c.bf16 %v5031_v21, %v5030_v33  ;;  %v12153_v33 = vld [vmem:[#allocation45_spill] sm:$0xff]  ;;  %v12154_v21 = vld [vmem:[#allocation46_spill] sm:$0xff] }
0x10eb   :  { %v4354_v50 = vadd.f32 %v4353_v13, %v4352_v18  ;;  %v4346_v29 = vmul.f32 0.25, %v4345_v16  ;;  %v5032_v18 = vld [vmem:[#allocation2 + $0x570] sm:$0xff]  ;;  %v5033_v16 = vld [vmem:[#allocation2 + $0x578] sm:$0xff] }
0x10ec   :  { %v9815_v13 = vpack.c.bf16 %v5033_v16, %v5032_v18  ;;  %v5784_v18 = vld [vmem:[#allocation2 + $0x588] sm:$0xff]  ;;  %v12155_v16 = vld [vmem:[#allocation55_spill] sm:$0xff] }
0x10ed   :  { %v4355_v43 = vmul.f32 0.25, %v4354_v50 }
0x10ef   :  { %v4356_v8 = vsel %vm236_vm3, %v4346_v29, %v4355_v43 }
0x10f0   :  { %v11577_v27 = vand.u32 4294901760, %v4356_v8 }
0x10f2   :  { %v11580_v55 = vsub.f32 %v4356_v8, %v11577_v27 }
0x10f4   :  { %v4440_v3 = vand.u32 4294901760, %v11580_v55 }
0x10f6   :  { %v4441_v34 = vsub.f32 %v11580_v55, %v4440_v3 }
0x10f8   :  { %v4442_v23 = vand.u32 4294901760, %v4441_v34 }
0x10fa   :  { %8232 = vmatmul.mubr.f32.vlgmr.msra.gmra.mrb[20].mxu0 %v4442_v23 }
0x10fb   :  { %9675 = vmatpush3.bf16.msra.mxu0 %v12115_v14  ;;  %8266 = vmatprep.mubr.msk.f32.mxu0 %vm10107_vm0, %v12037_v6 }
0x10fc   :  { %9676 = vmatprep.subr.bf16.mxu0 %v12038_v57 }
0x10ff   :  { %9678 = vmatpush3.bf16.msra.mxu0 %v12116_v4 }
0x1100   :  { %9679 = vmatprep.subr.bf16.mxu0 %v12038_v57 }
0x1103   :  { %9681 = vmatpush3.bf16.msra.mxu0 %v12117_v22 }
0x1104   :  { %9682 = vmatprep.subr.bf16.mxu0 %v12038_v57 }
0x1107   :  { %9684 = vmatpush3.bf16.msra.mxu0 %v12118_v51 }
0x1108   :  { %9685 = vmatprep.subr.bf16.mxu0 %v12038_v57 }
0x110b   :  { %9687 = vmatpush3.bf16.msra.mxu0 %v12119_v42  ;;  %v12139_v42 = vld [vmem:[#allocation32_spill] sm:$0xff] }
0x110c   :  { %9688 = vmatprep.subr.bf16.mxu0 %v12038_v57 }
0x110f   :  { %9690 = vmatpush3.bf16.msra.mxu0 %v12120_v26  ;;  %v12140_v26 = vld [vmem:[#allocation33_spill] sm:$0xff] }
0x1110   :  { %9691 = vmatprep.subr.bf16.mxu0 %v12038_v57 }
0x1113   :  { %9693 = vmatpush3.bf16.msra.mxu0 %v12121_v60  ;;  %v12142_v60 = vld [vmem:[#allocation35_spill] sm:$0xff] }
0x1114   :  { %9694 = vmatprep.subr.bf16.mxu0 %v12038_v57 }
0x1117   :  { %9696 = vmatpush3.bf16.msra.mxu0 %v12122_v30  ;;  %v12143_v30 = vld [vmem:[#allocation36_spill] sm:$0xff] }
0x1118   :  { %9697 = vmatprep.subr.bf16.mxu0 %v12038_v57 }
0x111a   :  { %8267 = vmatmul.mubr.f32.vlgmr.msra.gmra.mrb[20].mxu0 %v11577_v27 }
0x111b   :  { %9699 = vmatpush3.bf16.msra.mxu0 %v12123_v61  ;;  %8301 = vmatprep.mubr.msk.f32.mxu0 %vm10107_vm0, %v12037_v6  ;;  %v12146_v61 = vld [vmem:[#allocation39_spill] sm:$0xff] }
0x111c   :  { %9700 = vmatprep.subr.bf16.mxu0 %v12038_v57 }
0x111f   :  { %9702 = vmatpush3.bf16.msra.mxu0 %v12124_v37 }
0x1120   :  { %9703 = vmatprep.subr.bf16.mxu0 %v12038_v57 }
0x1123   :  { %9705 = vmatpush3.bf16.msra.mxu0 %v12125_v63 }
0x1124   :  { %9706 = vmatprep.subr.bf16.mxu0 %v12038_v57 }
0x1127   :  { %9708 = vmatpush3.bf16.msra.mxu0 %v12126_v44 }
0x1128   :  { %9709 = vmatprep.subr.bf16.mxu0 %v12038_v57 }
0x112b   :  { %9711 = vmatpush3.bf16.msra.mxu0 %v12127_v1 }
0x112c   :  { %9712 = vmatprep.subr.bf16.mxu0 %v12038_v57 }
0x112f   :  { %9714 = vmatpush3.bf16.msra.mxu0 %v12128_v53 }
0x1130   :  { %9715 = vmatprep.subr.bf16.mxu0 %v12038_v57 }
0x1133   :  { %9717 = vmatpush3.bf16.msra.mxu0 %v12129_v9 }
0x1134   :  { %9718 = vmatprep.subr.bf16.mxu0 %v12038_v57 }
0x1137   :  { %9720 = vmatpush3.bf16.msra.mxu0 %v12130_v24 }
0x1138   :  { %9721 = vmatprep.subr.bf16.mxu0 %v12038_v57 }
0x113a   :  { %8302 = vmatmul.mubr.f32.vlgmr.msra.gmra.mrb[20].mxu0 %v11580_v55 }
0x113b   :  { %9723 = vmatpush3.bf16.msra.mxu0 %v10175_v58  ;;  %8336 = vmatprep.mubr.msk.f32.mxu0 %vm10107_vm0, %v12037_v6 }
0x113c   :  { %9724 = vmatprep.subr.bf16.mxu0 %v12038_v57 }
0x113f   :  { %9726 = vmatpush3.bf16.msra.mxu0 %v10181_v2 }
0x1140   :  { %9727 = vmatprep.subr.bf16.mxu0 %v12038_v57 }
0x1143   :  { %9729 = vmatpush3.bf16.msra.mxu0 %v10185_v7 }
0x1144   :  { %9730 = vmatprep.subr.bf16.mxu0 %v12038_v57 }
0x1147   :  { %9732 = vmatpush3.bf16.msra.mxu0 %v10189_v12 }
0x1148   :  { %9733 = vmatprep.subr.bf16.mxu0 %v12038_v57 }
0x114b   :  { %9735 = vmatpush3.bf16.msra.mxu0 %v10193_v17 }
0x114c   :  { %9736 = vmatprep.subr.bf16.mxu0 %v12038_v57 }
0x114f   :  { %9738 = vmatpush3.bf16.msra.mxu0 %v12112_v32 }
0x1150   :  { %9739 = vmatprep.subr.bf16.mxu0 %v12038_v57 }
0x1153   :  { %9741 = vmatpush3.bf16.msra.mxu0 %v12113_v56 }
0x1154   :  { %9742 = vmatprep.subr.bf16.mxu0 %v12038_v57 }
0x1157   :  { %9744 = vmatpush3.bf16.msra.mxu0 %v12114_v62 }
0x1158   :  { %9745 = vmatprep.subr.bf16.mxu0 %v12038_v57 }
0x115a   :  { %8337 = vmatmul.mubr.f32.vlgmr.msra.gmra.mrb[20].mxu0 %v4440_v3 }
0x115b   :  { %9747 = vmatpush3.bf16.msra.mxu0 %v12131_v38  ;;  %8371 = vmatprep.mubr.msk.f32.mxu0 %vm10107_vm0, %v12037_v6 }
0x115c   :  { %9748 = vmatprep.subr.bf16.mxu0 %v12038_v57 }
0x115f   :  { %9750 = vmatpush3.bf16.msra.mxu0 %v12132_v28 }
0x1160   :  { %9751 = vmatprep.subr.bf16.mxu0 %v12038_v57 }
0x1163   :  { %9753 = vmatpush3.bf16.msra.mxu0 %v12133_v11 }
0x1164   :  { %9754 = vmatprep.subr.bf16.mxu0 %v12038_v57 }
0x1167   :  { %9756 = vmatpush3.bf16.msra.mxu0 %v12134_v52 }
0x1168   :  { %9757 = vmatprep.subr.bf16.mxu0 %v12038_v57 }
0x116b   :  { %9759 = vmatpush3.bf16.msra.mxu0 %v12135_v10 }
0x116c   :  { %9760 = vmatprep.subr.bf16.mxu0 %v12038_v57 }
0x116f   :  { %9762 = vmatpush3.bf16.msra.mxu0 %v12136_v31 }
0x1170   :  { %9763 = vmatprep.subr.bf16.mxu0 %v12038_v57 }
0x1173   :  { %9765 = vmatpush3.bf16.msra.mxu0 %v12137_v48 }
0x1174   :  { %9766 = vmatprep.subr.bf16.mxu0 %v12038_v57 }
0x1177   :  { %9768 = vmatpush3.bf16.msra.mxu0 %v12138_v54 }
0x1178   :  { %9769 = vmatprep.subr.bf16.mxu0 %v12038_v57 }
0x117a   :  { %8372 = vmatmul.mubr.f32.vlgmr.msra.gmra.mrb[20].mxu0 %v11577_v27 }
0x117b   :  { %9771 = vmatpush3.bf16.msra.mxu0 %v10175_v58  ;;  %8406 = vmatprep.mubr.msk.f32.mxu0 %vm10107_vm0, %v12037_v6  ;;  %v5020_v58 = vld [vmem:[#allocation2 + $0x510] sm:$0xff] }
0x117c   :  { %9772 = vmatprep.subr.bf16.mxu0 %v12038_v57 }
0x117f   :  { %9774 = vmatpush3.bf16.msra.mxu0 %v10181_v2  ;;  %v5021_v2 = vld [vmem:[#allocation2 + $0x518] sm:$0xff] }
0x1180   :  { %9775 = vmatprep.subr.bf16.mxu0 %v12038_v57 }
0x1183   :  { %9777 = vmatpush3.bf16.msra.mxu0 %v10185_v7  ;;  %v9797_v7 = vpack.c.bf16 %v5021_v2, %v5020_v58 }
0x1184   :  { %9778 = vmatprep.subr.bf16.mxu0 %v12038_v57 }
0x1185   :  { %9798 = vmatpush3.bf16.msra.mxu1 %v9797_v7 }
0x1186   :  { %9799 = vmatprep.subr.bf16.mxu1 %v12038_v57 }
0x1187   :  { %9780 = vmatpush3.bf16.msra.mxu0 %v10189_v12  ;;  %v5022_v12 = vld [vmem:[#allocation2 + $0x520] sm:$0xff] }
0x1188   :  { %9781 = vmatprep.subr.bf16.mxu0 %v12038_v57 }
0x118b   :  { %9783 = vmatpush3.bf16.msra.mxu0 %v10193_v17  ;;  %v5023_v17 = vld [vmem:[#allocation2 + $0x528] sm:$0xff] }
0x118c   :  { %9784 = vmatprep.subr.bf16.mxu0 %v12038_v57 }
0x118f   :  { %9786 = vmatpush3.bf16.msra.mxu0 %v12112_v32  ;;  %v9800_v32 = vpack.c.bf16 %v5023_v17, %v5022_v12 }
0x1190   :  { %9787 = vmatprep.subr.bf16.mxu0 %v12038_v57 }
0x1191   :  { %9801 = vmatpush3.bf16.msra.mxu1 %v9800_v32 }
0x1192   :  { %9802 = vmatprep.subr.bf16.mxu1 %v12038_v57 }
0x1193   :  { %9789 = vmatpush3.bf16.msra.mxu0 %v12113_v56  ;;  %v5024_v56 = vld [vmem:[#allocation2 + $0x530] sm:$0xff] }
0x1194   :  { %9790 = vmatprep.subr.bf16.mxu0 %v12038_v57 }
0x1197   :  { %9792 = vmatpush3.bf16.msra.mxu0 %v12114_v62  ;;  %v5025_v62 = vld [vmem:[#allocation2 + $0x538] sm:$0xff] }
0x1198   :  { %9961 = vmatprep.subr.bf16.mxu0 %v12038_v57  ;;  %v9803_v20 = vpack.c.bf16 %v5025_v62, %v5024_v56 }
0x119a   :  { %8407 = vmatmul.mubr.f32.vlgmr.msra.gmra.mrb[20].mxu0 %v11577_v27  ;;  %9804 = vmatpush3.bf16.msra.mxu1 %v9803_v20 }
0x119b   :  { %8686 = vmatprep.mubr.msk.f32.mxu0 %vm10107_vm0, %v12037_v6  ;;  %9805 = vmatprep.subr.bf16.mxu1 %v12038_v57 }
0x119e   :  { %9807 = vmatpush3.bf16.msra.mxu1 %v9806_v46  ;;  %v12149_v46 = vld [vmem:[#allocation41_spill] sm:$0xff] }
0x119f   :  { %9808 = vmatprep.subr.bf16.mxu1 %v12038_v57 }
0x11a2   :  { %9810 = vmatpush3.bf16.msra.mxu1 %v9809_v47  ;;  %v12152_v47 = vld [vmem:[#allocation44_spill] sm:$0xff] }
0x11a3   :  { %9811 = vmatprep.subr.bf16.mxu1 %v12038_v57 }
0x11a6   :  { %9813 = vmatpush3.bf16.msra.mxu1 %v9812_v25  ;;  %v5783_v25 = vld [vmem:[#allocation2 + $0x580] sm:$0xff] }
0x11a7   :  { %9814 = vmatprep.subr.bf16.mxu1 %v12038_v57 }
0x11aa   :  { %9816 = vmatpush3.bf16.msra.mxu1 %v9815_v13  ;;  %v9962_v13 = vpack.c.bf16 %v5784_v18, %v5783_v25 }
0x11ab   :  { %9817 = vmatprep.subr.bf16.mxu1 %v12038_v57 }
0x11ac   :  { %9963 = vmatpush3.bf16.msra.mxu0 %v9962_v13 }
0x11ad   :  { %9964 = vmatprep.subr.bf16.mxu0 %v12038_v57 }
0x126d   :  { %v4994_v50 = vpop.f32.mrb[20].mxu0 }
0x126e   :  { %v4998_v29 = vmul.f32 %v4994_v50, %v4994_v50  ;;  %v5006_v43 = vrot.slane %v4994_v50, %v10535_v39  ;;  %v8408_v8 = vpop.f32.mrb[21].mxu0 }
0x126f   :  { %v12159_v8 = vld [vmem:[#allocation50_spill] sm:$0xff] }
0x1270   :  { %v5000_v27 = vrot.slane %v4998_v29, 7  ;;  %v5007_v55 = vsub.f32 %v11569_v35, %v5006_v43  ;;  %v12141_v35 = vld [vmem:[#allocation34_spill] sm:$0xff]  ;;  %v12157_v29 = vld [vmem:[#allocation48_spill] sm:$0xff]  ;;  %v12158_v43 = vld [vmem:[#allocation49_spill] sm:$0xff] }
0x1272   :  { %v5002_v3 = vsub.f32 %v4994_v50, %v5000_v27  ;;  %v12156_v50 = vld [vmem:[#allocation47_spill] sm:$0xff] }
0x1273   :  { %v12160_v27 = vld [vmem:[#allocation51_spill] sm:$0xff] }
0x1274   :  { %v5008_v34 = vadd.f32 1e-05, %v5002_v3  ;;  %v12162_v3 = vld [vmem:[#allocation53_spill] sm:$0xff] }
0x1276   :  { %10075 = vrsqrt.f32 %v5008_v34  ;;  %v12163_v34 = vld [vmem:[#allocation56_spill] sm:$0xff] }
0x1280   :  { %v10076_v23 = vpop.eup %10075 }
0x1281   :  { %v5013_v14 = vrot.slane %v10076_v23, %v10539_v19  ;;  %v12164_v23 = vld [vmem:[#allocation57_spill] sm:$0xff] }
0x1283   :  { %v5014_v4 = vmul.f32 %v5013_v14, %v5007_v55  ;;  %v12161_v55 = vld [vmem:[#allocation52_spill] sm:$0xff]  ;;  %v12165_v14 = vld [vmem:[#allocation58_spill] sm:$0xff] }
0x1285   :  { %vm5015_vm8 = vcmp.gt.f32.partialorder %v5014_v4, 0.0  ;;  %v5016_v22 = vmul.f32 0.2, %v5014_v4 }
0x1287   :  { %v5017_v51 = vsel %vm5015_vm8, %v5014_v4, %v5016_v22  ;;  %v12166_v4 = vld [vmem:[#allocation59_spill] sm:$0xff]  ;;  %v12167_v22 = vld [vmem:[#allocation60_spill] sm:$0xff] }
0x1288   :  { %8442 = vmatmul.mubr.f32.vlgmr.msra.gmra.mrb[10].mxu1 %v5017_v51  ;;  %v12168_v51 = vld [vmem:[#allocation61_spill] sm:$0xff] }
0x1289   :  { %9819 = vmatpush3.bf16.msra.mxu1 %v12139_v42  ;;  %8476 = vmatprep.mubr.msk.f32.mxu1 %vm10107_vm0, %v12037_v6 }
0x128a   :  { %9820 = vmatprep.subr.bf16.mxu1 %v12038_v57 }
0x128d   :  { %9822 = vmatpush3.bf16.msra.mxu1 %v12140_v26 }
0x128e   :  { %9823 = vmatprep.subr.bf16.mxu1 %v12038_v57 }
0x1291   :  { %9825 = vmatpush3.bf16.msra.mxu1 %v12141_v35 }
0x1292   :  { %9826 = vmatprep.subr.bf16.mxu1 %v12038_v57 }
0x1295   :  { %9828 = vmatpush3.bf16.msra.mxu1 %v12142_v60 }
0x1296   :  { %9829 = vmatprep.subr.bf16.mxu1 %v12038_v57 }
0x1299   :  { %9831 = vmatpush3.bf16.msra.mxu1 %v12143_v30 }
0x129a   :  { %9832 = vmatprep.subr.bf16.mxu1 %v12038_v57 }
0x129d   :  { %9834 = vmatpush3.bf16.msra.mxu1 %v12144_v36 }
0x129e   :  { %9835 = vmatprep.subr.bf16.mxu1 %v12038_v57 }
0x12a1   :  { %9837 = vmatpush3.bf16.msra.mxu1 %v12145_v45 }
0x12a2   :  { %9838 = vmatprep.subr.bf16.mxu1 %v12038_v57 }
0x12a5   :  { %9840 = vmatpush3.bf16.msra.mxu1 %v12146_v61 }
0x12a6   :  { %9841 = vmatprep.subr.bf16.mxu1 %v12038_v57 }
0x135b   :  { %v11709_v0 = vpop.f32.mrb[10].mxu1 }
0x135c   :  { %v5104_v37 = vsel %vm217_vm2, %v11709_v0, 0.0  ;;  %v5112_v63 = vmul.f32 %v11709_v0, %v11709_v0  ;;  %v8443_v44 = vpop.f32.mrb[11].mxu1 }
0x135d   :  { %v5105_v1 = vrot.slane %v5104_v37, 4 }
0x135e   :  { %v5113_v53 = vsel %vm217_vm2, %v5112_v63, 0.0  ;;  %v12170_v63 = vld [vmem:[#allocation63_spill] sm:$0xff] }
0x135f   :  { %v5106_v9 = vadd.f32 %v5105_v1, %v5104_v37  ;;  %v5114_v24 = vrot.slane %v5113_v53, 4  ;;  %v12169_v37 = vld [vmem:[#allocation62_spill] sm:$0xff] }
0x1360   :  { %v5792_v1 = vld [vmem:[#allocation2 + $0x5c8] sm:$0xff] }
0x1361   :  { %v5107_v38 = vrot.slane %v5106_v9, 2  ;;  %v5115_v28 = vadd.f32 %v5114_v24, %v5113_v53  ;;  %v5794_v24 = vld [vmem:[#allocation2 + $0x5d8] sm:$0xff] }
0x1363   :  { %v5108_v11 = vadd.f32 %v5107_v38, %v5106_v9  ;;  %v5116_v52 = vrot.slane %v5115_v28, 2  ;;  %v5793_v9 = vld [vmem:[#allocation2 + $0x5d0] sm:$0xff] }
0x1364   :  { %v9977_v38 = vpack.c.bf16 %v5794_v24, %v5793_v9 }
0x1365   :  { %v5109_v10 = vrot.slane %v5108_v11, 1  ;;  %v5117_v31 = vadd.f32 %v5116_v52, %v5115_v28  ;;  %v5795_v28 = vld [vmem:[#allocation2 + $0x5e0] sm:$0xff] }
0x1367   :  { %v5110_v48 = vadd.f32 %v5109_v10, %v5108_v11  ;;  %v5118_v54 = vrot.slane %v5117_v31, 1  ;;  %v5796_v11 = vld [vmem:[#allocation2 + $0x5e8] sm:$0xff]  ;;  %v5797_v10 = vld [vmem:[#allocation2 + $0x5f0] sm:$0xff] }
0x1368   :  { %v9980_v52 = vpack.c.bf16 %v5796_v11, %v5795_v28 }
0x1369   :  { %v5119_v58 = vadd.f32 %v5118_v54, %v5117_v31  ;;  %v5111_v2 = vmul.f32 0.25, %v5110_v48  ;;  %v5798_v31 = vld [vmem:[#allocation2 + $0x5f8] sm:$0xff] }
0x136a   :  { %v9983_v48 = vpack.c.bf16 %v5798_v31, %v5797_v10 }
0x136b   :  { %v5120_v7 = vmul.f32 0.25, %v5119_v58 }
0x136d   :  { %v5121_v12 = vsel %vm236_vm3, %v5111_v2, %v5120_v7 }
0x136e   :  { %v11717_v17 = vand.u32 4294901760, %v5121_v12 }
0x1370   :  { %v11720_v32 = vsub.f32 %v5121_v12, %v11717_v17 }
0x1372   :  { %v5205_v56 = vand.u32 4294901760, %v11720_v32 }
0x1374   :  { %v5206_v62 = vsub.f32 %v11720_v32, %v5205_v56 }
0x1376   :  { %v5207_v20 = vand.u32 4294901760, %v5206_v62 }
0x1378   :  { %8477 = vmatmul.mubr.f32.vlgmr.msra.gmra.mrb[12].mxu1 %v5207_v20 }
0x1379   :  { %9843 = vmatpush3.bf16.msra.mxu1 %v12147_v59  ;;  %8511 = vmatprep.mubr.msk.f32.mxu1 %vm10107_vm0, %v12037_v6 }
0x137a   :  { %9844 = vmatprep.subr.bf16.mxu1 %v12038_v57 }
0x137d   :  { %9846 = vmatpush3.bf16.msra.mxu1 %v12148_v49 }
0x137e   :  { %9847 = vmatprep.subr.bf16.mxu1 %v12038_v57 }
0x1381   :  { %9849 = vmatpush3.bf16.msra.mxu1 %v12149_v46 }
0x1382   :  { %9850 = vmatprep.subr.bf16.mxu1 %v12038_v57 }
0x1385   :  { %9852 = vmatpush3.bf16.msra.mxu1 %v12150_v40 }
0x1386   :  { %9853 = vmatprep.subr.bf16.mxu1 %v12038_v57 }
0x1389   :  { %9855 = vmatpush3.bf16.msra.mxu1 %v12151_v41 }
0x138a   :  { %9856 = vmatprep.subr.bf16.mxu1 %v12038_v57 }
0x138d   :  { %9858 = vmatpush3.bf16.msra.mxu1 %v12152_v47 }
0x138e   :  { %9859 = vmatprep.subr.bf16.mxu1 %v12038_v57 }
0x1391   :  { %9861 = vmatpush3.bf16.msra.mxu1 %v12153_v33 }
0x1392   :  { %9862 = vmatprep.subr.bf16.mxu1 %v12038_v57 }
0x1395   :  { %9864 = vmatpush3.bf16.msra.mxu1 %v12154_v21 }
0x1396   :  { %9865 = vmatprep.subr.bf16.mxu1 %v12038_v57 }
0x1398   :  { %8512 = vmatmul.mubr.f32.vlgmr.msra.gmra.mrb[12].mxu1 %v11717_v17 }
0x1399   :  { %9867 = vmatpush3.bf16.msra.mxu1 %v12155_v16  ;;  %8546 = vmatprep.mubr.msk.f32.mxu1 %vm10107_vm0, %v12037_v6 }
0x139a   :  { %9868 = vmatprep.subr.bf16.mxu1 %v12038_v57 }
0x139d   :  { %9870 = vmatpush3.bf16.msra.mxu1 %v12156_v50 }
0x139e   :  { %9871 = vmatprep.subr.bf16.mxu1 %v12038_v57 }
0x13a1   :  { %9873 = vmatpush3.bf16.msra.mxu1 %v12157_v29 }
0x13a2   :  { %9874 = vmatprep.subr.bf16.mxu1 %v12038_v57 }
0x13a5   :  { %9876 = vmatpush3.bf16.msra.mxu1 %v12158_v43 }
0x13a6   :  { %9877 = vmatprep.subr.bf16.mxu1 %v12038_v57 }
0x13a9   :  { %9879 = vmatpush3.bf16.msra.mxu1 %v12159_v8 }
0x13aa   :  { %9880 = vmatprep.subr.bf16.mxu1 %v12038_v57 }
0x13ad   :  { %9882 = vmatpush3.bf16.msra.mxu1 %v12160_v27 }
0x13ae   :  { %9883 = vmatprep.subr.bf16.mxu1 %v12038_v57 }
0x13b1   :  { %9885 = vmatpush3.bf16.msra.mxu1 %v12161_v55 }
0x13b2   :  { %9886 = vmatprep.subr.bf16.mxu1 %v12038_v57 }
0x13b5   :  { %9888 = vmatpush3.bf16.msra.mxu1 %v12162_v3 }
0x13b6   :  { %9889 = vmatprep.subr.bf16.mxu1 %v12038_v57 }
0x13b8   :  { %8547 = vmatmul.mubr.f32.vlgmr.msra.gmra.mrb[12].mxu1 %v11720_v32 }
0x13b9   :  { %9891 = vmatpush3.bf16.msra.mxu1 %v12139_v42  ;;  %8581 = vmatprep.mubr.msk.f32.mxu1 %vm10107_vm0, %v12037_v6 }
0x13ba   :  { %9892 = vmatprep.subr.bf16.mxu1 %v12038_v57 }
0x13bd   :  { %9894 = vmatpush3.bf16.msra.mxu1 %v12140_v26 }
0x13be   :  { %9895 = vmatprep.subr.bf16.mxu1 %v12038_v57 }
0x13c1   :  { %9897 = vmatpush3.bf16.msra.mxu1 %v12141_v35 }
0x13c2   :  { %9898 = vmatprep.subr.bf16.mxu1 %v12038_v57 }
0x13c5   :  { %9900 = vmatpush3.bf16.msra.mxu1 %v12142_v60 }
0x13c6   :  { %9901 = vmatprep.subr.bf16.mxu1 %v12038_v57 }
0x13c9   :  { %9903 = vmatpush3.bf16.msra.mxu1 %v12143_v30 }
0x13ca   :  { %9904 = vmatprep.subr.bf16.mxu1 %v12038_v57 }
0x13cd   :  { %9906 = vmatpush3.bf16.msra.mxu1 %v12144_v36 }
0x13ce   :  { %9907 = vmatprep.subr.bf16.mxu1 %v12038_v57 }
0x13d1   :  { %9909 = vmatpush3.bf16.msra.mxu1 %v12145_v45 }
0x13d2   :  { %9910 = vmatprep.subr.bf16.mxu1 %v12038_v57 }
0x13d5   :  { %9912 = vmatpush3.bf16.msra.mxu1 %v12146_v61 }
0x13d6   :  { %9913 = vmatprep.subr.bf16.mxu1 %v12038_v57 }
0x13d8   :  { %8582 = vmatmul.mubr.f32.vlgmr.msra.gmra.mrb[12].mxu1 %v5205_v56 }
0x13d9   :  { %9915 = vmatpush3.bf16.msra.mxu1 %v12163_v34  ;;  %8616 = vmatprep.mubr.msk.f32.mxu1 %vm10107_vm0, %v12037_v6 }
0x13da   :  { %9916 = vmatprep.subr.bf16.mxu1 %v12038_v57 }
0x13dd   :  { %9918 = vmatpush3.bf16.msra.mxu1 %v12164_v23 }
0x13de   :  { %9919 = vmatprep.subr.bf16.mxu1 %v12038_v57 }
0x13e1   :  { %9921 = vmatpush3.bf16.msra.mxu1 %v12165_v14 }
0x13e2   :  { %9922 = vmatprep.subr.bf16.mxu1 %v12038_v57 }
0x13e5   :  { %9924 = vmatpush3.bf16.msra.mxu1 %v12166_v4 }
0x13e6   :  { %9925 = vmatprep.subr.bf16.mxu1 %v12038_v57 }
0x13e9   :  { %9927 = vmatpush3.bf16.msra.mxu1 %v12167_v22 }
0x13ea   :  { %9928 = vmatprep.subr.bf16.mxu1 %v12038_v57 }
0x13ed   :  { %9930 = vmatpush3.bf16.msra.mxu1 %v12168_v51 }
0x13ee   :  { %9931 = vmatprep.subr.bf16.mxu1 %v12038_v57 }
0x13f1   :  { %9933 = vmatpush3.bf16.msra.mxu1 %v12169_v37 }
0x13f2   :  { %9934 = vmatprep.subr.bf16.mxu1 %v12038_v57 }
0x13f5   :  { %9936 = vmatpush3.bf16.msra.mxu1 %v12170_v63 }
0x13f6   :  { %9937 = vmatprep.subr.bf16.mxu1 %v12038_v57 }
0x13f8   :  { %8617 = vmatmul.mubr.f32.vlgmr.msra.gmra.mrb[12].mxu1 %v11717_v17 }
0x13f9   :  { %9939 = vmatpush3.bf16.msra.mxu1 %v12139_v42  ;;  %8651 = vmatprep.mubr.msk.f32.mxu1 %vm10107_vm0, %v12037_v6  ;;  %v5785_v6 = vld [vmem:[#allocation2 + $0x590] sm:$0xff]  ;;  %v5786_v42 = vld [vmem:[#allocation2 + $0x598] sm:$0xff] }
0x13fa   :  { %9940 = vmatprep.subr.bf16.mxu1 %v12038_v57 }
0x13fd   :  { %9942 = vmatpush3.bf16.msra.mxu1 %v12140_v26  ;;  %v9965_v26 = vpack.c.bf16 %v5786_v42, %v5785_v6 }
0x13fe   :  { %9943 = vmatprep.subr.bf16.mxu1 %v12038_v57 }
0x13ff   :  { %9966 = vmatpush3.bf16.msra.mxu0 %v9965_v26 }
0x1400   :  { %9967 = vmatprep.subr.bf16.mxu0 %v12038_v57 }
0x1401   :  { %9945 = vmatpush3.bf16.msra.mxu1 %v12141_v35  ;;  %v5787_v35 = vld [vmem:[#allocation2 + $0x5a0] sm:$0xff] }
0x1402   :  { %9946 = vmatprep.subr.bf16.mxu1 %v12038_v57 }
0x1405   :  { %9948 = vmatpush3.bf16.msra.mxu1 %v12142_v60  ;;  %v5788_v60 = vld [vmem:[#allocation2 + $0x5a8] sm:$0xff] }
0x1406   :  { %9949 = vmatprep.subr.bf16.mxu1 %v12038_v57 }
0x1409   :  { %9951 = vmatpush3.bf16.msra.mxu1 %v12143_v30  ;;  %v9968_v30 = vpack.c.bf16 %v5788_v60, %v5787_v35 }
0x140a   :  { %9952 = vmatprep.subr.bf16.mxu1 %v12038_v57 }
0x140b   :  { %9969 = vmatpush3.bf16.msra.mxu0 %v9968_v30 }
0x140c   :  { %9970 = vmatprep.subr.bf16.mxu0 %v12038_v57 }
0x140d   :  { %9954 = vmatpush3.bf16.msra.mxu1 %v12144_v36  ;;  %v5789_v36 = vld [vmem:[#allocation2 + $0x5b0] sm:$0xff] }
0x140e   :  { %9955 = vmatprep.subr.bf16.mxu1 %v12038_v57 }
0x1411   :  { %9957 = vmatpush3.bf16.msra.mxu1 %v12145_v45  ;;  %v5790_v45 = vld [vmem:[#allocation2 + $0x5b8] sm:$0xff] }
0x1412   :  { %9958 = vmatprep.subr.bf16.mxu1 %v12038_v57  ;;  %v9971_v44 = vpack.c.bf16 %v5790_v45, %v5789_v36 }
0x1414   :  { %9972 = vmatpush3.bf16.msra.mxu0 %v9971_v44 }
0x1415   :  { %9960 = vmatpush3.bf16.msra.mxu1 %v12146_v61  ;;  %9973 = vmatprep.subr.bf16.mxu0 %v12038_v57  ;;  %v5791_v61 = vld [vmem:[#allocation2 + $0x5c0] sm:$0xff] }
0x1416   :  { %v9974_v53 = vpack.c.bf16 %v5792_v1, %v5791_v61 }
0x1418   :  { %8652 = vmatmul.mubr.f32.vlgmr.msra.gmra.mrb[12].mxu1 %v11717_v17  ;;  %9975 = vmatpush3.bf16.msra.mxu0 %v9974_v53 }
0x1419   :  { %9976 = vmatprep.subr.bf16.mxu0 %v12038_v57 }
0x141c   :  { %9978 = vmatpush3.bf16.msra.mxu0 %v9977_v38 }
0x141d   :  { %9979 = vmatprep.subr.bf16.mxu0 %v12038_v57 }
0x1420   :  { %9981 = vmatpush3.bf16.msra.mxu0 %v9980_v52 }
0x1421   :  { %9982 = vmatprep.subr.bf16.mxu0 %v12038_v57 }
0x1424   :  { %9984 = vmatpush3.bf16.msra.mxu0 %v9983_v48 }
0x14eb   :  { %v5759_v54 = vpop.f32.mrb[12].mxu1 }
0x14ec   :  { %v5763_v58 = vmul.f32 %v5759_v54, %v5759_v54  ;;  %v5771_v2 = vrot.slane %v5759_v54, %v10535_v39  ;;  %v8653_v7 = vpop.f32.mrb[13].mxu1  ;;  %v5870_v39 = vpop.permute.xlu0 %5869 }
0x14ee   :  { %v5765_v12 = vrot.slane %v5763_v58, 7  ;;  %v5772_v17 = vsub.f32 %v11709_v0, %v5771_v2  ;;  %v4249_v0 = vsel %vm4248_vm10, %v11546_v15, 0.0 }
0x14ef   :  { %v5871_v41 = vadd.f32 %v5870_v39, %v4249_v0 }
0x14f0   :  { %v5767_v32 = vsub.f32 %v5759_v54, %v5765_v12 }
0x14f2   :  { %v5773_v56 = vadd.f32 1e-05, %v5767_v32 }
0x14f4   :  { %10077 = vrsqrt.f32 %v5773_v56 }
0x14fe   :  { %v10078_v62 = vpop.eup %10077 }
0x14ff   :  { %v5778_v20 = vrot.slane %v10078_v62, %v10539_v19 }
0x1501   :  { %v5779_v59 = vmul.f32 %v5778_v20, %v5772_v17 }
0x1503   :  { %vm5780_vm9 = vcmp.gt.f32.partialorder %v5779_v59, 0.0  ;;  %v5781_v57 = vmul.f32 0.2, %v5779_v59 }
0x1505   :  { %v5782_v49 = vsel %vm5780_vm9, %v5779_v59, %v5781_v57 }
0x1506   :  { %8687 = vmatmul.mubr.f32.vlgmr.msra.gmra.mrb[22].mxu0 %v5782_v49 }
0x15d9   :  { %v5865_v46 = vpop.f32.mrb[22].mxu0 }
0x15da   :  { %5872 = vrot.lane.b32.xlu0 %v5865_v46, %s10110_s24  ;;  %v8688_v40 = vpop.f32.mrb[23].mxu0 }
0x164c   :  { %v5873_v47 = vpop.permute.xlu0 %5872 }
0x164d   :  { %v5874_v33 = vadd.f32 %v5873_v47, %v5871_v41 }
0x164f   :  { %5875 = vst [vmem:[%s11834_s2] sm:$0xf] %v5874_v33 }
0x1650   :  { %5880 = vsyncpa [#allocation3], 1 }

</bundles_post_ra>
